<compile_context>
chip_gen: v7x
topology: tpu7x:2x2x1
jax: 0.10.0
libtpu: 0.0.40
codegen_flags: <defaults>
</compile_context>

<pallas_src>
import functools

import numpy as np
import jax
import jax.numpy as jnp
from jax import lax
from jax.experimental import pallas as pl
from jax.experimental.pallas import tpu as pltpu


_PAD = 128  # lane padding on each side of the flattened spatial axis (>= 73)


# ----------------------------------------------------------------------------
# Static tap geometry: flat-index shift + validity mask for each of 27 taps.
# ----------------------------------------------------------------------------
def _tap_offsets_and_masks(D, H, W):
    d = np.arange(D)[:, None, None]
    h = np.arange(H)[None, :, None]
    w = np.arange(W)[None, None, :]
    offsets, masks = [], []
    for kd in range(3):
        for kh in range(3):
            for kw in range(3):
                dd, dh, dw = kd - 1, kh - 1, kw - 1
                offsets.append(dd * H * W + dh * W + dw)
                valid = ((d + dd >= 0) & (d + dd < D) &
                         (h + dh >= 0) & (h + dh < H) &
                         (w + dw >= 0) & (w + dw < W))
                masks.append(valid.reshape(-1))
    # (27, D*H*W) 0/1 mask, matches tap order t = kd*9 + kh*3 + kw
    return tuple(offsets), np.stack(masks).astype(np.float32)


# ----------------------------------------------------------------------------
# Fused kernel: conv1+BN1+ReLU, conv2+BN2, +residual, ReLU — one sample.
# ----------------------------------------------------------------------------
def _basic_block_kernel(x_ref, w1_ref, s1_ref, b1_ref, w2_ref, s2_ref, b2_ref,
                        mask_ref, out_ref, buf_ref, patch_ref, *, S, offsets):
    """Refs (per grid step = one batch sample):
      x_ref   : (C, S)        f32   flattened NCDHW sample (S = D*H*W)
      w*_ref  : (C, 27*C)     bf16  conv weights, columns ordered (tap, ci)
      s*_ref  : (C, 1)        f32   folded BN scale
      b*_ref  : (C, 1)        f32   folded BN bias
      mask_ref: (27, S)       f32   per-tap validity mask (conv padding=1)
      out_ref : (C, S)        f32   lane-dense output
      buf_ref : (C, S+2*_PAD) f32   VMEM scratch, in-VMEM halo padding
      patch_ref:(27*C, S)     f32   VMEM scratch, im2col patch (aligned stores)
    """
    C = x_ref.shape[0]
    n_taps = len(offsets)

    # Zero the halo regions of the flat padded buffer once per sample
    # (interior gets overwritten per conv; masked taps then read exact zeros).
    # Kept unconditional: with "parallel" grid semantics each core owns its
    # own scratch, so a program_id==0 guard would leave one core's halo stale.
    buf_ref[:, :_PAD] = jnp.zeros((C, _PAD), jnp.float32)
    buf_ref[:, _PAD + S:] = jnp.zeros((C, _PAD), jnp.float32)

    def conv3x3x3(inp, w_ref):
        # inp: (C, S) f32 value -> (C, S) f32 conv output.
        buf_ref[:, _PAD:_PAD + S] = inp
        # im2col: one lane-dense (C, S) masked shifted slab per tap, written
        # to sublane-tile-aligned rows (t*C is a multiple of 8) of the f32
        # patch scratch.  Slices are fully static.
        for t in range(n_taps):
            start = _PAD + offsets[t]                  # static, in [55, 201]
            slab = buf_ref[:, start:start + S]         # (C, S) f32
            m = mask_ref[t:t + 1, :]                   # (1, S) 0/1
            patch_ref[t * C:(t + 1) * C, :] = slab * m
        # Single deep MXU matmul: (C, 27*C) @ (27*C, S), bf16 in, f32 acc.
        # Output (C, S) = (8, 512) is lane-dense -> only 4 f32 vregs live.
        return jnp.dot(w_ref[...],
                       patch_ref[...].astype(jnp.bfloat16),
                       preferred_element_type=jnp.float32)

    x = x_ref[...].astype(jnp.float32)

    # conv1 + folded BN1 + ReLU
    h = conv3x3x3(x, w1_ref) * s1_ref[...] + b1_ref[...]
    h = jnp.maximum(h, 0.0)

    # conv2 + folded BN2 + identity shortcut + final ReLU
    y = conv3x3x3(h, w2_ref) * s2_ref[...] + b2_ref[...]
    y = jnp.maximum(y + x, 0.0)

    out_ref[...] = y.astype(out_ref.dtype)


# ----------------------------------------------------------------------------
# Wrapper
# ----------------------------------------------------------------------------
def basic_block_3d(x_ncdhw, params):
    """Full BasicBlock3d forward.  Input/output are NCDHW like PyTorch."""
    N, C, D, H, W = x_ncdhw.shape
    S = D * H * W
    offsets, masks_np = _tap_offsets_and_masks(D, H, W)
    masks = jnp.asarray(masks_np)                      # (27, S) f32
    n_taps = len(offsets)

    # Free contiguous reshape — no transpose, channels stay in sublanes and
    # the flattened spatial axis is the lane-dense minor dim.
    x2d = x_ncdhw.reshape(N, C, S)

    kern = functools.partial(_basic_block_kernel, S=S, offsets=offsets)

    out2d = pl.pallas_call(
        kern,
        out_shape=jax.ShapeDtypeStruct((N, C, S), x_ncdhw.dtype),
        grid=(N,),
        in_specs=[
            pl.BlockSpec((None, C, S), lambda n: (n, 0, 0)),        # x
            pl.BlockSpec((C, n_taps * C), lambda n: (0, 0)),        # w1 (bf16)
            pl.BlockSpec((C, 1), lambda n: (0, 0)),                 # scale1
            pl.BlockSpec((C, 1), lambda n: (0, 0)),                 # bias1
            pl.BlockSpec((C, n_taps * C), lambda n: (0, 0)),        # w2 (bf16)
            pl.BlockSpec((C, 1), lambda n: (0, 0)),                 # scale2
            pl.BlockSpec((C, 1), lambda n: (0, 0)),                 # bias2
            pl.BlockSpec((n_taps, S), lambda n: (0, 0)),            # tap masks
        ],
        out_specs=pl.BlockSpec((None, C, S), lambda n: (n, 0, 0)),
        scratch_shapes=[
            pltpu.VMEM((C, S + 2 * _PAD), jnp.float32),             # padded buf
            pltpu.VMEM((n_taps * C, S), jnp.float32),               # im2col patch
        ],
        compiler_params=pltpu.CompilerParams(
            dimension_semantics=("parallel",)),
    )(x2d, params["w1"], params["scale1"], params["bias1"],
      params["w2"], params["scale2"], params["bias2"], masks)

    return out2d.reshape(N, C, D, H, W)


# ----------------------------------------------------------------------------
# Deterministic parameter construction (folded eval-mode BatchNorm)
# ----------------------------------------------------------------------------
def make_params(key, in_channels, out_channels, eps=1e-5):
    assert in_channels == out_channels, "identity-shortcut branch only"
    ks = jax.random.split(key, 10)
    # PyTorch conv weights: (Cout, Cin, 3, 3, 3)
    w1_oidhw = jax.random.normal(ks[0], (out_channels, in_channels, 3, 3, 3),
                                 jnp.float32) * 0.1
    w2_oidhw = jax.random.normal(ks[1], (out_channels, out_channels, 3, 3, 3),
                                 jnp.float32) * 0.1

    def pack_w(w_oidhw):
        co, ci = w_oidhw.shape[:2]
        # (Co,Ci,kd,kh,kw) -> (Co, kd,kh,kw, Ci) -> (Co, 27*Ci); column index
        # = tap*Ci + ci, matching the kernel's im2col row order.  bf16 = native
        # MXU dtype (accumulation stays f32).
        return jnp.transpose(w_oidhw, (0, 2, 3, 4, 1)).reshape(
            co, 27 * ci).astype(jnp.bfloat16)

    def fold_bn(kg, kb, km, kv, c):
        gamma = 1.0 + 0.1 * jax.random.normal(kg, (c,), jnp.float32)
        beta = 0.1 * jax.random.normal(kb, (c,), jnp.float32)
        mean = 0.1 * jax.random.normal(km, (c,), jnp.float32)
        var = jnp.abs(jax.random.normal(kv, (c,), jnp.float32)) + 0.5
        scale = gamma / jnp.sqrt(var + eps)
        bias = beta - mean * scale
        return scale.reshape(c, 1), bias.reshape(c, 1)

    scale1, bias1 = fold_bn(ks[2], ks[3], ks[4], ks[5], out_channels)
    scale2, bias2 = fold_bn(ks[6], ks[7], ks[8], ks[9], out_channels)
    return dict(w1=pack_w(w1_oidhw), w2=pack_w(w2_oidhw),
                w1_oidhw=w1_oidhw, w2_oidhw=w2_oidhw,
                scale1=scale1, bias1=bias1, scale2=scale2, bias2=bias2)


# ----------------------------------------------------------------------------
# Pure-JAX reference (precision-matched: bf16 conv inputs, f32 accumulation)
# ----------------------------------------------------------------------------
def reference_block(x_ncdhw, params):
    dn = ("NCDHW", "OIDHW", "NCDHW")

    def conv(inp, w):
        return lax.conv_general_dilated(
            inp.astype(jnp.bfloat16), w.astype(jnp.bfloat16),
            window_strides=(1, 1, 1), padding="SAME",
            dimension_numbers=dn, preferred_element_type=jnp.float32)

    def bn(y, scale, bias):
        return y * scale.reshape(1, -1, 1, 1, 1) + bias.reshape(1, -1, 1, 1, 1)

    x = x_ncdhw.astype(jnp.float32)
    h = jnp.maximum(bn(conv(x, params["w1_oidhw"]),
                       params["scale1"], params["bias1"]), 0.0)
    y = bn(conv(h, params["w2_oidhw"]), params["scale2"], params["bias2"]) + x
    return jnp.maximum(y, 0.0)


# ----------------------------------------------------------------------------
if __name__ == "__main__":
    key = jax.random.PRNGKey(0)
    k_x, k_p = jax.random.split(key)

    N, C, D, H, W = 2, 8, 8, 8, 8       # in_channels == out_channels, stride=1
    x = jax.random.normal(k_x, (N, C, D, H, W), jnp.float32)
    params = make_params(k_p, C, C)

    out = jax.block_until_ready(basic_block_3d(x, params))
    ref = jax.block_until_ready(reference_block(x, params))

    assert out.shape == (N, C, D, H, W)
    max_err = float(jnp.max(jnp.abs(out - ref)))
    assert jnp.allclose(out, ref, rtol=2e-3, atol=2e-3), max_err

    print("KERNEL_OK")
</pallas_src>

<mosaic_0001>
module attributes {stable_mosaic.version = 11 : i64} {
  func.func @_basic_block_kernel(%arg0: i32, %arg1: memref<1x8x512xf32, #tpu.memory_space<vmem>>, %arg2: memref<8x216xbf16, #tpu.memory_space<vmem>>, %arg3: memref<8x1xf32, #tpu.memory_space<vmem>>, %arg4: memref<8x1xf32, #tpu.memory_space<vmem>>, %arg5: memref<8x216xbf16, #tpu.memory_space<vmem>>, %arg6: memref<8x1xf32, #tpu.memory_space<vmem>>, %arg7: memref<8x1xf32, #tpu.memory_space<vmem>>, %arg8: memref<27x512xf32, #tpu.memory_space<vmem>>, %arg9: memref<1x8x512xf32, #tpu.memory_space<vmem>>, %arg10: memref<8x768xf32, #tpu.memory_space<vmem>>, %arg11: memref<216x512xf32, #tpu.memory_space<vmem>>) attributes {dimension_semantics = [#tpu.dimension_semantics<parallel>], iteration_bounds = array<i64: 2>, scalar_prefetch = 0 : i64, scratch_operands = 2 : i64, tpu.core_type = #tpu.core_type<tc>, window_params = [{transform_indices = @transform_0, window_bounds = array<i64: 1, 8, 512>}, {pipeline_mode = #tpu.pipeline_mode<synchronous>, transform_indices = @transform_1, window_bounds = array<i64: 8, 216>}, {pipeline_mode = #tpu.pipeline_mode<synchronous>, transform_indices = @transform_2, window_bounds = array<i64: 8, 1>}, {pipeline_mode = #tpu.pipeline_mode<synchronous>, transform_indices = @transform_3, window_bounds = array<i64: 8, 1>}, {pipeline_mode = #tpu.pipeline_mode<synchronous>, transform_indices = @transform_4, window_bounds = array<i64: 8, 216>}, {pipeline_mode = #tpu.pipeline_mode<synchronous>, transform_indices = @transform_5, window_bounds = array<i64: 8, 1>}, {pipeline_mode = #tpu.pipeline_mode<synchronous>, transform_indices = @transform_6, window_bounds = array<i64: 8, 1>}, {pipeline_mode = #tpu.pipeline_mode<synchronous>, transform_indices = @transform_7, window_bounds = array<i64: 27, 512>}, {transform_indices = @transform_8, window_bounds = array<i64: 1, 8, 512>}]} {
    %cst = arith.constant 0.000000e+00 : f32
    %0 = vector.broadcast %cst : f32 to vector<8x128xf32>
    %c0 = arith.constant 0 : index
    %c0_0 = arith.constant 0 : index
    %1 = vector.load %arg10[%c0, %c0_0] : memref<8x768xf32, #tpu.memory_space<vmem>>, vector<8x128xf32>
    tpu.vector_store %arg10[%c0, %c0_0], %0 {strides = array<i32>} : memref<8x768xf32, #tpu.memory_space<vmem>>, vector<8x128xf32>,
    %cst_1 = arith.constant 0.000000e+00 : f32
    %2 = vector.broadcast %cst_1 : f32 to vector<8x128xf32>
    %c0_2 = arith.constant 0 : index
    %c640 = arith.constant 640 : index
    %3 = vector.load %arg10[%c0_2, %c640] : memref<8x768xf32, #tpu.memory_space<vmem>>, vector<8x128xf32>
    tpu.vector_store %arg10[%c0_2, %c640], %2 {strides = array<i32>} : memref<8x768xf32, #tpu.memory_space<vmem>>, vector<8x128xf32>,
    %c0_3 = arith.constant 0 : index
    %c0_4 = arith.constant 0 : index
    %c0_5 = arith.constant 0 : index
    %4 = vector.load %arg1[%c0_3, %c0_4, %c0_5] : memref<1x8x512xf32, #tpu.memory_space<vmem>>, vector<1x8x512xf32>
    %5 = vector.shape_cast %4 : vector<1x8x512xf32> to vector<8x512xf32>
    %c0_6 = arith.constant 0 : index
    %c128 = arith.constant 128 : index
    %6 = vector.load %arg10[%c0_6, %c128] : memref<8x768xf32, #tpu.memory_space<vmem>>, vector<8x512xf32>
    tpu.vector_store %arg10[%c0_6, %c128], %5 {strides = array<i32>} : memref<8x768xf32, #tpu.memory_space<vmem>>, vector<8x512xf32>,
    %c0_7 = arith.constant 0 : index
    %c55 = arith.constant 55 : index
    %7 = vector.load %arg10[%c0_7, %c55] : memref<8x768xf32, #tpu.memory_space<vmem>>, vector<8x512xf32>
    %c0_8 = arith.constant 0 : index
    %c0_9 = arith.constant 0 : index
    %8 = vector.load %arg8[%c0_8, %c0_9] : memref<27x512xf32, #tpu.memory_space<vmem>>, vector<1x512xf32>
    %9 = vector.broadcast %8 : vector<1x512xf32> to vector<8x512xf32>
    %10 = arith.mulf %7, %9 : vector<8x512xf32>
    %c0_10 = arith.constant 0 : index
    %c0_11 = arith.constant 0 : index
    %11 = vector.load %arg11[%c0_10, %c0_11] : memref<216x512xf32, #tpu.memory_space<vmem>>, vector<8x512xf32>
    tpu.vector_store %arg11[%c0_10, %c0_11], %10 {strides = array<i32>} : memref<216x512xf32, #tpu.memory_space<vmem>>, vector<8x512xf32>,
    %c0_12 = arith.constant 0 : index
    %c56 = arith.constant 56 : index
    %12 = vector.load %arg10[%c0_12, %c56] : memref<8x768xf32, #tpu.memory_space<vmem>>, vector<8x512xf32>
    %c1 = arith.constant 1 : index
    %c0_13 = arith.constant 0 : index
    %13 = vector.load %arg8[%c1, %c0_13] : memref<27x512xf32, #tpu.memory_space<vmem>>, vector<1x512xf32>
    %14 = vector.broadcast %13 : vector<1x512xf32> to vector<8x512xf32>
    %15 = arith.mulf %12, %14 : vector<8x512xf32>
    %c8 = arith.constant 8 : index
    %c0_14 = arith.constant 0 : index
    %16 = vector.load %arg11[%c8, %c0_14] : memref<216x512xf32, #tpu.memory_space<vmem>>, vector<8x512xf32>
    tpu.vector_store %arg11[%c8, %c0_14], %15 {strides = array<i32>} : memref<216x512xf32, #tpu.memory_space<vmem>>, vector<8x512xf32>,
    %c0_15 = arith.constant 0 : index
    %c57 = arith.constant 57 : index
    %17 = vector.load %arg10[%c0_15, %c57] : memref<8x768xf32, #tpu.memory_space<vmem>>, vector<8x512xf32>
    %c2 = arith.constant 2 : index
    %c0_16 = arith.constant 0 : index
    %18 = vector.load %arg8[%c2, %c0_16] : memref<27x512xf32, #tpu.memory_space<vmem>>, vector<1x512xf32>
    %19 = vector.broadcast %18 : vector<1x512xf32> to vector<8x512xf32>
    %20 = arith.mulf %17, %19 : vector<8x512xf32>
    %c16 = arith.constant 16 : index
    %c0_17 = arith.constant 0 : index
    %21 = vector.load %arg11[%c16, %c0_17] : memref<216x512xf32, #tpu.memory_space<vmem>>, vector<8x512xf32>
    tpu.vector_store %arg11[%c16, %c0_17], %20 {strides = array<i32>} : memref<216x512xf32, #tpu.memory_space<vmem>>, vector<8x512xf32>,
    %c0_18 = arith.constant 0 : index
    %c63 = arith.constant 63 : index
    %22 = vector.load %arg10[%c0_18, %c63] : memref<8x768xf32, #tpu.memory_space<vmem>>, vector<8x512xf32>
    %c3 = arith.constant 3 : index
    %c0_19 = arith.constant 0 : index
    %23 = vector.load %arg8[%c3, %c0_19] : memref<27x512xf32, #tpu.memory_space<vmem>>, vector<1x512xf32>
    %24 = vector.broadcast %23 : vector<1x512xf32> to vector<8x512xf32>
    %25 = arith.mulf %22, %24 : vector<8x512xf32>
    %c24 = arith.constant 24 : index
    %c0_20 = arith.constant 0 : index
    %26 = vector.load %arg11[%c24, %c0_20] : memref<216x512xf32, #tpu.memory_space<vmem>>, vector<8x512xf32>
    tpu.vector_store %arg11[%c24, %c0_20], %25 {strides = array<i32>} : memref<216x512xf32, #tpu.memory_space<vmem>>, vector<8x512xf32>,
    %c0_21 = arith.constant 0 : index
    %c64 = arith.constant 64 : index
    %27 = vector.load %arg10[%c0_21, %c64] : memref<8x768xf32, #tpu.memory_space<vmem>>, vector<8x512xf32>
    %c4 = arith.constant 4 : index
    %c0_22 = arith.constant 0 : index
    %28 = vector.load %arg8[%c4, %c0_22] : memref<27x512xf32, #tpu.memory_space<vmem>>, vector<1x512xf32>
    %29 = vector.broadcast %28 : vector<1x512xf32> to vector<8x512xf32>
    %30 = arith.mulf %27, %29 : vector<8x512xf32>
    %c32 = arith.constant 32 : index
    %c0_23 = arith.constant 0 : index
    %31 = vector.load %arg11[%c32, %c0_23] : memref<216x512xf32, #tpu.memory_space<vmem>>, vector<8x512xf32>
    tpu.vector_store %arg11[%c32, %c0_23], %30 {strides = array<i32>} : memref<216x512xf32, #tpu.memory_space<vmem>>, vector<8x512xf32>,
    %c0_24 = arith.constant 0 : index
    %c65 = arith.constant 65 : index
    %32 = vector.load %arg10[%c0_24, %c65] : memref<8x768xf32, #tpu.memory_space<vmem>>, vector<8x512xf32>
    %c5 = arith.constant 5 : index
    %c0_25 = arith.constant 0 : index
    %33 = vector.load %arg8[%c5, %c0_25] : memref<27x512xf32, #tpu.memory_space<vmem>>, vector<1x512xf32>
    %34 = vector.broadcast %33 : vector<1x512xf32> to vector<8x512xf32>
    %35 = arith.mulf %32, %34 : vector<8x512xf32>
    %c40 = arith.constant 40 : index
    %c0_26 = arith.constant 0 : index
    %36 = vector.load %arg11[%c40, %c0_26] : memref<216x512xf32, #tpu.memory_space<vmem>>, vector<8x512xf32>
    tpu.vector_store %arg11[%c40, %c0_26], %35 {strides = array<i32>} : memref<216x512xf32, #tpu.memory_space<vmem>>, vector<8x512xf32>,
    %c0_27 = arith.constant 0 : index
    %c71 = arith.constant 71 : index
    %37 = vector.load %arg10[%c0_27, %c71] : memref<8x768xf32, #tpu.memory_space<vmem>>, vector<8x512xf32>
    %c6 = arith.constant 6 : index
    %c0_28 = arith.constant 0 : index
    %38 = vector.load %arg8[%c6, %c0_28] : memref<27x512xf32, #tpu.memory_space<vmem>>, vector<1x512xf32>
    %39 = vector.broadcast %38 : vector<1x512xf32> to vector<8x512xf32>
    %40 = arith.mulf %37, %39 : vector<8x512xf32>
    %c48 = arith.constant 48 : index
    %c0_29 = arith.constant 0 : index
    %41 = vector.load %arg11[%c48, %c0_29] : memref<216x512xf32, #tpu.memory_space<vmem>>, vector<8x512xf32>
    tpu.vector_store %arg11[%c48, %c0_29], %40 {strides = array<i32>} : memref<216x512xf32, #tpu.memory_space<vmem>>, vector<8x512xf32>,
    %c0_30 = arith.constant 0 : index
    %c72 = arith.constant 72 : index
    %42 = vector.load %arg10[%c0_30, %c72] : memref<8x768xf32, #tpu.memory_space<vmem>>, vector<8x512xf32>
    %c7 = arith.constant 7 : index
    %c0_31 = arith.constant 0 : index
    %43 = vector.load %arg8[%c7, %c0_31] : memref<27x512xf32, #tpu.memory_space<vmem>>, vector<1x512xf32>
    %44 = vector.broadcast %43 : vector<1x512xf32> to vector<8x512xf32>
    %45 = arith.mulf %42, %44 : vector<8x512xf32>
    %c56_32 = arith.constant 56 : index
    %c0_33 = arith.constant 0 : index
    %46 = vector.load %arg11[%c56_32, %c0_33] : memref<216x512xf32, #tpu.memory_space<vmem>>, vector<8x512xf32>
    tpu.vector_store %arg11[%c56_32, %c0_33], %45 {strides = array<i32>} : memref<216x512xf32, #tpu.memory_space<vmem>>, vector<8x512xf32>,
    %c0_34 = arith.constant 0 : index
    %c73 = arith.constant 73 : index
    %47 = vector.load %arg10[%c0_34, %c73] : memref<8x768xf32, #tpu.memory_space<vmem>>, vector<8x512xf32>
    %c8_35 = arith.constant 8 : index
    %c0_36 = arith.constant 0 : index
    %48 = vector.load %arg8[%c8_35, %c0_36] : memref<27x512xf32, #tpu.memory_space<vmem>>, vector<1x512xf32>
    %49 = vector.broadcast %48 : vector<1x512xf32> to vector<8x512xf32>
    %50 = arith.mulf %47, %49 : vector<8x512xf32>
    %c64_37 = arith.constant 64 : index
    %c0_38 = arith.constant 0 : index
    %51 = vector.load %arg11[%c64_37, %c0_38] : memref<216x512xf32, #tpu.memory_space<vmem>>, vector<8x512xf32>
    tpu.vector_store %arg11[%c64_37, %c0_38], %50 {strides = array<i32>} : memref<216x512xf32, #tpu.memory_space<vmem>>, vector<8x512xf32>,
    %c0_39 = arith.constant 0 : index
    %c119 = arith.constant 119 : index
    %52 = vector.load %arg10[%c0_39, %c119] : memref<8x768xf32, #tpu.memory_space<vmem>>, vector<8x512xf32>
    %c9 = arith.constant 9 : index
    %c0_40 = arith.constant 0 : index
    %53 = vector.load %arg8[%c9, %c0_40] : memref<27x512xf32, #tpu.memory_space<vmem>>, vector<1x512xf32>
    %54 = vector.broadcast %53 : vector<1x512xf32> to vector<8x512xf32>
    %55 = arith.mulf %52, %54 : vector<8x512xf32>
    %c72_41 = arith.constant 72 : index
    %c0_42 = arith.constant 0 : index
    %56 = vector.load %arg11[%c72_41, %c0_42] : memref<216x512xf32, #tpu.memory_space<vmem>>, vector<8x512xf32>
    tpu.vector_store %arg11[%c72_41, %c0_42], %55 {strides = array<i32>} : memref<216x512xf32, #tpu.memory_space<vmem>>, vector<8x512xf32>,
    %c0_43 = arith.constant 0 : index
    %c120 = arith.constant 120 : index
    %57 = vector.load %arg10[%c0_43, %c120] : memref<8x768xf32, #tpu.memory_space<vmem>>, vector<8x512xf32>
    %c10 = arith.constant 10 : index
    %c0_44 = arith.constant 0 : index
    %58 = vector.load %arg8[%c10, %c0_44] : memref<27x512xf32, #tpu.memory_space<vmem>>, vector<1x512xf32>
    %59 = vector.broadcast %58 : vector<1x512xf32> to vector<8x512xf32>
    %60 = arith.mulf %57, %59 : vector<8x512xf32>
    %c80 = arith.constant 80 : index
    %c0_45 = arith.constant 0 : index
    %61 = vector.load %arg11[%c80, %c0_45] : memref<216x512xf32, #tpu.memory_space<vmem>>, vector<8x512xf32>
    tpu.vector_store %arg11[%c80, %c0_45], %60 {strides = array<i32>} : memref<216x512xf32, #tpu.memory_space<vmem>>, vector<8x512xf32>,
    %c0_46 = arith.constant 0 : index
    %c121 = arith.constant 121 : index
    %62 = vector.load %arg10[%c0_46, %c121] : memref<8x768xf32, #tpu.memory_space<vmem>>, vector<8x512xf32>
    %c11 = arith.constant 11 : index
    %c0_47 = arith.constant 0 : index
    %63 = vector.load %arg8[%c11, %c0_47] : memref<27x512xf32, #tpu.memory_space<vmem>>, vector<1x512xf32>
    %64 = vector.broadcast %63 : vector<1x512xf32> to vector<8x512xf32>
    %65 = arith.mulf %62, %64 : vector<8x512xf32>
    %c88 = arith.constant 88 : index
    %c0_48 = arith.constant 0 : index
    %66 = vector.load %arg11[%c88, %c0_48] : memref<216x512xf32, #tpu.memory_space<vmem>>, vector<8x512xf32>
    tpu.vector_store %arg11[%c88, %c0_48], %65 {strides = array<i32>} : memref<216x512xf32, #tpu.memory_space<vmem>>, vector<8x512xf32>,
    %c0_49 = arith.constant 0 : index
    %c127 = arith.constant 127 : index
    %67 = vector.load %arg10[%c0_49, %c127] : memref<8x768xf32, #tpu.memory_space<vmem>>, vector<8x512xf32>
    %c12 = arith.constant 12 : index
    %c0_50 = arith.constant 0 : index
    %68 = vector.load %arg8[%c12, %c0_50] : memref<27x512xf32, #tpu.memory_space<vmem>>, vector<1x512xf32>
    %69 = vector.broadcast %68 : vector<1x512xf32> to vector<8x512xf32>
    %70 = arith.mulf %67, %69 : vector<8x512xf32>
    %c96 = arith.constant 96 : index
    %c0_51 = arith.constant 0 : index
    %71 = vector.load %arg11[%c96, %c0_51] : memref<216x512xf32, #tpu.memory_space<vmem>>, vector<8x512xf32>
    tpu.vector_store %arg11[%c96, %c0_51], %70 {strides = array<i32>} : memref<216x512xf32, #tpu.memory_space<vmem>>, vector<8x512xf32>,
    %c0_52 = arith.constant 0 : index
    %c128_53 = arith.constant 128 : index
    %72 = vector.load %arg10[%c0_52, %c128_53] : memref<8x768xf32, #tpu.memory_space<vmem>>, vector<8x512xf32>
    %c13 = arith.constant 13 : index
    %c0_54 = arith.constant 0 : index
    %73 = vector.load %arg8[%c13, %c0_54] : memref<27x512xf32, #tpu.memory_space<vmem>>, vector<1x512xf32>
    %74 = vector.broadcast %73 : vector<1x512xf32> to vector<8x512xf32>
    %75 = arith.mulf %72, %74 : vector<8x512xf32>
    %c104 = arith.constant 104 : index
    %c0_55 = arith.constant 0 : index
    %76 = vector.load %arg11[%c104, %c0_55] : memref<216x512xf32, #tpu.memory_space<vmem>>, vector<8x512xf32>
    tpu.vector_store %arg11[%c104, %c0_55], %75 {strides = array<i32>} : memref<216x512xf32, #tpu.memory_space<vmem>>, vector<8x512xf32>,
    %c0_56 = arith.constant 0 : index
    %c129 = arith.constant 129 : index
    %77 = vector.load %arg10[%c0_56, %c129] : memref<8x768xf32, #tpu.memory_space<vmem>>, vector<8x512xf32>
    %c14 = arith.constant 14 : index
    %c0_57 = arith.constant 0 : index
    %78 = vector.load %arg8[%c14, %c0_57] : memref<27x512xf32, #tpu.memory_space<vmem>>, vector<1x512xf32>
    %79 = vector.broadcast %78 : vector<1x512xf32> to vector<8x512xf32>
    %80 = arith.mulf %77, %79 : vector<8x512xf32>
    %c112 = arith.constant 112 : index
    %c0_58 = arith.constant 0 : index
    %81 = vector.load %arg11[%c112, %c0_58] : memref<216x512xf32, #tpu.memory_space<vmem>>, vector<8x512xf32>
    tpu.vector_store %arg11[%c112, %c0_58], %80 {strides = array<i32>} : memref<216x512xf32, #tpu.memory_space<vmem>>, vector<8x512xf32>,
    %c0_59 = arith.constant 0 : index
    %c135 = arith.constant 135 : index
    %82 = vector.load %arg10[%c0_59, %c135] : memref<8x768xf32, #tpu.memory_space<vmem>>, vector<8x512xf32>
    %c15 = arith.constant 15 : index
    %c0_60 = arith.constant 0 : index
    %83 = vector.load %arg8[%c15, %c0_60] : memref<27x512xf32, #tpu.memory_space<vmem>>, vector<1x512xf32>
    %84 = vector.broadcast %83 : vector<1x512xf32> to vector<8x512xf32>
    %85 = arith.mulf %82, %84 : vector<8x512xf32>
    %c120_61 = arith.constant 120 : index
    %c0_62 = arith.constant 0 : index
    %86 = vector.load %arg11[%c120_61, %c0_62] : memref<216x512xf32, #tpu.memory_space<vmem>>, vector<8x512xf32>
    tpu.vector_store %arg11[%c120_61, %c0_62], %85 {strides = array<i32>} : memref<216x512xf32, #tpu.memory_space<vmem>>, vector<8x512xf32>,
    %c0_63 = arith.constant 0 : index
    %c136 = arith.constant 136 : index
    %87 = vector.load %arg10[%c0_63, %c136] : memref<8x768xf32, #tpu.memory_space<vmem>>, vector<8x512xf32>
    %c16_64 = arith.constant 16 : index
    %c0_65 = arith.constant 0 : index
    %88 = vector.load %arg8[%c16_64, %c0_65] : memref<27x512xf32, #tpu.memory_space<vmem>>, vector<1x512xf32>
    %89 = vector.broadcast %88 : vector<1x512xf32> to vector<8x512xf32>
    %90 = arith.mulf %87, %89 : vector<8x512xf32>
    %c128_66 = arith.constant 128 : index
    %c0_67 = arith.constant 0 : index
    %91 = vector.load %arg11[%c128_66, %c0_67] : memref<216x512xf32, #tpu.memory_space<vmem>>, vector<8x512xf32>
    tpu.vector_store %arg11[%c128_66, %c0_67], %90 {strides = array<i32>} : memref<216x512xf32, #tpu.memory_space<vmem>>, vector<8x512xf32>,
    %c0_68 = arith.constant 0 : index
    %c137 = arith.constant 137 : index
    %92 = vector.load %arg10[%c0_68, %c137] : memref<8x768xf32, #tpu.memory_space<vmem>>, vector<8x512xf32>
    %c17 = arith.constant 17 : index
    %c0_69 = arith.constant 0 : index
    %93 = vector.load %arg8[%c17, %c0_69] : memref<27x512xf32, #tpu.memory_space<vmem>>, vector<1x512xf32>
    %94 = vector.broadcast %93 : vector<1x512xf32> to vector<8x512xf32>
    %95 = arith.mulf %92, %94 : vector<8x512xf32>
    %c136_70 = arith.constant 136 : index
    %c0_71 = arith.constant 0 : index
    %96 = vector.load %arg11[%c136_70, %c0_71] : memref<216x512xf32, #tpu.memory_space<vmem>>, vector<8x512xf32>
    tpu.vector_store %arg11[%c136_70, %c0_71], %95 {strides = array<i32>} : memref<216x512xf32, #tpu.memory_space<vmem>>, vector<8x512xf32>,
    %c0_72 = arith.constant 0 : index
    %c183 = arith.constant 183 : index
    %97 = vector.load %arg10[%c0_72, %c183] : memref<8x768xf32, #tpu.memory_space<vmem>>, vector<8x512xf32>
    %c18 = arith.constant 18 : index
    %c0_73 = arith.constant 0 : index
    %98 = vector.load %arg8[%c18, %c0_73] : memref<27x512xf32, #tpu.memory_space<vmem>>, vector<1x512xf32>
    %99 = vector.broadcast %98 : vector<1x512xf32> to vector<8x512xf32>
    %100 = arith.mulf %97, %99 : vector<8x512xf32>
    %c144 = arith.constant 144 : index
    %c0_74 = arith.constant 0 : index
    %101 = vector.load %arg11[%c144, %c0_74] : memref<216x512xf32, #tpu.memory_space<vmem>>, vector<8x512xf32>
    tpu.vector_store %arg11[%c144, %c0_74], %100 {strides = array<i32>} : memref<216x512xf32, #tpu.memory_space<vmem>>, vector<8x512xf32>,
    %c0_75 = arith.constant 0 : index
    %c184 = arith.constant 184 : index
    %102 = vector.load %arg10[%c0_75, %c184] : memref<8x768xf32, #tpu.memory_space<vmem>>, vector<8x512xf32>
    %c19 = arith.constant 19 : index
    %c0_76 = arith.constant 0 : index
    %103 = vector.load %arg8[%c19, %c0_76] : memref<27x512xf32, #tpu.memory_space<vmem>>, vector<1x512xf32>
    %104 = vector.broadcast %103 : vector<1x512xf32> to vector<8x512xf32>
    %105 = arith.mulf %102, %104 : vector<8x512xf32>
    %c152 = arith.constant 152 : index
    %c0_77 = arith.constant 0 : index
    %106 = vector.load %arg11[%c152, %c0_77] : memref<216x512xf32, #tpu.memory_space<vmem>>, vector<8x512xf32>
    tpu.vector_store %arg11[%c152, %c0_77], %105 {strides = array<i32>} : memref<216x512xf32, #tpu.memory_space<vmem>>, vector<8x512xf32>,
    %c0_78 = arith.constant 0 : index
    %c185 = arith.constant 185 : index
    %107 = vector.load %arg10[%c0_78, %c185] : memref<8x768xf32, #tpu.memory_space<vmem>>, vector<8x512xf32>
    %c20 = arith.constant 20 : index
    %c0_79 = arith.constant 0 : index
    %108 = vector.load %arg8[%c20, %c0_79] : memref<27x512xf32, #tpu.memory_space<vmem>>, vector<1x512xf32>
    %109 = vector.broadcast %108 : vector<1x512xf32> to vector<8x512xf32>
    %110 = arith.mulf %107, %109 : vector<8x512xf32>
    %c160 = arith.constant 160 : index
    %c0_80 = arith.constant 0 : index
    %111 = vector.load %arg11[%c160, %c0_80] : memref<216x512xf32, #tpu.memory_space<vmem>>, vector<8x512xf32>
    tpu.vector_store %arg11[%c160, %c0_80], %110 {strides = array<i32>} : memref<216x512xf32, #tpu.memory_space<vmem>>, vector<8x512xf32>,
    %c0_81 = arith.constant 0 : index
    %c191 = arith.constant 191 : index
    %112 = vector.load %arg10[%c0_81, %c191] : memref<8x768xf32, #tpu.memory_space<vmem>>, vector<8x512xf32>
    %c21 = arith.constant 21 : index
    %c0_82 = arith.constant 0 : index
    %113 = vector.load %arg8[%c21, %c0_82] : memref<27x512xf32, #tpu.memory_space<vmem>>, vector<1x512xf32>
    %114 = vector.broadcast %113 : vector<1x512xf32> to vector<8x512xf32>
    %115 = arith.mulf %112, %114 : vector<8x512xf32>
    %c168 = arith.constant 168 : index
    %c0_83 = arith.constant 0 : index
    %116 = vector.load %arg11[%c168, %c0_83] : memref<216x512xf32, #tpu.memory_space<vmem>>, vector<8x512xf32>
    tpu.vector_store %arg11[%c168, %c0_83], %115 {strides = array<i32>} : memref<216x512xf32, #tpu.memory_space<vmem>>, vector<8x512xf32>,
    %c0_84 = arith.constant 0 : index
    %c192 = arith.constant 192 : index
    %117 = vector.load %arg10[%c0_84, %c192] : memref<8x768xf32, #tpu.memory_space<vmem>>, vector<8x512xf32>
    %c22 = arith.constant 22 : index
    %c0_85 = arith.constant 0 : index
    %118 = vector.load %arg8[%c22, %c0_85] : memref<27x512xf32, #tpu.memory_space<vmem>>, vector<1x512xf32>
    %119 = vector.broadcast %118 : vector<1x512xf32> to vector<8x512xf32>
    %120 = arith.mulf %117, %119 : vector<8x512xf32>
    %c176 = arith.constant 176 : index
    %c0_86 = arith.constant 0 : index
    %121 = vector.load %arg11[%c176, %c0_86] : memref<216x512xf32, #tpu.memory_space<vmem>>, vector<8x512xf32>
    tpu.vector_store %arg11[%c176, %c0_86], %120 {strides = array<i32>} : memref<216x512xf32, #tpu.memory_space<vmem>>, vector<8x512xf32>,
    %c0_87 = arith.constant 0 : index
    %c193 = arith.constant 193 : index
    %122 = vector.load %arg10[%c0_87, %c193] : memref<8x768xf32, #tpu.memory_space<vmem>>, vector<8x512xf32>
    %c23 = arith.constant 23 : index
    %c0_88 = arith.constant 0 : index
    %123 = vector.load %arg8[%c23, %c0_88] : memref<27x512xf32, #tpu.memory_space<vmem>>, vector<1x512xf32>
    %124 = vector.broadcast %123 : vector<1x512xf32> to vector<8x512xf32>
    %125 = arith.mulf %122, %124 : vector<8x512xf32>
    %c184_89 = arith.constant 184 : index
    %c0_90 = arith.constant 0 : index
    %126 = vector.load %arg11[%c184_89, %c0_90] : memref<216x512xf32, #tpu.memory_space<vmem>>, vector<8x512xf32>
    tpu.vector_store %arg11[%c184_89, %c0_90], %125 {strides = array<i32>} : memref<216x512xf32, #tpu.memory_space<vmem>>, vector<8x512xf32>,
    %c0_91 = arith.constant 0 : index
    %c199 = arith.constant 199 : index
    %127 = vector.load %arg10[%c0_91, %c199] : memref<8x768xf32, #tpu.memory_space<vmem>>, vector<8x512xf32>
    %c24_92 = arith.constant 24 : index
    %c0_93 = arith.constant 0 : index
    %128 = vector.load %arg8[%c24_92, %c0_93] : memref<27x512xf32, #tpu.memory_space<vmem>>, vector<1x512xf32>
    %129 = vector.broadcast %128 : vector<1x512xf32> to vector<8x512xf32>
    %130 = arith.mulf %127, %129 : vector<8x512xf32>
    %c192_94 = arith.constant 192 : index
    %c0_95 = arith.constant 0 : index
    %131 = vector.load %arg11[%c192_94, %c0_95] : memref<216x512xf32, #tpu.memory_space<vmem>>, vector<8x512xf32>
    tpu.vector_store %arg11[%c192_94, %c0_95], %130 {strides = array<i32>} : memref<216x512xf32, #tpu.memory_space<vmem>>, vector<8x512xf32>,
    %c0_96 = arith.constant 0 : index
    %c200 = arith.constant 200 : index
    %132 = vector.load %arg10[%c0_96, %c200] : memref<8x768xf32, #tpu.memory_space<vmem>>, vector<8x512xf32>
    %c25 = arith.constant 25 : index
    %c0_97 = arith.constant 0 : index
    %133 = vector.load %arg8[%c25, %c0_97] : memref<27x512xf32, #tpu.memory_space<vmem>>, vector<1x512xf32>
    %134 = vector.broadcast %133 : vector<1x512xf32> to vector<8x512xf32>
    %135 = arith.mulf %132, %134 : vector<8x512xf32>
    %c200_98 = arith.constant 200 : index
    %c0_99 = arith.constant 0 : index
    %136 = vector.load %arg11[%c200_98, %c0_99] : memref<216x512xf32, #tpu.memory_space<vmem>>, vector<8x512xf32>
    tpu.vector_store %arg11[%c200_98, %c0_99], %135 {strides = array<i32>} : memref<216x512xf32, #tpu.memory_space<vmem>>, vector<8x512xf32>,
    %c0_100 = arith.constant 0 : index
    %c201 = arith.constant 201 : index
    %137 = vector.load %arg10[%c0_100, %c201] : memref<8x768xf32, #tpu.memory_space<vmem>>, vector<8x512xf32>
    %c26 = arith.constant 26 : index
    %c0_101 = arith.constant 0 : index
    %138 = vector.load %arg8[%c26, %c0_101] : memref<27x512xf32, #tpu.memory_space<vmem>>, vector<1x512xf32>
    %139 = vector.broadcast %138 : vector<1x512xf32> to vector<8x512xf32>
    %140 = arith.mulf %137, %139 : vector<8x512xf32>
    %c208 = arith.constant 208 : index
    %c0_102 = arith.constant 0 : index
    %141 = vector.load %arg11[%c208, %c0_102] : memref<216x512xf32, #tpu.memory_space<vmem>>, vector<8x512xf32>
    tpu.vector_store %arg11[%c208, %c0_102], %140 {strides = array<i32>} : memref<216x512xf32, #tpu.memory_space<vmem>>, vector<8x512xf32>,
    %c0_103 = arith.constant 0 : index
    %c0_104 = arith.constant 0 : index
    %142 = vector.load %arg2[%c0_103, %c0_104] : memref<8x216xbf16, #tpu.memory_space<vmem>>, vector<8x216xbf16>
    %c0_105 = arith.constant 0 : index
    %c0_106 = arith.constant 0 : index
    %143 = vector.load %arg11[%c0_105, %c0_106] : memref<216x512xf32, #tpu.memory_space<vmem>>, vector<216x512xf32>
    %144 = arith.truncf %143 : vector<216x512xf32> to vector<216x512xbf16>
    %cst_107 = arith.constant dense<0.000000e+00> : vector<8x512xf32>
    %145 = tpu.matmul %142, %144, %cst_107 {dimension_numbers = #tpu.dot_dimension_numbers<[1], [0], [0], [1], [0, 0, 1, 1], [], []>} : vector<8x216xbf16>, vector<216x512xbf16>, vector<8x512xf32> -> vector<8x512xf32>
    %c0_108 = arith.constant 0 : index
    %c0_109 = arith.constant 0 : index
    %146 = vector.load %arg3[%c0_108, %c0_109] : memref<8x1xf32, #tpu.memory_space<vmem>>, vector<8x1xf32>
    %147 = vector.broadcast %146 : vector<8x1xf32> to vector<8x512xf32>
    %148 = arith.mulf %145, %147 : vector<8x512xf32>
    %c0_110 = arith.constant 0 : index
    %c0_111 = arith.constant 0 : index
    %149 = vector.load %arg4[%c0_110, %c0_111] : memref<8x1xf32, #tpu.memory_space<vmem>>, vector<8x1xf32>
    %150 = vector.broadcast %149 : vector<8x1xf32> to vector<8x512xf32>
    %151 = arith.addf %148, %150 : vector<8x512xf32>
    %cst_112 = arith.constant 0.000000e+00 : f32
    %152 = vector.broadcast %cst_112 : f32 to vector<8x512xf32>
    %153 = arith.maximumf %151, %152 : vector<8x512xf32>
    %c0_113 = arith.constant 0 : index
    %c128_114 = arith.constant 128 : index
    %154 = vector.load %arg10[%c0_113, %c128_114] : memref<8x768xf32, #tpu.memory_space<vmem>>, vector<8x512xf32>
    tpu.vector_store %arg10[%c0_113, %c128_114], %153 {strides = array<i32>} : memref<8x768xf32, #tpu.memory_space<vmem>>, vector<8x512xf32>,
    %c0_115 = arith.constant 0 : index
    %c55_116 = arith.constant 55 : index
    %155 = vector.load %arg10[%c0_115, %c55_116] : memref<8x768xf32, #tpu.memory_space<vmem>>, vector<8x512xf32>
    %c0_117 = arith.constant 0 : index
    %c0_118 = arith.constant 0 : index
    %156 = vector.load %arg8[%c0_117, %c0_118] : memref<27x512xf32, #tpu.memory_space<vmem>>, vector<1x512xf32>
    %157 = vector.broadcast %156 : vector<1x512xf32> to vector<8x512xf32>
    %158 = arith.mulf %155, %157 : vector<8x512xf32>
    %c0_119 = arith.constant 0 : index
    %c0_120 = arith.constant 0 : index
    %159 = vector.load %arg11[%c0_119, %c0_120] : memref<216x512xf32, #tpu.memory_space<vmem>>, vector<8x512xf32>
    tpu.vector_store %arg11[%c0_119, %c0_120], %158 {strides = array<i32>} : memref<216x512xf32, #tpu.memory_space<vmem>>, vector<8x512xf32>,
    %c0_121 = arith.constant 0 : index
    %c56_122 = arith.constant 56 : index
    %160 = vector.load %arg10[%c0_121, %c56_122] : memref<8x768xf32, #tpu.memory_space<vmem>>, vector<8x512xf32>
    %c1_123 = arith.constant 1 : index
    %c0_124 = arith.constant 0 : index
    %161 = vector.load %arg8[%c1_123, %c0_124] : memref<27x512xf32, #tpu.memory_space<vmem>>, vector<1x512xf32>
    %162 = vector.broadcast %161 : vector<1x512xf32> to vector<8x512xf32>
    %163 = arith.mulf %160, %162 : vector<8x512xf32>
    %c8_125 = arith.constant 8 : index
    %c0_126 = arith.constant 0 : index
    %164 = vector.load %arg11[%c8_125, %c0_126] : memref<216x512xf32, #tpu.memory_space<vmem>>, vector<8x512xf32>
    tpu.vector_store %arg11[%c8_125, %c0_126], %163 {strides = array<i32>} : memref<216x512xf32, #tpu.memory_space<vmem>>, vector<8x512xf32>,
    %c0_127 = arith.constant 0 : index
    %c57_128 = arith.constant 57 : index
    %165 = vector.load %arg10[%c0_127, %c57_128] : memref<8x768xf32, #tpu.memory_space<vmem>>, vector<8x512xf32>
    %c2_129 = arith.constant 2 : index
    %c0_130 = arith.constant 0 : index
    %166 = vector.load %arg8[%c2_129, %c0_130] : memref<27x512xf32, #tpu.memory_space<vmem>>, vector<1x512xf32>
    %167 = vector.broadcast %166 : vector<1x512xf32> to vector<8x512xf32>
    %168 = arith.mulf %165, %167 : vector<8x512xf32>
    %c16_131 = arith.constant 16 : index
    %c0_132 = arith.constant 0 : index
    %169 = vector.load %arg11[%c16_131, %c0_132] : memref<216x512xf32, #tpu.memory_space<vmem>>, vector<8x512xf32>
    tpu.vector_store %arg11[%c16_131, %c0_132], %168 {strides = array<i32>} : memref<216x512xf32, #tpu.memory_space<vmem>>, vector<8x512xf32>,
    %c0_133 = arith.constant 0 : index
    %c63_134 = arith.constant 63 : index
    %170 = vector.load %arg10[%c0_133, %c63_134] : memref<8x768xf32, #tpu.memory_space<vmem>>, vector<8x512xf32>
    %c3_135 = arith.constant 3 : index
    %c0_136 = arith.constant 0 : index
    %171 = vector.load %arg8[%c3_135, %c0_136] : memref<27x512xf32, #tpu.memory_space<vmem>>, vector<1x512xf32>
    %172 = vector.broadcast %171 : vector<1x512xf32> to vector<8x512xf32>
    %173 = arith.mulf %170, %172 : vector<8x512xf32>
    %c24_137 = arith.constant 24 : index
    %c0_138 = arith.constant 0 : index
    %174 = vector.load %arg11[%c24_137, %c0_138] : memref<216x512xf32, #tpu.memory_space<vmem>>, vector<8x512xf32>
    tpu.vector_store %arg11[%c24_137, %c0_138], %173 {strides = array<i32>} : memref<216x512xf32, #tpu.memory_space<vmem>>, vector<8x512xf32>,
    %c0_139 = arith.constant 0 : index
    %c64_140 = arith.constant 64 : index
    %175 = vector.load %arg10[%c0_139, %c64_140] : memref<8x768xf32, #tpu.memory_space<vmem>>, vector<8x512xf32>
    %c4_141 = arith.constant 4 : index
    %c0_142 = arith.constant 0 : index
    %176 = vector.load %arg8[%c4_141, %c0_142] : memref<27x512xf32, #tpu.memory_space<vmem>>, vector<1x512xf32>
    %177 = vector.broadcast %176 : vector<1x512xf32> to vector<8x512xf32>
    %178 = arith.mulf %175, %177 : vector<8x512xf32>
    %c32_143 = arith.constant 32 : index
    %c0_144 = arith.constant 0 : index
    %179 = vector.load %arg11[%c32_143, %c0_144] : memref<216x512xf32, #tpu.memory_space<vmem>>, vector<8x512xf32>
    tpu.vector_store %arg11[%c32_143, %c0_144], %178 {strides = array<i32>} : memref<216x512xf32, #tpu.memory_space<vmem>>, vector<8x512xf32>,
    %c0_145 = arith.constant 0 : index
    %c65_146 = arith.constant 65 : index
    %180 = vector.load %arg10[%c0_145, %c65_146] : memref<8x768xf32, #tpu.memory_space<vmem>>, vector<8x512xf32>
    %c5_147 = arith.constant 5 : index
    %c0_148 = arith.constant 0 : index
    %181 = vector.load %arg8[%c5_147, %c0_148] : memref<27x512xf32, #tpu.memory_space<vmem>>, vector<1x512xf32>
    %182 = vector.broadcast %181 : vector<1x512xf32> to vector<8x512xf32>
    %183 = arith.mulf %180, %182 : vector<8x512xf32>
    %c40_149 = arith.constant 40 : index
    %c0_150 = arith.constant 0 : index
    %184 = vector.load %arg11[%c40_149, %c0_150] : memref<216x512xf32, #tpu.memory_space<vmem>>, vector<8x512xf32>
    tpu.vector_store %arg11[%c40_149, %c0_150], %183 {strides = array<i32>} : memref<216x512xf32, #tpu.memory_space<vmem>>, vector<8x512xf32>,
    %c0_151 = arith.constant 0 : index
    %c71_152 = arith.constant 71 : index
    %185 = vector.load %arg10[%c0_151, %c71_152] : memref<8x768xf32, #tpu.memory_space<vmem>>, vector<8x512xf32>
    %c6_153 = arith.constant 6 : index
    %c0_154 = arith.constant 0 : index
    %186 = vector.load %arg8[%c6_153, %c0_154] : memref<27x512xf32, #tpu.memory_space<vmem>>, vector<1x512xf32>
    %187 = vector.broadcast %186 : vector<1x512xf32> to vector<8x512xf32>
    %188 = arith.mulf %185, %187 : vector<8x512xf32>
    %c48_155 = arith.constant 48 : index
    %c0_156 = arith.constant 0 : index
    %189 = vector.load %arg11[%c48_155, %c0_156] : memref<216x512xf32, #tpu.memory_space<vmem>>, vector<8x512xf32>
    tpu.vector_store %arg11[%c48_155, %c0_156], %188 {strides = array<i32>} : memref<216x512xf32, #tpu.memory_space<vmem>>, vector<8x512xf32>,
    %c0_157 = arith.constant 0 : index
    %c72_158 = arith.constant 72 : index
    %190 = vector.load %arg10[%c0_157, %c72_158] : memref<8x768xf32, #tpu.memory_space<vmem>>, vector<8x512xf32>
    %c7_159 = arith.constant 7 : index
    %c0_160 = arith.constant 0 : index
    %191 = vector.load %arg8[%c7_159, %c0_160] : memref<27x512xf32, #tpu.memory_space<vmem>>, vector<1x512xf32>
    %192 = vector.broadcast %191 : vector<1x512xf32> to vector<8x512xf32>
    %193 = arith.mulf %190, %192 : vector<8x512xf32>
    %c56_161 = arith.constant 56 : index
    %c0_162 = arith.constant 0 : index
    %194 = vector.load %arg11[%c56_161, %c0_162] : memref<216x512xf32, #tpu.memory_space<vmem>>, vector<8x512xf32>
    tpu.vector_store %arg11[%c56_161, %c0_162], %193 {strides = array<i32>} : memref<216x512xf32, #tpu.memory_space<vmem>>, vector<8x512xf32>,
    %c0_163 = arith.constant 0 : index
    %c73_164 = arith.constant 73 : index
    %195 = vector.load %arg10[%c0_163, %c73_164] : memref<8x768xf32, #tpu.memory_space<vmem>>, vector<8x512xf32>
    %c8_165 = arith.constant 8 : index
    %c0_166 = arith.constant 0 : index
    %196 = vector.load %arg8[%c8_165, %c0_166] : memref<27x512xf32, #tpu.memory_space<vmem>>, vector<1x512xf32>
    %197 = vector.broadcast %196 : vector<1x512xf32> to vector<8x512xf32>
    %198 = arith.mulf %195, %197 : vector<8x512xf32>
    %c64_167 = arith.constant 64 : index
    %c0_168 = arith.constant 0 : index
    %199 = vector.load %arg11[%c64_167, %c0_168] : memref<216x512xf32, #tpu.memory_space<vmem>>, vector<8x512xf32>
    tpu.vector_store %arg11[%c64_167, %c0_168], %198 {strides = array<i32>} : memref<216x512xf32, #tpu.memory_space<vmem>>, vector<8x512xf32>,
    %c0_169 = arith.constant 0 : index
    %c119_170 = arith.constant 119 : index
    %200 = vector.load %arg10[%c0_169, %c119_170] : memref<8x768xf32, #tpu.memory_space<vmem>>, vector<8x512xf32>
    %c9_171 = arith.constant 9 : index
    %c0_172 = arith.constant 0 : index
    %201 = vector.load %arg8[%c9_171, %c0_172] : memref<27x512xf32, #tpu.memory_space<vmem>>, vector<1x512xf32>
    %202 = vector.broadcast %201 : vector<1x512xf32> to vector<8x512xf32>
    %203 = arith.mulf %200, %202 : vector<8x512xf32>
    %c72_173 = arith.constant 72 : index
    %c0_174 = arith.constant 0 : index
    %204 = vector.load %arg11[%c72_173, %c0_174] : memref<216x512xf32, #tpu.memory_space<vmem>>, vector<8x512xf32>
    tpu.vector_store %arg11[%c72_173, %c0_174], %203 {strides = array<i32>} : memref<216x512xf32, #tpu.memory_space<vmem>>, vector<8x512xf32>,
    %c0_175 = arith.constant 0 : index
    %c120_176 = arith.constant 120 : index
    %205 = vector.load %arg10[%c0_175, %c120_176] : memref<8x768xf32, #tpu.memory_space<vmem>>, vector<8x512xf32>
    %c10_177 = arith.constant 10 : index
    %c0_178 = arith.constant 0 : index
    %206 = vector.load %arg8[%c10_177, %c0_178] : memref<27x512xf32, #tpu.memory_space<vmem>>, vector<1x512xf32>
    %207 = vector.broadcast %206 : vector<1x512xf32> to vector<8x512xf32>
    %208 = arith.mulf %205, %207 : vector<8x512xf32>
    %c80_179 = arith.constant 80 : index
    %c0_180 = arith.constant 0 : index
    %209 = vector.load %arg11[%c80_179, %c0_180] : memref<216x512xf32, #tpu.memory_space<vmem>>, vector<8x512xf32>
    tpu.vector_store %arg11[%c80_179, %c0_180], %208 {strides = array<i32>} : memref<216x512xf32, #tpu.memory_space<vmem>>, vector<8x512xf32>,
    %c0_181 = arith.constant 0 : index
    %c121_182 = arith.constant 121 : index
    %210 = vector.load %arg10[%c0_181, %c121_182] : memref<8x768xf32, #tpu.memory_space<vmem>>, vector<8x512xf32>
    %c11_183 = arith.constant 11 : index
    %c0_184 = arith.constant 0 : index
    %211 = vector.load %arg8[%c11_183, %c0_184] : memref<27x512xf32, #tpu.memory_space<vmem>>, vector<1x512xf32>
    %212 = vector.broadcast %211 : vector<1x512xf32> to vector<8x512xf32>
    %213 = arith.mulf %210, %212 : vector<8x512xf32>
    %c88_185 = arith.constant 88 : index
    %c0_186 = arith.constant 0 : index
    %214 = vector.load %arg11[%c88_185, %c0_186] : memref<216x512xf32, #tpu.memory_space<vmem>>, vector<8x512xf32>
    tpu.vector_store %arg11[%c88_185, %c0_186], %213 {strides = array<i32>} : memref<216x512xf32, #tpu.memory_space<vmem>>, vector<8x512xf32>,
    %c0_187 = arith.constant 0 : index
    %c127_188 = arith.constant 127 : index
    %215 = vector.load %arg10[%c0_187, %c127_188] : memref<8x768xf32, #tpu.memory_space<vmem>>, vector<8x512xf32>
    %c12_189 = arith.constant 12 : index
    %c0_190 = arith.constant 0 : index
    %216 = vector.load %arg8[%c12_189, %c0_190] : memref<27x512xf32, #tpu.memory_space<vmem>>, vector<1x512xf32>
    %217 = vector.broadcast %216 : vector<1x512xf32> to vector<8x512xf32>
    %218 = arith.mulf %215, %217 : vector<8x512xf32>
    %c96_191 = arith.constant 96 : index
    %c0_192 = arith.constant 0 : index
    %219 = vector.load %arg11[%c96_191, %c0_192] : memref<216x512xf32, #tpu.memory_space<vmem>>, vector<8x512xf32>
    tpu.vector_store %arg11[%c96_191, %c0_192], %218 {strides = array<i32>} : memref<216x512xf32, #tpu.memory_space<vmem>>, vector<8x512xf32>,
    %c0_193 = arith.constant 0 : index
    %c128_194 = arith.constant 128 : index
    %220 = vector.load %arg10[%c0_193, %c128_194] : memref<8x768xf32, #tpu.memory_space<vmem>>, vector<8x512xf32>
    %c13_195 = arith.constant 13 : index
    %c0_196 = arith.constant 0 : index
    %221 = vector.load %arg8[%c13_195, %c0_196] : memref<27x512xf32, #tpu.memory_space<vmem>>, vector<1x512xf32>
    %222 = vector.broadcast %221 : vector<1x512xf32> to vector<8x512xf32>
    %223 = arith.mulf %220, %222 : vector<8x512xf32>
    %c104_197 = arith.constant 104 : index
    %c0_198 = arith.constant 0 : index
    %224 = vector.load %arg11[%c104_197, %c0_198] : memref<216x512xf32, #tpu.memory_space<vmem>>, vector<8x512xf32>
    tpu.vector_store %arg11[%c104_197, %c0_198], %223 {strides = array<i32>} : memref<216x512xf32, #tpu.memory_space<vmem>>, vector<8x512xf32>,
    %c0_199 = arith.constant 0 : index
    %c129_200 = arith.constant 129 : index
    %225 = vector.load %arg10[%c0_199, %c129_200] : memref<8x768xf32, #tpu.memory_space<vmem>>, vector<8x512xf32>
    %c14_201 = arith.constant 14 : index
    %c0_202 = arith.constant 0 : index
    %226 = vector.load %arg8[%c14_201, %c0_202] : memref<27x512xf32, #tpu.memory_space<vmem>>, vector<1x512xf32>
    %227 = vector.broadcast %226 : vector<1x512xf32> to vector<8x512xf32>
    %228 = arith.mulf %225, %227 : vector<8x512xf32>
    %c112_203 = arith.constant 112 : index
    %c0_204 = arith.constant 0 : index
    %229 = vector.load %arg11[%c112_203, %c0_204] : memref<216x512xf32, #tpu.memory_space<vmem>>, vector<8x512xf32>
    tpu.vector_store %arg11[%c112_203, %c0_204], %228 {strides = array<i32>} : memref<216x512xf32, #tpu.memory_space<vmem>>, vector<8x512xf32>,
    %c0_205 = arith.constant 0 : index
    %c135_206 = arith.constant 135 : index
    %230 = vector.load %arg10[%c0_205, %c135_206] : memref<8x768xf32, #tpu.memory_space<vmem>>, vector<8x512xf32>
    %c15_207 = arith.constant 15 : index
    %c0_208 = arith.constant 0 : index
    %231 = vector.load %arg8[%c15_207, %c0_208] : memref<27x512xf32, #tpu.memory_space<vmem>>, vector<1x512xf32>
    %232 = vector.broadcast %231 : vector<1x512xf32> to vector<8x512xf32>
    %233 = arith.mulf %230, %232 : vector<8x512xf32>
    %c120_209 = arith.constant 120 : index
    %c0_210 = arith.constant 0 : index
    %234 = vector.load %arg11[%c120_209, %c0_210] : memref<216x512xf32, #tpu.memory_space<vmem>>, vector<8x512xf32>
    tpu.vector_store %arg11[%c120_209, %c0_210], %233 {strides = array<i32>} : memref<216x512xf32, #tpu.memory_space<vmem>>, vector<8x512xf32>,
    %c0_211 = arith.constant 0 : index
    %c136_212 = arith.constant 136 : index
    %235 = vector.load %arg10[%c0_211, %c136_212] : memref<8x768xf32, #tpu.memory_space<vmem>>, vector<8x512xf32>
    %c16_213 = arith.constant 16 : index
    %c0_214 = arith.constant 0 : index
    %236 = vector.load %arg8[%c16_213, %c0_214] : memref<27x512xf32, #tpu.memory_space<vmem>>, vector<1x512xf32>
    %237 = vector.broadcast %236 : vector<1x512xf32> to vector<8x512xf32>
    %238 = arith.mulf %235, %237 : vector<8x512xf32>
    %c128_215 = arith.constant 128 : index
    %c0_216 = arith.constant 0 : index
    %239 = vector.load %arg11[%c128_215, %c0_216] : memref<216x512xf32, #tpu.memory_space<vmem>>, vector<8x512xf32>
    tpu.vector_store %arg11[%c128_215, %c0_216], %238 {strides = array<i32>} : memref<216x512xf32, #tpu.memory_space<vmem>>, vector<8x512xf32>,
    %c0_217 = arith.constant 0 : index
    %c137_218 = arith.constant 137 : index
    %240 = vector.load %arg10[%c0_217, %c137_218] : memref<8x768xf32, #tpu.memory_space<vmem>>, vector<8x512xf32>
    %c17_219 = arith.constant 17 : index
    %c0_220 = arith.constant 0 : index
    %241 = vector.load %arg8[%c17_219, %c0_220] : memref<27x512xf32, #tpu.memory_space<vmem>>, vector<1x512xf32>
    %242 = vector.broadcast %241 : vector<1x512xf32> to vector<8x512xf32>
    %243 = arith.mulf %240, %242 : vector<8x512xf32>
    %c136_221 = arith.constant 136 : index
    %c0_222 = arith.constant 0 : index
    %244 = vector.load %arg11[%c136_221, %c0_222] : memref<216x512xf32, #tpu.memory_space<vmem>>, vector<8x512xf32>
    tpu.vector_store %arg11[%c136_221, %c0_222], %243 {strides = array<i32>} : memref<216x512xf32, #tpu.memory_space<vmem>>, vector<8x512xf32>,
    %c0_223 = arith.constant 0 : index
    %c183_224 = arith.constant 183 : index
    %245 = vector.load %arg10[%c0_223, %c183_224] : memref<8x768xf32, #tpu.memory_space<vmem>>, vector<8x512xf32>
    %c18_225 = arith.constant 18 : index
    %c0_226 = arith.constant 0 : index
    %246 = vector.load %arg8[%c18_225, %c0_226] : memref<27x512xf32, #tpu.memory_space<vmem>>, vector<1x512xf32>
    %247 = vector.broadcast %246 : vector<1x512xf32> to vector<8x512xf32>
    %248 = arith.mulf %245, %247 : vector<8x512xf32>
    %c144_227 = arith.constant 144 : index
    %c0_228 = arith.constant 0 : index
    %249 = vector.load %arg11[%c144_227, %c0_228] : memref<216x512xf32, #tpu.memory_space<vmem>>, vector<8x512xf32>
    tpu.vector_store %arg11[%c144_227, %c0_228], %248 {strides = array<i32>} : memref<216x512xf32, #tpu.memory_space<vmem>>, vector<8x512xf32>,
    %c0_229 = arith.constant 0 : index
    %c184_230 = arith.constant 184 : index
    %250 = vector.load %arg10[%c0_229, %c184_230] : memref<8x768xf32, #tpu.memory_space<vmem>>, vector<8x512xf32>
    %c19_231 = arith.constant 19 : index
    %c0_232 = arith.constant 0 : index
    %251 = vector.load %arg8[%c19_231, %c0_232] : memref<27x512xf32, #tpu.memory_space<vmem>>, vector<1x512xf32>
    %252 = vector.broadcast %251 : vector<1x512xf32> to vector<8x512xf32>
    %253 = arith.mulf %250, %252 : vector<8x512xf32>
    %c152_233 = arith.constant 152 : index
    %c0_234 = arith.constant 0 : index
    %254 = vector.load %arg11[%c152_233, %c0_234] : memref<216x512xf32, #tpu.memory_space<vmem>>, vector<8x512xf32>
    tpu.vector_store %arg11[%c152_233, %c0_234], %253 {strides = array<i32>} : memref<216x512xf32, #tpu.memory_space<vmem>>, vector<8x512xf32>,
    %c0_235 = arith.constant 0 : index
    %c185_236 = arith.constant 185 : index
    %255 = vector.load %arg10[%c0_235, %c185_236] : memref<8x768xf32, #tpu.memory_space<vmem>>, vector<8x512xf32>
    %c20_237 = arith.constant 20 : index
    %c0_238 = arith.constant 0 : index
    %256 = vector.load %arg8[%c20_237, %c0_238] : memref<27x512xf32, #tpu.memory_space<vmem>>, vector<1x512xf32>
    %257 = vector.broadcast %256 : vector<1x512xf32> to vector<8x512xf32>
    %258 = arith.mulf %255, %257 : vector<8x512xf32>
    %c160_239 = arith.constant 160 : index
    %c0_240 = arith.constant 0 : index
    %259 = vector.load %arg11[%c160_239, %c0_240] : memref<216x512xf32, #tpu.memory_space<vmem>>, vector<8x512xf32>
    tpu.vector_store %arg11[%c160_239, %c0_240], %258 {strides = array<i32>} : memref<216x512xf32, #tpu.memory_space<vmem>>, vector<8x512xf32>,
    %c0_241 = arith.constant 0 : index
    %c191_242 = arith.constant 191 : index
    %260 = vector.load %arg10[%c0_241, %c191_242] : memref<8x768xf32, #tpu.memory_space<vmem>>, vector<8x512xf32>
    %c21_243 = arith.constant 21 : index
    %c0_244 = arith.constant 0 : index
    %261 = vector.load %arg8[%c21_243, %c0_244] : memref<27x512xf32, #tpu.memory_space<vmem>>, vector<1x512xf32>
    %262 = vector.broadcast %261 : vector<1x512xf32> to vector<8x512xf32>
    %263 = arith.mulf %260, %262 : vector<8x512xf32>
    %c168_245 = arith.constant 168 : index
    %c0_246 = arith.constant 0 : index
    %264 = vector.load %arg11[%c168_245, %c0_246] : memref<216x512xf32, #tpu.memory_space<vmem>>, vector<8x512xf32>
    tpu.vector_store %arg11[%c168_245, %c0_246], %263 {strides = array<i32>} : memref<216x512xf32, #tpu.memory_space<vmem>>, vector<8x512xf32>,
    %c0_247 = arith.constant 0 : index
    %c192_248 = arith.constant 192 : index
    %265 = vector.load %arg10[%c0_247, %c192_248] : memref<8x768xf32, #tpu.memory_space<vmem>>, vector<8x512xf32>
    %c22_249 = arith.constant 22 : index
    %c0_250 = arith.constant 0 : index
    %266 = vector.load %arg8[%c22_249, %c0_250] : memref<27x512xf32, #tpu.memory_space<vmem>>, vector<1x512xf32>
    %267 = vector.broadcast %266 : vector<1x512xf32> to vector<8x512xf32>
    %268 = arith.mulf %265, %267 : vector<8x512xf32>
    %c176_251 = arith.constant 176 : index
    %c0_252 = arith.constant 0 : index
    %269 = vector.load %arg11[%c176_251, %c0_252] : memref<216x512xf32, #tpu.memory_space<vmem>>, vector<8x512xf32>
    tpu.vector_store %arg11[%c176_251, %c0_252], %268 {strides = array<i32>} : memref<216x512xf32, #tpu.memory_space<vmem>>, vector<8x512xf32>,
    %c0_253 = arith.constant 0 : index
    %c193_254 = arith.constant 193 : index
    %270 = vector.load %arg10[%c0_253, %c193_254] : memref<8x768xf32, #tpu.memory_space<vmem>>, vector<8x512xf32>
    %c23_255 = arith.constant 23 : index
    %c0_256 = arith.constant 0 : index
    %271 = vector.load %arg8[%c23_255, %c0_256] : memref<27x512xf32, #tpu.memory_space<vmem>>, vector<1x512xf32>
    %272 = vector.broadcast %271 : vector<1x512xf32> to vector<8x512xf32>
    %273 = arith.mulf %270, %272 : vector<8x512xf32>
    %c184_257 = arith.constant 184 : index
    %c0_258 = arith.constant 0 : index
    %274 = vector.load %arg11[%c184_257, %c0_258] : memref<216x512xf32, #tpu.memory_space<vmem>>, vector<8x512xf32>
    tpu.vector_store %arg11[%c184_257, %c0_258], %273 {strides = array<i32>} : memref<216x512xf32, #tpu.memory_space<vmem>>, vector<8x512xf32>,
    %c0_259 = arith.constant 0 : index
    %c199_260 = arith.constant 199 : index
    %275 = vector.load %arg10[%c0_259, %c199_260] : memref<8x768xf32, #tpu.memory_space<vmem>>, vector<8x512xf32>
    %c24_261 = arith.constant 24 : index
    %c0_262 = arith.constant 0 : index
    %276 = vector.load %arg8[%c24_261, %c0_262] : memref<27x512xf32, #tpu.memory_space<vmem>>, vector<1x512xf32>
    %277 = vector.broadcast %276 : vector<1x512xf32> to vector<8x512xf32>
    %278 = arith.mulf %275, %277 : vector<8x512xf32>
    %c192_263 = arith.constant 192 : index
    %c0_264 = arith.constant 0 : index
    %279 = vector.load %arg11[%c192_263, %c0_264] : memref<216x512xf32, #tpu.memory_space<vmem>>, vector<8x512xf32>
    tpu.vector_store %arg11[%c192_263, %c0_264], %278 {strides = array<i32>} : memref<216x512xf32, #tpu.memory_space<vmem>>, vector<8x512xf32>,
    %c0_265 = arith.constant 0 : index
    %c200_266 = arith.constant 200 : index
    %280 = vector.load %arg10[%c0_265, %c200_266] : memref<8x768xf32, #tpu.memory_space<vmem>>, vector<8x512xf32>
    %c25_267 = arith.constant 25 : index
    %c0_268 = arith.constant 0 : index
    %281 = vector.load %arg8[%c25_267, %c0_268] : memref<27x512xf32, #tpu.memory_space<vmem>>, vector<1x512xf32>
    %282 = vector.broadcast %281 : vector<1x512xf32> to vector<8x512xf32>
    %283 = arith.mulf %280, %282 : vector<8x512xf32>
    %c200_269 = arith.constant 200 : index
    %c0_270 = arith.constant 0 : index
    %284 = vector.load %arg11[%c200_269, %c0_270] : memref<216x512xf32, #tpu.memory_space<vmem>>, vector<8x512xf32>
    tpu.vector_store %arg11[%c200_269, %c0_270], %283 {strides = array<i32>} : memref<216x512xf32, #tpu.memory_space<vmem>>, vector<8x512xf32>,
    %c0_271 = arith.constant 0 : index
    %c201_272 = arith.constant 201 : index
    %285 = vector.load %arg10[%c0_271, %c201_272] : memref<8x768xf32, #tpu.memory_space<vmem>>, vector<8x512xf32>
    %c26_273 = arith.constant 26 : index
    %c0_274 = arith.constant 0 : index
    %286 = vector.load %arg8[%c26_273, %c0_274] : memref<27x512xf32, #tpu.memory_space<vmem>>, vector<1x512xf32>
    %287 = vector.broadcast %286 : vector<1x512xf32> to vector<8x512xf32>
    %288 = arith.mulf %285, %287 : vector<8x512xf32>
    %c208_275 = arith.constant 208 : index
    %c0_276 = arith.constant 0 : index
    %289 = vector.load %arg11[%c208_275, %c0_276] : memref<216x512xf32, #tpu.memory_space<vmem>>, vector<8x512xf32>
    tpu.vector_store %arg11[%c208_275, %c0_276], %288 {strides = array<i32>} : memref<216x512xf32, #tpu.memory_space<vmem>>, vector<8x512xf32>,
    %c0_277 = arith.constant 0 : index
    %c0_278 = arith.constant 0 : index
    %290 = vector.load %arg5[%c0_277, %c0_278] : memref<8x216xbf16, #tpu.memory_space<vmem>>, vector<8x216xbf16>
    %c0_279 = arith.constant 0 : index
    %c0_280 = arith.constant 0 : index
    %291 = vector.load %arg11[%c0_279, %c0_280] : memref<216x512xf32, #tpu.memory_space<vmem>>, vector<216x512xf32>
    %292 = arith.truncf %291 : vector<216x512xf32> to vector<216x512xbf16>
    %cst_281 = arith.constant dense<0.000000e+00> : vector<8x512xf32>
    %293 = tpu.matmul %290, %292, %cst_281 {dimension_numbers = #tpu.dot_dimension_numbers<[1], [0], [0], [1], [0, 0, 1, 1], [], []>} : vector<8x216xbf16>, vector<216x512xbf16>, vector<8x512xf32> -> vector<8x512xf32>
    %c0_282 = arith.constant 0 : index
    %c0_283 = arith.constant 0 : index
    %294 = vector.load %arg6[%c0_282, %c0_283] : memref<8x1xf32, #tpu.memory_space<vmem>>, vector<8x1xf32>
    %295 = vector.broadcast %294 : vector<8x1xf32> to vector<8x512xf32>
    %296 = arith.mulf %293, %295 : vector<8x512xf32>
    %c0_284 = arith.constant 0 : index
    %c0_285 = arith.constant 0 : index
    %297 = vector.load %arg7[%c0_284, %c0_285] : memref<8x1xf32, #tpu.memory_space<vmem>>, vector<8x1xf32>
    %298 = vector.broadcast %297 : vector<8x1xf32> to vector<8x512xf32>
    %299 = arith.addf %296, %298 : vector<8x512xf32>
    %300 = arith.addf %299, %5 : vector<8x512xf32>
    %cst_286 = arith.constant 0.000000e+00 : f32
    %301 = vector.broadcast %cst_286 : f32 to vector<8x512xf32>
    %302 = arith.maximumf %300, %301 : vector<8x512xf32>
    %c0_287 = arith.constant 0 : index
    %c0_288 = arith.constant 0 : index
    %c0_289 = arith.constant 0 : index
    %303 = vector.load %arg9[%c0_287, %c0_288, %c0_289] : memref<1x8x512xf32, #tpu.memory_space<vmem>>, vector<1x8x512xf32>
    %304 = vector.shape_cast %303 : vector<1x8x512xf32> to vector<8x512xf32>
    %305 = vector.shape_cast %302 : vector<8x512xf32> to vector<1x8x512xf32>
    tpu.vector_store %arg9[%c0_287, %c0_288, %c0_289], %305 {strides = array<i32>} : memref<1x8x512xf32, #tpu.memory_space<vmem>>, vector<1x8x512xf32>,
    return
  }
  func.func @transform_0(%arg0: i32) -> (i32, i32, i32) {
    %c0_i32 = arith.constant 0 : i32
    %c0_i32_0 = arith.constant 0 : i32
    %c0_i32_1 = arith.constant 0 : i32
    return %arg0, %c0_i32, %c0_i32_0 : i32, i32, i32
  }
  func.func @transform_1(%arg0: i32) -> (i32, i32) {
    %c0_i32 = arith.constant 0 : i32
    %c0_i32_0 = arith.constant 0 : i32
    %c0_i32_1 = arith.constant 0 : i32
    return %c0_i32, %c0_i32_0 : i32, i32
  }
  func.func @transform_2(%arg0: i32) -> (i32, i32) {
    %c0_i32 = arith.constant 0 : i32
    %c0_i32_0 = arith.constant 0 : i32
    %c0_i32_1 = arith.constant 0 : i32
    return %c0_i32, %c0_i32_0 : i32, i32
  }
  func.func @transform_3(%arg0: i32) -> (i32, i32) {
    %c0_i32 = arith.constant 0 : i32
    %c0_i32_0 = arith.constant 0 : i32
    %c0_i32_1 = arith.constant 0 : i32
    return %c0_i32, %c0_i32_0 : i32, i32
  }
  func.func @transform_4(%arg0: i32) -> (i32, i32) {
    %c0_i32 = arith.constant 0 : i32
    %c0_i32_0 = arith.constant 0 : i32
    %c0_i32_1 = arith.constant 0 : i32
    return %c0_i32, %c0_i32_0 : i32, i32
  }
  func.func @transform_5(%arg0: i32) -> (i32, i32) {
    %c0_i32 = arith.constant 0 : i32
    %c0_i32_0 = arith.constant 0 : i32
    %c0_i32_1 = arith.constant 0 : i32
    return %c0_i32, %c0_i32_0 : i32, i32
  }
  func.func @transform_6(%arg0: i32) -> (i32, i32) {
    %c0_i32 = arith.constant 0 : i32
    %c0_i32_0 = arith.constant 0 : i32
    %c0_i32_1 = arith.constant 0 : i32
    return %c0_i32, %c0_i32_0 : i32, i32
  }
  func.func @transform_7(%arg0: i32) -> (i32, i32) {
    %c0_i32 = arith.constant 0 : i32
    %c0_i32_0 = arith.constant 0 : i32
    %c0_i32_1 = arith.constant 0 : i32
    return %c0_i32, %c0_i32_0 : i32, i32
  }
  func.func @transform_8(%arg0: i32) -> (i32, i32, i32) {
    %c0_i32 = arith.constant 0 : i32
    %c0_i32_0 = arith.constant 0 : i32
    %c0_i32_1 = arith.constant 0 : i32
    return %arg0, %c0_i32, %c0_i32_0 : i32, i32, i32
  }
}

</mosaic_0001>

<bundles_post_ra>
// kernel: tpu_custom_call.1
= control target key start
LH: loop header
LB: loop body
LE: loop exit
PB: predicated region body
PF: predicated region fallthrough
CT: control target
= control target key end

     0   :  { %s7758_s0 = inlined_call_operand.hbm [shape: f32[2,8,512], index: 0, kind: input, shape index: {}]   ;;  %s7759_s1 = inlined_call_operand.vmem [shape: bf16[8,216], index: 1, kind: input, shape index: {}]   ;;  %s7760_s2 = inlined_call_operand.vmem [shape: f32[8,1], index: 2, kind: input, shape index: {}]   ;;  %s7761_s3 = inlined_call_operand.vmem [shape: f32[8,1], index: 3, kind: input, shape index: {}]   ;;  %s7762_s4 = inlined_call_operand.vmem [shape: bf16[8,216], index: 4, kind: input, shape index: {}]   ;;  %s7763_s5 = inlined_call_operand.vmem [shape: f32[8,1], index: 5, kind: input, shape index: {}]   ;;  %s7764_s6 = inlined_call_operand.vmem [shape: f32[8,1], index: 6, kind: input, shape index: {}]   ;;  %s7765_s7 = inlined_call_operand.hbm [shape: f32[27,512], index: 7, kind: input, shape index: {}]   ;;  %s7766_s8 = inlined_call_operand.hbm [shape: f32[2,8,512], index: 8, kind: output, shape index: {}]  }
   0x1   :  { %7829 = sst [smem:[#allocation26_spill]] %s7758_s0 }
   0x2   :  { %7830 = sst [smem:[#allocation27_spill]] %s7759_s1 }
   0x3   :  { %7831 = sst [smem:[#allocation28_spill]] %s7760_s2 }
   0x4   :  { %7832 = sst [smem:[#allocation29_spill]] %s7761_s3 }
   0x5   :  { %7833 = sst [smem:[#allocation30_spill]] %s7765_s7 }
   0x6   :  { %13 = vsyncpa [#allocation5], 0 }
   0x7   :  { %15 = vsyncpa [#allocation5 + $0x1], 0 }
   0x8   :  { %16 = vsyncpa [#allocation8], 0 }
   0x9   :  { %17 = vsyncpa [#allocation6], 0 }
   0xa   :  { %19 = vsyncpa [#allocation6 + $0x1], 0  ;;  %s5688_s27 = smov 0   ;;  %s5690_s28 = smov 0  }
   0xb   :  { %s5692_s29 = smov 0   ;;  %s5694_s30 = smov 0  }
   0xc LB: > { %s5709_s9 = sadd.s32 4294967295, %s5618_s30   ;;  %s4844_s10 = sadd.s32 4294967294, %s5618_s30   ;;  %s5618_s30 = sphi %s5694_s30, %s7946_s30   ;;  %s5614_s29 = sphi %s5692_s29, %s7949_s29   ;;  %s5610_s28 = sphi %s5690_s28, %s7948_s28   ;;  %s5606_s27 = sphi %s5688_s27, %s7947_s27  }
   0xd   : > { %p45_p0 = scmp.ne.s32.totalorder %s5610_s28, %s5606_s27  ;;  %p7767_p1 = scmp.eq.s32.totalorder %s5709_s9, 0 }
   0xe   : > { %p222_p3 = scmp.eq.s32.totalorder %s4844_s10, 1  ;;  %p4845_p5 = scmp.ge.s32.totalorder %s5618_s30, 1 }
   0xf   : > { %p5718_p4 = por %p7767_p1, %p45_p0  ;;  %p229_p7 = scmp.lt.s32.totalorder %s5618_s30, 3 }
  0x10   : > { %p5723_p6 = por %p222_p3, %p45_p0  ;;  %s5620_s14 = smov [#allocation7]  }
  0x11   : > { %s7834_s11 = scalar_select %p5718_p4, 1, 0 }
  0x12   : > { %s7835_s12 = scalar_select %p5723_p6, 1, 0 }
  0x13   : > { %p5728_p8 = pnand %p4845_p5, %p229_p7  ;;  %s259_s15 = sshll.u32 %s5620_s14, 4  ;;  %s5732_s15 = int_to_ptr.vmem [resolvable:$true] %s259_s15 }
  0x14   : > { %s5744_s17 = sadd.s32 1, %s5618_s30   ;;  %s32_s18 = sadd.s32 1, %s5614_s29 }
  0x15   : > { %s7836_s13 = scalar_select %p5728_p8, 1, 0 }
  0x16   : > { %p4882_p9 = pneg %p5728_p8  ;;  %7838 = sst [smem:[#allocation13_spill]] %s5744_s17 }
  0x17   : > { %s29_s19 = ssub.s32 %s5618_s30, %s5744_s17  ;;  %s7839_s7 = sld [smem:[#allocation30_spill]] }
  0x18   : > { %p5739_p11 = pnand %p4882_p9, %p7767_p1 }
  0x1a   : > { %p5492_p13 = pneg %p5739_p11 }
  0x1d   : > { %s5490_s22 = scalar_lea.hbm %s7839_s7, 2048 }
  0x1e   : > { %p5491_p12 = scmp.ne.s32.totalorder %s7839_s7, %s5490_s22  ;;  %p5497_p5 = scmp.lt.u32.totalorder %s5490_s22, %s7839_s7 }
  0x20   : > { %p5493_p0 = pnand %p5492_p13, %p5491_p12 }
  0x22   : > { %p5494_p3 = pneg %p5493_p0 }
  0x24   : > { %p5499_p7 = pnand %p5497_p5, %p5494_p3 }
  0x26   : > { %5502 = shalt.err (!%p5499_p7)
}
  0x27   : > { %s5503_s10 = scalar_lea.vmem %s5732_s15, 2048  ;;  %p5511_p2 = scmp.lt.s32.totalorder %s5732_s15, %s5732_s15 }
  0x28   : > { %p5504_p9 = scmp.ne.s32.totalorder %s5732_s15, %s5503_s10  ;;  %p5512_p6 = scmp.lt.s32.totalorder %s5503_s10, %s5503_s10 }
  0x2a   : > { %p5506_p10 = pnand %p5504_p9, %p5492_p13  ;;  %p5513_p4 = por %p5512_p6, %p5511_p2 }
  0x2c   : > { %p5507_p1 = pneg %p5506_p10 }
  0x2e   : > { %p5514_p8 = pnand %p5513_p4, %p5507_p1 }
  0x30   : > { %5517 = shalt.err (!%p5514_p8)
}
  0x31   : > { %s5621_s14 = smov 512   ;;  %s5622_s20 = smov 32  }
  0x32   : > { %4885 = dma.hbm_to_vmem [thread:$0]  (!%p5739_p11), %s7839_s7, 2048, %s5732_s15, [#allocation8], %s5621_s14, %s5621_s14, %s5622_s20  }
  0x33   : > { %p30_p2 = scmp.eq.s32.totalorder %s29_s19, 0  ;;  %p39_p1 = scmp.ne.s32.totalorder %s5614_s29, %s5610_s28 }
  0x34   : > { %p40_p4 = scmp.eq.s32.totalorder %s5618_s30, 0  ;;  %p4895_p6 = scmp.lt.s32.totalorder %s5618_s30, 2 }
  0x35   : > { %s5775_s23 = scalar_select %p30_p2, %s5614_s29, %s32_s18  }
  0x36   : > { %p41_p8 = por %p40_p4, %p39_p1  ;;  %p7840_p10 = scmp.eq.s32.totalorder %s5709_s9, 1 }
  0x37   : > { %s273_s25 = sand.u32 1, %s5614_s29   ;;  %s4872_s26 = sshll.u32 %s5618_s30, 9 }
  0x38   : > { %p5779_p12 = por %p7840_p10, %p39_p1  ;;  %s4848_s10 = sshll.u32 %s273_s25, 5 }
  0x39   : > { %s7842_s0 = sld [smem:[#allocation26_spill]]  ;;  %s277_s15 = scalar_lea.vmem [#allocation4], %s4848_s10 }
  0x3a   : > { %s285_s18 = sshll.u32 %s277_s15, 4  ;;  %p5790_p11 = pnand %p4895_p6, %p41_p8  ;;  %s5794_s18 = int_to_ptr.vmem [resolvable:$true] %s285_s18 }
  0x3b   : > { %s274_s14 = scalar_lea.sflag [#allocation5], %s273_s25 }
  0x3c   : > { %p5520_p0 = pneg %p5790_p11 }
  0x3f   : > { %s5788_s21 = scalar_lea.hbm %s7842_s0, %s4872_s26  ;;  %s5523_s26 = scalar_lea.hbm %s7842_s0, 1024 }
  0x40   : > { %s5518_s20 = scalar_lea.hbm %s5788_s21, 512  ;;  %p5524_p7 = scmp.lt.u32.totalorder %s5788_s21, %s7842_s0 }
  0x41   : > { %p5519_p13 = scmp.ne.s32.totalorder %s5788_s21, %s5518_s20  ;;  %p5525_p9 = scmp.lt.u32.totalorder %s5523_s26, %s5518_s20 }
  0x42   : > { %p5527_p1 = scmp.lt.u32.totalorder %s5518_s20, %s5788_s21 }
  0x43   : > { %p5521_p3 = pnand %p5520_p0, %p5519_p13  ;;  %p5526_p2 = por %p5525_p9, %p5524_p7 }
  0x45   : > { %p5522_p5 = pneg %p5521_p3  ;;  %p5528_p4 = por %p5527_p1, %p5526_p2 }
  0x47   : > { %p5529_p6 = pnand %p5528_p4, %p5522_p5 }
  0x49   : > { %5532 = shalt.err (!%p5529_p6)
}
  0x4a   : > { %s5533_s25 = scalar_lea.vmem %s5794_s18, 512  ;;  %s5623_s15 = smov [#allocation4]  }
  0x4b   : > { %p5534_p8 = scmp.ne.s32.totalorder %s5794_s18, %s5533_s25  ;;  %s5538_s17 = sshll.u32 %s5623_s15, 4  ;;  %s5539_s17 = int_to_ptr.vmem [resolvable:$false] %s5538_s17 }
  0x4c   : > { %s5540_s22 = scalar_lea.vmem %s5539_s17, 1024  ;;  %p5541_p3 = scmp.lt.s32.totalorder %s5794_s18, %s5539_s17 }
  0x4d   : > { %p5536_p10 = pnand %p5534_p8, %p5520_p0  ;;  %p5542_p7 = scmp.lt.s32.totalorder %s5540_s22, %s5533_s25 }
  0x4f   : > { %p5537_p13 = pneg %p5536_p10  ;;  %p5543_p9 = por %p5542_p7, %p5541_p3 }
  0x51   : > { %p5544_p2 = pnand %p5543_p9, %p5537_p13 }
  0x53   : > { %5547 = shalt.err (!%p5544_p2)
}
  0x54   : > { %4889 = dma.hbm_to_vmem [thread:$0]  (!%p5790_p11), %s5788_s21, 512, %s5794_s18, %s274_s14  }
  0x55   : > { %p7844_p5 = scmp.ne.s32.totalorder %s7836_s13, 0 }
  0x57   : > { %294 = sbr.rel (%p7844_p5) target bundleno = 2077 (0x81d), region = 52 }
  0x5e   : > { %s5824_s20 = sand.u32 1, %s5610_s28   ;;  %p7845_p0 = scmp.ne.s32.totalorder %s7834_s11, 0 }
  0x5f   : > { %s7772_s26 = sshll.u32 %s5824_s20, 5  ;;  %s297_s10 = scalar_lea.sflag [#allocation5], %s5824_s20 }
  0x60   : > { %s5830_s16 = scalar_lea.vmem [#allocation4], %s7772_s26 }
  0x61   : > { %5593 = dma.done.wait (%p7845_p0), %s297_s10, 512  }
  0x62   : > { %5595 = vsyncadd (%p7845_p0), %s297_s10, 4294966784  ;;  %p7846_p11 = scmp.eq.s32.totalorder %s5709_s9, 0 }
  0x64   : > { %5597 = dma.done.wait (%p7846_p11), [#allocation8], 2048   ;;  %p7847_p1 = pmov %p7846_p11 }
  0x65   : > { %v355_v0 = vlaneseq  ;;  %v353_v6 = vld [vmem:[#allocation7] ss:$8 sm:$0xf]  ;;  %s7792_s11 = smov 55   ;;  %s7810_s13 = smov 56   ;;  %vm7828_vm0 = vcmask 449536  }
  0x66   : > { %5599 = vsyncadd (%p7847_p1), [#allocation8], 4294965248  ;;  %v427_v11 = vld [vmem:[#allocation7 + $0x1] ss:$8 sm:$0xf]  ;;  %s7808_s21 = smov 57  }
  0x67   : > { %v356_v1 = vshrl.u32 %v355_v0, 7  ;;  %v501_v16 = vld [vmem:[#allocation7 + $0x2] ss:$8 sm:$0xf]  ;;  %s7803_s18 = smov 63   ;;  %s7801_s19 = smov 64  }
  0x68   : > { %v575_v21 = vld [vmem:[#allocation7 + $0x3] ss:$8 sm:$0xf]  ;;  %v649_v26 = vld [vmem:[#allocation7 + $0x4] ss:$8 sm:$0xf] }
  0x69   : > { %v5840_v2 = vsub.s32 2, %v356_v1  ;;  %v5842_v3 = vsub.s32 0, %v356_v1  ;;  %v5844_v4 = vsub.s32 3, %v356_v1  ;;  %v5846_v5 = vsub.s32 1, %v356_v1  ;;  %s7799_s14 = smov 65   ;;  %s7796_s25 = smov 71  }
  0x6a   : > { %v722_v31 = vld [vmem:[#allocation7 + $0x5] ss:$8 sm:$0xf]  ;;  %v794_v36 = vld [vmem:[#allocation7 + $0x6] ss:$8 sm:$0xf] }
  0x6b   : > { %7848 = vst [vmem:[#allocation14_spill] sm:$0xff] %v5840_v2  ;;  %7849 = vst [vmem:[#allocation15_spill] sm:$0xff] %v5842_v3  ;;  %v366_v7 = vrot.slane %v353_v6, %v5840_v2  ;;  %v358_v8 = vrot.slane %v353_v6, %v5842_v3  ;;  %v370_v9 = vrot.slane %v353_v6, %v5844_v4  ;;  %v866_v41 = vld [vmem:[#allocation7 + $0x7] ss:$8 sm:$0xf]  ;;  %s7794_s15 = smov 72  }
  0x6c   : > { %7850 = vst [vmem:[#allocation16_spill] sm:$0xff] %v5844_v4  ;;  %7851 = vst [vmem:[#allocation17_spill] sm:$0xff] %v5846_v5  ;;  %v362_v10 = vrot.slane %v353_v6, %v5846_v5  ;;  %v432_v12 = vrot.slane %v427_v11, %v5842_v3  ;;  %v436_v13 = vrot.slane %v427_v11, %v5846_v5  ;;  %v938_v46 = vld [vmem:[#allocation7 + $0x20] ss:$8 sm:$0xf]  ;;  %s7779_s17 = smov 73  }
  0x6d   : > { %375 = vrot.lane.b32.xlu1 %v366_v7, %s7792_s11  ;;  %371 = vrot.lane.b32.xlu0 %v358_v8, %s7792_s11  ;;  %v440_v14 = vrot.slane %v427_v11, %v5840_v2  ;;  %v444_v15 = vrot.slane %v427_v11, %v5844_v4  ;;  %v510_v17 = vrot.slane %v501_v16, %v5846_v5  ;;  %v5918_v51 = vld [vmem:[#allocation7 + $0x21] ss:$8 sm:$0xf]  ;;  %s7773_s22 = smov 119   ;;  %vm7827_vm1 = vcmask 457728   ;;  %s7783_s10 = smov 9  }
  0x6e   : > { %v506_v18 = vrot.slane %v501_v16, %v5842_v3  ;;  %v518_v19 = vrot.slane %v501_v16, %v5844_v4  ;;  %v514_v20 = vrot.slane %v501_v16, %v5840_v2  ;;  %v580_v22 = vrot.slane %v575_v21, %v5842_v3  ;;  %v5934_v57 = vld [vmem:[%s5830_s16 + $0x18] sm:$0xff]  ;;  %s7775_s26 = smov 120   ;;  %s7857_s1 = sld [smem:[#allocation27_spill]] }
  0x6f   : > { %v584_v23 = vrot.slane %v575_v21, %v5846_v5  ;;  %v588_v24 = vrot.slane %v575_v21, %v5840_v2  ;;  %v592_v25 = vrot.slane %v575_v21, %v5844_v4  ;;  %v658_v27 = vrot.slane %v649_v26, %v5846_v5  ;;  %s7859_s2 = sld [smem:[#allocation28_spill]]  ;;  %s7860_s3 = sld [smem:[#allocation29_spill]] }
  0x70   : > { %v654_v28 = vrot.slane %v649_v26, %v5842_v3  ;;  %v666_v29 = vrot.slane %v649_v26, %v5844_v4  ;;  %v662_v30 = vrot.slane %v649_v26, %v5840_v2  ;;  %v727_v32 = vrot.slane %v722_v31, %v5842_v3  ;;  %s7870_s0 = smov 7   ;;  %s7874_s7 = smov 57  }
  0x71   : > { %377 = vrot.lane.b32.xlu1 %v370_v9, %s7792_s11  ;;  %373 = vrot.lane.b32.xlu0 %v362_v10, %s7792_s11  ;;  %v731_v33 = vrot.slane %v722_v31, %v5846_v5  ;;  %v735_v34 = vrot.slane %v722_v31, %v5840_v2  ;;  %v739_v35 = vrot.slane %v722_v31, %v5844_v4  ;;  %vm7826_vm2 = vcmask 465920  }
  0x72   : > { %v803_v37 = vrot.slane %v794_v36, %v5846_v5  ;;  %v799_v38 = vrot.slane %v794_v36, %v5842_v3  ;;  %v811_v39 = vrot.slane %v794_v36, %v5844_v4  ;;  %v807_v40 = vrot.slane %v794_v36, %v5840_v2 }
  0x73   : > { %v871_v42 = vrot.slane %v866_v41, %v5842_v3  ;;  %v875_v43 = vrot.slane %v866_v41, %v5846_v5  ;;  %v879_v44 = vrot.slane %v866_v41, %v5840_v2  ;;  %v883_v45 = vrot.slane %v866_v41, %v5844_v4 }
  0x74   : > { %v947_v47 = vrot.slane %v938_v46, %v5846_v5  ;;  %v943_v48 = vrot.slane %v938_v46, %v5842_v3  ;;  %v955_v49 = vrot.slane %v938_v46, %v5844_v4  ;;  %v951_v50 = vrot.slane %v938_v46, %v5840_v2 }
  0x75   : > { %445 = vrot.lane.b32.xlu1 %v432_v12, %s7810_s13  ;;  %447 = vrot.lane.b32.xlu0 %v436_v13, %s7810_s13  ;;  %v1015_v52 = vrot.slane %v5918_v51, %v5842_v3  ;;  %v1019_v53 = vrot.slane %v5918_v51, %v5846_v5  ;;  %v1023_v54 = vrot.slane %v5918_v51, %v5840_v2  ;;  %vm601_vm3 = vcmask 515072  }
  0x76   : > { %vm675_vm4 = vcmask 523264   ;;  %vm630_vm5 = vcmask 531456   ;;  %vm556_vm6 = vcmask 580608   ;;  %vm482_vm7 = vcmask 588800  }
  0x77   : > { %vm408_vm8 = vcmask 596992   ;;  %vm7785_vm9 = vcmask 973824   ;;  %vm7798_vm10 = vcmask 72704   ;;  %vm1110_vm11 = vcmask 982016  }
  0x78   : > { %vm1184_vm12 = vcmask 990208   ;;  %vm7807_vm13 = vcmask 56320   ;;  %vm7806_vm14 = vcmask 64512   ;;  %vm1258_vm15 = vcmask 1039360  }
  0x79   : > { %449 = vrot.lane.b32.xlu1 %v440_v14, %s7810_s13  ;;  %451 = vrot.lane.b32.xlu0 %v444_v15, %s7810_s13 }
  0x7d   : > { %521 = vrot.lane.b32.xlu1 %v510_v17, %s7808_s21  ;;  %519 = vrot.lane.b32.xlu0 %v506_v18, %s7808_s21 }
  0x81   : > { %525 = vrot.lane.b32.xlu1 %v518_v19, %s7808_s21  ;;  %523 = vrot.lane.b32.xlu0 %v514_v20, %s7808_s21 }
  0x85   : > { %593 = vrot.lane.b32.xlu1 %v580_v22, %s7803_s18  ;;  %595 = vrot.lane.b32.xlu0 %v584_v23, %s7803_s18 }
  0x89   : > { %597 = vrot.lane.b32.xlu1 %v588_v24, %s7803_s18  ;;  %599 = vrot.lane.b32.xlu0 %v592_v25, %s7803_s18 }
  0x8d   : > { %669 = vrot.lane.b32.xlu1 %v658_v27, %s7801_s19  ;;  %667 = vrot.lane.b32.xlu0 %v654_v28, %s7801_s19 }
  0x91   : > { %673 = vrot.lane.b32.xlu1 %v666_v29, %s7801_s19  ;;  %671 = vrot.lane.b32.xlu0 %v662_v30, %s7801_s19 }
  0x95   : > { %740 = vrot.lane.b32.xlu1 %v727_v32, %s7799_s14  ;;  %742 = vrot.lane.b32.xlu0 %v731_v33, %s7799_s14  ;;  %v6002_v33 = vld [vmem:[%s5830_s16 + $0x10] sm:$0xff] }
  0x99   : > { %744 = vrot.lane.b32.xlu1 %v735_v34, %s7799_s14  ;;  %746 = vrot.lane.b32.xlu0 %v739_v35, %s7799_s14  ;;  %v6006_v35 = vld [vmem:[%s5830_s16 + $0x8] sm:$0xff] }
  0x9d   : > { %814 = vrot.lane.b32.xlu1 %v803_v37, %s7796_s25  ;;  %812 = vrot.lane.b32.xlu0 %v799_v38, %s7796_s25 }
  0xa1   : > { %818 = vrot.lane.b32.xlu1 %v811_v39, %s7796_s25  ;;  %816 = vrot.lane.b32.xlu0 %v807_v40, %s7796_s25  ;;  %v6015_v40 = vld [vmem:[%s5830_s16] sm:$0xff] }
  0xa5   : > { %884 = vrot.lane.b32.xlu1 %v871_v42, %s7794_s15  ;;  %886 = vrot.lane.b32.xlu0 %v875_v43, %s7794_s15 }
  0xa9   : > { %888 = vrot.lane.b32.xlu1 %v879_v44, %s7794_s15  ;;  %890 = vrot.lane.b32.xlu0 %v883_v45, %s7794_s15 }
  0xad   : > { %958 = vrot.lane.b32.xlu1 %v947_v47, %s7779_s17  ;;  %956 = vrot.lane.b32.xlu0 %v943_v48, %s7779_s17 }
  0xb1   : > { %962 = vrot.lane.b32.xlu1 %v955_v49, %s7779_s17  ;;  %960 = vrot.lane.b32.xlu0 %v951_v50, %s7779_s17 }
  0xb5   : > { %1028 = vrot.lane.b32.xlu1 %v1015_v52, %s7773_s22  ;;  %1030 = vrot.lane.b32.xlu0 %v1019_v53, %s7773_s22 }
  0xb9   : > { %1032 = vrot.lane.b32.xlu1 %v1023_v54, %s7773_s22 }
  0xdf   : > { %v376_v55 = vpop.permute.xlu1 %375  ;;  %v5931_v56 = vpop.permute.xlu0 %371 }
  0xe0   : > { %v388_v52 = vmul.f32 0.0, %v5931_v56 }
  0xe3   : > { %v378_v58 = vpop.permute.xlu1 %377  ;;  %v374_v59 = vpop.permute.xlu0 %373 }
  0xe4   : > { %v392_v60 = vmul.f32 %v378_v58, %v5934_v57  ;;  %v382_v34 = vsel %vm7828_vm0, %v376_v55, %v378_v58  ;;  %v381_v36 = vsel %vm7828_vm0, %v374_v59, %v376_v55  ;;  %v380_v47 = vsel %vm7828_vm0, %v5931_v56, %v374_v59 }
  0xe5   : > { %v391_v39 = vmul.f32 %v382_v34, %v6002_v33  ;;  %v390_v41 = vmul.f32 %v381_v36, %v6006_v35  ;;  %v389_v53 = vmul.f32 %v380_v47, %v6015_v40 }
  0xe6   : > { %406 = vrot.lane.b32.xlu0 %v392_v60, %s7779_s17 }
  0xe7   : > { %v446_v61 = vpop.permute.xlu1 %445  ;;  %v5938_v62 = vpop.permute.xlu0 %447  ;;  %v4956_v48 = vpack.i.bf16 %v391_v39, %v390_v41 }
  0xe8   : > { %v454_v42 = vsel %vm7827_vm1, %v446_v61, %v5938_v62  ;;  %v462_v44 = vmul.f32 0.0, %v446_v61 }
  0xe9   : > { %v463_v45 = vmul.f32 %v454_v42, %v6015_v40 }
  0xeb   : > { %v5940_v63 = vpop.permute.xlu1 %449  ;;  %v5942_v0 = vpop.permute.xlu0 %451  ;;  %v4961_v59 = vpack.i.bf16 %v463_v45, %v462_v44 }
  0xec   : > { %v466_v1 = vmul.f32 %v5942_v0, %v5934_v57  ;;  %v455_v54 = vsel %vm7827_vm1, %v5938_v62, %v5940_v63  ;;  %v456_v55 = vsel %vm7827_vm1, %v5940_v63, %v5942_v0 }
  0xed   : > { %v464_v62 = vmul.f32 %v455_v54, %v6006_v35 }
  0xee   : > { %480 = vrot.lane.b32.xlu1 %v466_v1, %s7794_s15 }
  0xef   : > { %v5947_v6 = vpop.permute.xlu1 %521  ;;  %v5949_v7 = vpop.permute.xlu0 %519 }
  0xf3   : > { %v526_v8 = vpop.permute.xlu1 %525  ;;  %v524_v9 = vpop.permute.xlu0 %523 }
  0xf4   : > { %v540_v10 = vmul.f32 %v526_v8, %v5934_v57  ;;  %v529_v49 = vsel %vm7826_vm2, %v5947_v6, %v524_v9  ;;  %v530_v50 = vsel %vm7826_vm2, %v524_v9, %v526_v8  ;;  %v465_v8 = vmul.f32 %v456_v55, %v6002_v33 }
  0xf5   : > { %v538_v60 = vmul.f32 %v529_v49, %v6006_v35  ;;  %v539_v61 = vmul.f32 %v530_v50, %v6002_v33  ;;  %v528_v9 = vsel %vm7826_vm2, %v5949_v7, %v5947_v6 }
  0xf6   : > { %554 = vrot.lane.b32.xlu0 %v540_v10, %s7796_s25  ;;  %v537_v6 = vmul.f32 %v528_v9, %v6015_v40 }
  0xf7   : > { %v5953_v11 = vpop.permute.xlu1 %593  ;;  %v5955_v12 = vpop.permute.xlu0 %595  ;;  %v4976_v10 = vpack.i.bf16 %v539_v61, %v538_v60 }
  0xf8   : > { %v602_v56 = vsel %vm601_vm3, %v5953_v11, %v5955_v12  ;;  %v610_v63 = vmul.f32 0.0, %v5953_v11  ;;  %v4966_v11 = vpack.i.bf16 %v465_v8, %v464_v62 }
  0xf9   : > { %v611_v0 = vmul.f32 %v602_v56, %v6015_v40 }
  0xfb   : > { %v5957_v13 = vpop.permute.xlu1 %597  ;;  %v5959_v14 = vpop.permute.xlu0 %599  ;;  %v4981_v36 = vpack.i.bf16 %v611_v0, %v610_v63 }
  0xfc   : > { %v614_v15 = vmul.f32 %v5959_v14, %v5934_v57  ;;  %v603_v34 = vsel %vm601_vm3, %v5955_v12, %v5957_v13  ;;  %v604_v39 = vsel %vm601_vm3, %v5957_v13, %v5959_v14 }
  0xfd   : > { %v612_v12 = vmul.f32 %v603_v34, %v6006_v35  ;;  %v613_v42 = vmul.f32 %v604_v39, %v6002_v33 }
  0xfe   : > { %628 = vrot.lane.b32.xlu1 %v614_v15, %s7799_s14  ;;  %v4951_v15 = vpack.i.bf16 %v389_v53, %v388_v52 }
  0xff   : > { %v5964_v16 = vpop.permute.xlu1 %669  ;;  %v5966_v17 = vpop.permute.xlu0 %667  ;;  %v4986_v50 = vpack.i.bf16 %v613_v42, %v612_v12 }
 0x103   : > { %v5968_v18 = vpop.permute.xlu1 %673  ;;  %v5970_v19 = vpop.permute.xlu0 %671 }
 0x104   : > { %v688_v20 = vmul.f32 %v5968_v18, %v5934_v57 }
 0x106   : > { %702 = vrot.lane.b32.xlu0 %v688_v20, %s7801_s19  ;;  %v677_v20 = vsel %vm675_vm4, %v5964_v16, %v5970_v19 }
 0x107   : > { %v5975_v21 = vpop.permute.xlu1 %740  ;;  %v5977_v22 = vpop.permute.xlu0 %742 }
 0x108   : > { %v748_v41 = vsel %vm630_vm5, %v5975_v21, %v5977_v22  ;;  %v756_v13 = vmul.f32 0.0, %v5975_v21  ;;  %v684_v21 = vmul.f32 0.0, %v5966_v17 }
 0x109   : > { %v757_v14 = vmul.f32 %v748_v41, %v6015_v40 }
 0x10b   : > { %v5979_v23 = vpop.permute.xlu1 %744  ;;  %v5981_v24 = vpop.permute.xlu0 %746  ;;  %v5001_v49 = vpack.i.bf16 %v757_v14, %v756_v13 }
 0x10c   : > { %v760_v25 = vmul.f32 %v5981_v24, %v5934_v57  ;;  %v749_v52 = vsel %vm630_vm5, %v5977_v22, %v5979_v23  ;;  %v750_v53 = vsel %vm630_vm5, %v5979_v23, %v5981_v24 }
 0x10d   : > { %v758_v55 = vmul.f32 %v749_v52, %v6006_v35  ;;  %v759_v22 = vmul.f32 %v750_v53, %v6002_v33 }
 0x10e   : > { %774 = vrot.lane.b32.xlu1 %v760_v25, %s7803_s18  ;;  %v678_v25 = vsel %vm675_vm4, %v5970_v19, %v5968_v18  ;;  %v686_v18 = vmul.f32 %v677_v20, %v6006_v35 }
 0x10f   : > { %v5986_v26 = vpop.permute.xlu1 %814  ;;  %v5988_v27 = vpop.permute.xlu0 %812  ;;  %v687_v19 = vmul.f32 %v678_v25, %v6002_v33  ;;  %v5006_v63 = vpack.i.bf16 %v759_v22, %v758_v55 }
 0x111   : > { %v4996_v44 = vpack.i.bf16 %v687_v19, %v686_v18 }
 0x113   : > { %v5990_v28 = vpop.permute.xlu1 %818  ;;  %v5992_v29 = vpop.permute.xlu0 %816 }
 0x114   : > { %v832_v30 = vmul.f32 %v5990_v28, %v5934_v57  ;;  %v821_v47 = vsel %vm556_vm6, %v5986_v26, %v5992_v29 }
 0x116   : > { %846 = vrot.lane.b32.xlu0 %v832_v30, %s7808_s21  ;;  %v536_v30 = vmul.f32 0.0, %v5949_v7 }
 0x117   : > { %v5997_v31 = vpop.permute.xlu1 %884  ;;  %v5999_v32 = vpop.permute.xlu0 %886 }
 0x118   : > { %v4971_v45 = vpack.i.bf16 %v537_v6, %v536_v30  ;;  %v900_v23 = vmul.f32 0.0, %v5997_v31 }
 0x11b   : > { %v6009_v37 = vpop.permute.xlu1 %888  ;;  %v6011_v38 = vpop.permute.xlu0 %890 }
 0x11c   : > { %v904_v43 = vmul.f32 %v6011_v38, %v5934_v57  ;;  %v894_v20 = vsel %vm482_vm7, %v6009_v37, %v6011_v38 }
 0x11d   : > { %v903_v30 = vmul.f32 %v894_v20, %v6002_v33 }
 0x11e   : > { %918 = vrot.lane.b32.xlu1 %v904_v43, %s7810_s13  ;;  %v676_v43 = vsel %vm675_vm4, %v5966_v17, %v5964_v16  ;;  %v892_v17 = vsel %vm482_vm7, %v5997_v31, %v5999_v32  ;;  %v828_v31 = vmul.f32 0.0, %v5988_v27 }
 0x11f   : > { %v6024_v46 = vpop.permute.xlu1 %958  ;;  %v6079_v7 = vpop.permute.xlu0 %956  ;;  %v685_v16 = vmul.f32 %v676_v43, %v6015_v40  ;;  %v901_v24 = vmul.f32 %v892_v17, %v6015_v40 }
 0x120   : > { %v972_v38 = vmul.f32 0.0, %v6079_v7 }
 0x121   : > { %v4991_v60 = vpack.i.bf16 %v685_v16, %v684_v21 }
 0x122   : > { %4957 = vrot.lane.b32.xlu1 %v4956_v48, %s7779_s17  ;;  %v822_v48 = vsel %vm556_vm6, %v5992_v29, %v5990_v28  ;;  %v830_v28 = vmul.f32 %v821_v47, %v6006_v35 }
 0x123   : > { %v6040_v58 = vpop.permute.xlu1 %962  ;;  %v831_v29 = vmul.f32 %v822_v48, %v6002_v33  ;;  %v961_v54 = vpop.permute.xlu0 %960 }
 0x124   : > { %v976_v1 = vmul.f32 %v6040_v58, %v5934_v57  ;;  %v965_v62 = vsel %vm408_vm8, %v6024_v46, %v961_v54  ;;  %v966_v8 = vsel %vm408_vm8, %v961_v54, %v6040_v58  ;;  %v893_v58 = vsel %vm482_vm7, %v5999_v32, %v6009_v37 }
 0x125   : > { %v964_v32 = vsel %vm408_vm8, %v6079_v7, %v6024_v46  ;;  %v1027_v46 = vrot.slane %v5918_v51, %v5844_v4 }
 0x126   : > { %990 = vrot.lane.b32.xlu0 %v976_v1, %s7792_s11  ;;  %4962 = vrot.lane.b32.xlu1 %v4961_v59, %s7794_s15  ;;  %v5016_v59 = vpack.i.bf16 %v831_v29, %v830_v28  ;;  %v820_v1 = vsel %vm556_vm6, %v5988_v27, %v5986_v26  ;;  %v974_v26 = vmul.f32 %v965_v62, %v6006_v35 }
 0x127   : > { %v1029_v61 = vpop.permute.xlu1 %1028  ;;  %v6117_v56 = vpop.permute.xlu0 %1030  ;;  %v829_v9 = vmul.f32 %v820_v1, %v6015_v40 }
 0x128   : > { %v1037_v0 = vsel %vm7785_vm9, %v1029_v61, %v6117_v56  ;;  %v1045_v27 = vmul.f32 0.0, %v1029_v61 }
 0x129   : > { %v1046_v25 = vmul.f32 %v1037_v0, %v6015_v40  ;;  %v5011_v34 = vpack.i.bf16 %v829_v9, %v828_v31 }
 0x12a   : > { %4977 = vrot.lane.b32.xlu1 %v4976_v10, %s7796_s25  ;;  %4952 = vrot.lane.b32.xlu0 %v4951_v15, %s7779_s17  ;;  %v975_v10 = vmul.f32 %v966_v8, %v6002_v33  ;;  %v5021_v15 = vpack.i.bf16 %v901_v24, %v900_v23  ;;  %s7781_s17 = smov 127  }
 0x12b   : > { %v5041_v37 = vpack.i.bf16 %v1046_v25, %v1045_v27  ;;  %v6158_v19 = vpop.permute.xlu1 %1032 }
 0x12c   : > { %v5036_v6 = vpack.i.bf16 %v975_v10, %v974_v26 }
 0x12e   : > { %4982 = vrot.lane.b32.xlu1 %v4981_v36, %s7799_s14  ;;  %4967 = vrot.lane.b32.xlu0 %v4966_v11, %s7794_s15  ;;  %v902_v11 = vmul.f32 %v893_v58, %v6006_v35  ;;  %v973_v36 = vmul.f32 %v964_v32, %v6015_v40 }
 0x130   : > { %v5026_v39 = vpack.i.bf16 %v903_v30, %v902_v11  ;;  %v5031_v18 = vpack.i.bf16 %v973_v36, %v972_v38 }
 0x132   : > { %4997 = vrot.lane.b32.xlu1 %v4996_v44, %s7801_s19  ;;  %4972 = vrot.lane.b32.xlu0 %v4971_v45, %s7796_s25 }
 0x136   : > { %5002 = vrot.lane.b32.xlu1 %v5001_v49, %s7803_s18  ;;  %4987 = vrot.lane.b32.xlu0 %v4986_v50, %s7799_s14 }
 0x13a   : > { %5017 = vrot.lane.b32.xlu1 %v5016_v59, %s7808_s21  ;;  %4992 = vrot.lane.b32.xlu0 %v4991_v60, %s7801_s19 }
 0x13e   : > { %5022 = vrot.lane.b32.xlu1 %v5021_v15, %s7810_s13  ;;  %5007 = vrot.lane.b32.xlu0 %v5006_v63, %s7803_s18 }
 0x142   : > { %5037 = vrot.lane.b32.xlu1 %v5036_v6, %s7792_s11  ;;  %5012 = vrot.lane.b32.xlu0 %v5011_v34, %s7808_s21 }
 0x146   : > { %5027 = vrot.lane.b32.xlu0 %v5026_v39, %s7810_s13  ;;  %5042 = vrot.lane.b32.xlu1 %v5041_v37, %s7783_s10 }
 0x14a   : > { %5032 = vrot.lane.b32.xlu0 %v5031_v18, %s7792_s11 }
 0x14e   : > { %1034 = vrot.lane.b32.xlu0 %v1027_v46, %s7773_s22  ;;  %s7786_s22 = smov 8  }
 0x158   : > { %v407_v12 = vpop.permute.xlu0 %406 }
 0x160   : > { %v481_v41 = vpop.permute.xlu1 %480 }
 0x168   : > { %v555_v13 = vpop.permute.xlu0 %554 }
 0x170   : > { %v629_v7 = vpop.permute.xlu1 %628 }
 0x178   : > { %v6162_v14 = vpop.permute.xlu0 %702 }
 0x180   : > { %v6160_v42 = vpop.permute.xlu1 %774 }
 0x188   : > { %v6166_v44 = vpop.permute.xlu0 %846 }
 0x190   : > { %v6164_v43 = vpop.permute.xlu1 %918 }
 0x194   : > { %v4958_v45 = vpop.permute.xlu1 %4957 }
 0x195   : > { %v4960_v16 = vunpack.i.h.bf16 %v4958_v45  ;;  %v4959_v49 = vunpack.i.l.bf16 %v4958_v45 }
 0x197   : > { %v412_v22 = vsel %vm408_vm8, %v4960_v16, %v407_v12  ;;  %v411_v24 = vsel %vm408_vm8, %v4959_v49, %v4960_v16 }
 0x198   : > { %v6168_v47 = vpop.permute.xlu0 %990  ;;  %v4963_v51 = vpop.permute.xlu1 %4962 }
 0x199   : > { %v4965_v53 = vunpack.i.h.bf16 %v4963_v51  ;;  %v4964_v28 = vunpack.i.l.bf16 %v4963_v51 }
 0x19b   : > { %v483_v0 = vsel %vm482_vm7, %v4964_v28, %v4965_v53 }
 0x19c   : > { %v4978_v48 = vpop.permute.xlu1 %4977  ;;  %v4953_v21 = vpop.permute.xlu0 %4952 }
 0x19d   : > { %v4955_v50 = vunpack.i.h.bf16 %v4953_v21  ;;  %v4954_v52 = vunpack.i.l.bf16 %v4953_v21  ;;  %v4980_v10 = vunpack.i.h.bf16 %v4978_v48  ;;  %v4979_v15 = vunpack.i.l.bf16 %v4978_v48 }
 0x19f   : > { %v409_v23 = vsel %vm408_vm8, %v4954_v52, %v4955_v50  ;;  %v410_v59 = vsel %vm408_vm8, %v4955_v50, %v4959_v49  ;;  %v560_v32 = vsel %vm556_vm6, %v4980_v10, %v555_v13  ;;  %v559_v38 = vsel %vm556_vm6, %v4979_v15, %v4980_v10 }
 0x1a0   : > { %v4983_v29 = vpop.permute.xlu1 %4982  ;;  %v4968_v54 = vpop.permute.xlu0 %4967  ;;  %v2380_v26 = vpack.c.bf16 %v483_v0, %v409_v23 }
 0x1a1   : > { %v4970_v17 = vunpack.i.h.bf16 %v4968_v54  ;;  %v4969_v55 = vunpack.i.l.bf16 %v4968_v54  ;;  %v4985_v27 = vunpack.i.h.bf16 %v4983_v29  ;;  %v4984_v25 = vunpack.i.l.bf16 %v4983_v29 }
 0x1a3   : > { %v484_v60 = vsel %vm482_vm7, %v4965_v53, %v4969_v55  ;;  %v486_v61 = vsel %vm482_vm7, %v4970_v17, %v481_v41  ;;  %v485_v1 = vsel %vm482_vm7, %v4969_v55, %v4970_v17  ;;  %v631_v51 = vsel %vm630_vm5, %v4984_v25, %v4985_v27 }
 0x1a4   : > { %v4998_v62 = vpop.permute.xlu1 %4997  ;;  %v4973_v8 = vpop.permute.xlu0 %4972  ;;  %v2381_v31 = vpack.c.bf16 %v484_v60, %v410_v59  ;;  %v2383_v63 = vpack.c.bf16 %v486_v61, %v412_v22  ;;  %v2382_v9 = vpack.c.bf16 %v485_v1, %v411_v24 }
 0x1a5   : > { %v4975_v58 = vunpack.i.h.bf16 %v4973_v8  ;;  %v4974_v20 = vunpack.i.l.bf16 %v4973_v8  ;;  %v5000_v13 = vunpack.i.h.bf16 %v4998_v62  ;;  %v4999_v16 = vunpack.i.l.bf16 %v4998_v62 }
 0x1a6   : > { %2459 = vmatprep.subr.bf16.mxu0 %v2381_v31  ;;  %2500 = vmatprep.subr.bf16.mxu1 %v2383_v63 }
 0x1a7   : > { %2460 = vmatpush1.bf16.msra.mxu0 %v2380_v26  ;;  %2501 = vmatpush1.bf16.msra.mxu1 %v2382_v9  ;;  %v557_v37 = vsel %vm556_vm6, %v4974_v20, %v4975_v58  ;;  %v558_v36 = vsel %vm556_vm6, %v4975_v58, %v4979_v15  ;;  %v707_v17 = vsel %vm675_vm4, %v5000_v13, %v6162_v14 }
 0x1a8   : > { %v4988_v11 = vpop.permute.xlu0 %4987  ;;  %v5003_v30 = vpop.permute.xlu1 %5002  ;;  %v2384_v21 = vpack.c.bf16 %v631_v51, %v557_v37  ;;  %v706_v22 = vsel %vm675_vm4, %v4999_v16, %v5000_v13 }
 0x1a9   : > { %v4990_v6 = vunpack.i.h.bf16 %v4988_v11  ;;  %v4989_v34 = vunpack.i.l.bf16 %v4988_v11  ;;  %v5005_v53 = vunpack.i.h.bf16 %v5003_v30 }
 0x1ab   : > { %v632_v39 = vsel %vm630_vm5, %v4985_v27, %v4989_v34  ;;  %v634_v18 = vsel %vm630_vm5, %v4990_v6, %v629_v7  ;;  %v633_v46 = vsel %vm630_vm5, %v4989_v34, %v4990_v6  ;;  %v5004_v7 = vunpack.i.l.bf16 %v5003_v30 }
 0x1ac   : > { %v4993_v41 = vpop.permute.xlu0 %4992  ;;  %v2385_v12 = vpack.c.bf16 %v632_v39, %v558_v36  ;;  %v2387_v45 = vpack.c.bf16 %v634_v18, %v560_v32  ;;  %v2386_v48 = vpack.c.bf16 %v633_v46, %v559_v38  ;;  %v5018_v52 = vpop.permute.xlu1 %5017 }
 0x1ad   : > { %v4995_v49 = vunpack.i.h.bf16 %v4993_v41  ;;  %v4994_v50 = vunpack.i.l.bf16 %v4993_v41  ;;  %v776_v8 = vsel %vm601_vm3, %v5004_v7, %v5005_v53  ;;  %v5020_v0 = vunpack.i.h.bf16 %v5018_v52 }
 0x1ae   : > { %2461 = vmatprep.subr.bf16.mxu0 %v2385_v12  ;;  %2502 = vmatprep.subr.bf16.mxu1 %v2387_v45  ;;  %v5019_v9 = vunpack.i.l.bf16 %v5018_v52  ;;  %v1038_v41 = vsel %vm7785_vm9, %v6117_v56, %v6158_v19  ;;  %v1084_v45 = vld [vmem:[#allocation7 + $0x22] ss:$8 sm:$0xf] }
 0x1af   : > { %2462 = vmatpush1.bf16.msra.mxu0 %v2384_v21  ;;  %2503 = vmatpush1.bf16.msra.mxu1 %v2386_v48  ;;  %v704_v55 = vsel %vm675_vm4, %v4994_v50, %v4995_v49  ;;  %v705_v23 = vsel %vm675_vm4, %v4995_v49, %v4999_v16  ;;  %v851_v25 = vsel %vm7826_vm2, %v5020_v0, %v6166_v44 }
 0x1b0   : > { %v5008_v28 = vpop.permute.xlu0 %5007  ;;  %v5023_v14 = vpop.permute.xlu1 %5022  ;;  %v2388_v63 = vpack.c.bf16 %v776_v8, %v704_v55  ;;  %v850_v30 = vsel %vm7826_vm2, %v5019_v9, %v5020_v0  ;;  %v1047_v48 = vmul.f32 %v1038_v41, %v6006_v35  ;;  %v1093_v13 = vrot.slane %v1084_v45, %v5846_v5 }
 0x1b1   : > { %v5010_v29 = vunpack.i.h.bf16 %v5008_v28  ;;  %v5009_v54 = vunpack.i.l.bf16 %v5008_v28  ;;  %v5025_v15 = vunpack.i.h.bf16 %v5023_v14  ;;  %v1089_v56 = vrot.slane %v1084_v45, %v5842_v3 }
 0x1b2   : > { %v1097_v49 = vrot.slane %v1084_v45, %v5840_v2 }
 0x1b3   : > { %v777_v24 = vsel %vm601_vm3, %v5005_v53, %v5009_v54  ;;  %v779_v59 = vsel %vm601_vm3, %v5010_v29, %v6160_v42  ;;  %v778_v60 = vsel %vm601_vm3, %v5009_v54, %v5010_v29  ;;  %v5024_v42 = vunpack.i.l.bf16 %v5023_v14 }
 0x1b4   : > { %v5013_v61 = vpop.permute.xlu0 %5012  ;;  %v2389_v1 = vpack.c.bf16 %v777_v24, %v705_v23  ;;  %v2391_v62 = vpack.c.bf16 %v779_v59, %v707_v17  ;;  %v2390_v31 = vpack.c.bf16 %v778_v60, %v706_v22  ;;  %v5038_v50 = vpop.permute.xlu1 %5037 }
 0x1b5   : > { %v5015_v26 = vunpack.i.h.bf16 %v5013_v61  ;;  %v5014_v10 = vunpack.i.l.bf16 %v5013_v61  ;;  %v920_v18 = vsel %vm7827_vm1, %v5024_v42, %v5025_v15  ;;  %v5040_v53 = vunpack.i.h.bf16 %v5038_v50 }
 0x1b6   : > { %2463 = vmatprep.subr.bf16.mxu0 %v2389_v1  ;;  %2504 = vmatprep.subr.bf16.mxu1 %v2391_v62  ;;  %v5039_v7 = vunpack.i.l.bf16 %v5038_v50 }
 0x1b7   : > { %2464 = vmatpush1.bf16.msra.mxu0 %v2388_v63  ;;  %2505 = vmatpush1.bf16.msra.mxu1 %v2390_v31  ;;  %v848_v11 = vsel %vm7826_vm2, %v5014_v10, %v5015_v26  ;;  %v849_v6 = vsel %vm7826_vm2, %v5015_v26, %v5019_v9  ;;  %v995_v60 = vsel %vm7828_vm0, %v5040_v53, %v6168_v47 }
 0x1b8   : > { %v5028_v58 = vpop.permute.xlu0 %5027  ;;  %v2392_v44 = vpack.c.bf16 %v920_v18, %v848_v11  ;;  %v5043_v52 = vpop.permute.xlu1 %5042  ;;  %v994_v62 = vsel %vm7828_vm0, %v5039_v7, %v5040_v53  ;;  %v1232_v53 = vld [vmem:[#allocation7 + $0x24] ss:$8 sm:$0xf] }
 0x1b9   : > { %v5030_v20 = vunpack.i.h.bf16 %v5028_v58  ;;  %v5029_v27 = vunpack.i.l.bf16 %v5028_v58  ;;  %v5045_v29 = vunpack.i.h.bf16 %v5043_v52  ;;  %v5044_v54 = vunpack.i.l.bf16 %v5043_v52 }
 0x1bb   : > { %v921_v34 = vsel %vm7827_vm1, %v5025_v15, %v5029_v27  ;;  %v923_v32 = vsel %vm7827_vm1, %v5030_v20, %v6164_v43  ;;  %v922_v37 = vsel %vm7827_vm1, %v5029_v27, %v5030_v20  ;;  %v1066_v1 = vsel %vm7798_vm10, %v5044_v54, %v5045_v29 }
 0x1bc   : > { %v5033_v38 = vpop.permute.xlu0 %5032  ;;  %v2393_v36 = vpack.c.bf16 %v921_v34, %v849_v6  ;;  %v2395_v39 = vpack.c.bf16 %v923_v32, %v851_v25  ;;  %v2394_v46 = vpack.c.bf16 %v922_v37, %v850_v30  ;;  %v1158_v32 = vld [vmem:[#allocation7 + $0x23] ss:$8 sm:$0xf]  ;;  %v1237_v54 = vrot.slane %v1232_v53, %v5842_v3 }
 0x1bd   : > { %v5035_v17 = vunpack.i.h.bf16 %v5033_v38  ;;  %v5034_v55 = vunpack.i.l.bf16 %v5033_v38  ;;  %v1175_v18 = vrot.slane %v1158_v32, %v5844_v4 }
 0x1be   : > { %2465 = vmatprep.subr.bf16.mxu0 %v2393_v36  ;;  %2506 = vmatprep.subr.bf16.mxu1 %v2395_v39  ;;  %v1167_v36 = vrot.slane %v1158_v32, %v5846_v5  ;;  %v1163_v39 = vrot.slane %v1158_v32, %v5842_v3 }
 0x1bf   : > { %2466 = vmatpush1.bf16.msra.mxu0 %v2392_v44  ;;  %2507 = vmatpush1.bf16.msra.mxu1 %v2394_v46  ;;  %v992_v61 = vsel %vm7828_vm0, %v5034_v55, %v5035_v17  ;;  %v993_v8 = vsel %vm7828_vm0, %v5035_v17, %v5039_v7  ;;  %v1171_v46 = vrot.slane %v1158_v32, %v5840_v2 }
 0x1c0   : > { %v1035_v12 = vpop.permute.xlu0 %1034  ;;  %v2396_v42 = vpack.c.bf16 %v1066_v1, %v992_v61  ;;  %v1249_v17 = vrot.slane %v1232_v53, %v5844_v4  ;;  %v1245_v55 = vrot.slane %v1232_v53, %v5840_v2 }
 0x1c1   : > { %v1039_v43 = vsel %vm7785_vm9, %v6158_v19, %v1035_v12  ;;  %v1049_v51 = vmul.f32 %v1035_v12, %v5934_v57  ;;  %v1101_v19 = vrot.slane %v1084_v45, %v5844_v4  ;;  %vm1287_vm9 = vcmask 7168  }
 0x1c2   : > { %v1048_v21 = vmul.f32 %v1039_v43, %v6002_v33 }
 0x1c3   : > { %1063 = vrot.lane.b32.xlu1 %v1049_v51, %s7783_s10 }
 0x1c4   : > { %v5046_v16 = vpack.i.bf16 %v1048_v21, %v1047_v48 }
 0x1c6   : > { %5047 = vrot.lane.b32.xlu0 %v5046_v16, %s7783_s10 }
 0x1c7   : > { %1104 = vrot.lane.b32.xlu1 %v1093_v13, %s7775_s26 }
 0x1ca   : > { %1102 = vrot.lane.b32.xlu0 %v1089_v56, %s7775_s26 }
 0x1cb   : > { %1108 = vrot.lane.b32.xlu1 %v1101_v19, %s7775_s26 }
 0x1ce   : > { %1106 = vrot.lane.b32.xlu0 %v1097_v49, %s7775_s26  ;;  %s7777_s26 = smov 121  }
 0x235   : > { %v1064_v28 = vpop.permute.xlu1 %1063 }
 0x238   : > { %v5048_v22 = vpop.permute.xlu0 %5047 }
 0x239   : > { %v5050_v23 = vunpack.i.h.bf16 %v5048_v22  ;;  %v5049_v24 = vunpack.i.l.bf16 %v5048_v22  ;;  %v1105_v59 = vpop.permute.xlu1 %1104 }
 0x23b   : > { %v1067_v31 = vsel %vm7798_vm10, %v5045_v29, %v5049_v24  ;;  %v1069_v14 = vsel %vm7798_vm10, %v5050_v23, %v1064_v28  ;;  %v1068_v63 = vsel %vm7798_vm10, %v5049_v24, %v5050_v23  ;;  %v1241_v29 = vrot.slane %v1232_v53, %v5846_v5 }
 0x23c   : > { %v1103_v0 = vpop.permute.xlu0 %1102  ;;  %v2397_v9 = vpack.c.bf16 %v1067_v31, %v993_v8  ;;  %v2399_v26 = vpack.c.bf16 %v1069_v14, %v995_v60  ;;  %v2398_v10 = vpack.c.bf16 %v1068_v63, %v994_v62 }
 0x23d   : > { %v1111_v47 = vsel %vm1110_vm11, %v1103_v0, %v1105_v59  ;;  %v1119_v15 = vmul.f32 0.0, %v1103_v0  ;;  %v1109_v20 = vpop.permute.xlu1 %1108 }
 0x23e   : > { %v1120_v58 = vmul.f32 %v1111_v47, %v6015_v40  ;;  %2467 = vmatprep.subr.bf16.mxu0 %v2397_v9  ;;  %2508 = vmatprep.subr.bf16.mxu1 %v2399_v26  ;;  %v1123_v37 = vmul.f32 %v1109_v20, %v5934_v57 }
 0x23f   : > { %2468 = vmatpush1.bf16.msra.mxu0 %v2396_v42  ;;  %2509 = vmatpush1.bf16.msra.mxu1 %v2398_v10 }
 0x240   : > { %v1107_v27 = vpop.permute.xlu0 %1106  ;;  %v5051_v25 = vpack.i.bf16 %v1120_v58, %v1119_v15 }
 0x241   : > { %v1112_v11 = vsel %vm1110_vm11, %v1105_v59, %v1107_v27  ;;  %v1113_v30 = vsel %vm1110_vm11, %v1107_v27, %v1109_v20 }
 0x242   : > { %v1121_v6 = vmul.f32 %v1112_v11, %v6006_v35  ;;  %v1122_v34 = vmul.f32 %v1113_v30, %v6002_v33  ;;  %5052 = vrot.lane.b32.xlu0 %v5051_v25, %s7786_s22 }
 0x244   : > { %v5056_v38 = vpack.i.bf16 %v1122_v34, %v1121_v6 }
 0x246   : > { %1137 = vrot.lane.b32.xlu0 %v1123_v37, %s7786_s22  ;;  %5057 = vrot.lane.b32.xlu1 %v5056_v38, %s7786_s22 }
 0x24a   : > { %1178 = vrot.lane.b32.xlu0 %v1167_v36, %s7777_s26  ;;  %1176 = vrot.lane.b32.xlu1 %v1163_v39, %s7777_s26 }
 0x24e   : > { %1182 = vrot.lane.b32.xlu0 %v1175_v18, %s7777_s26  ;;  %1180 = vrot.lane.b32.xlu1 %v1171_v46, %s7777_s26  ;;  %s7788_s26 = smov 7  }
 0x2b4   : > { %v5053_v44 = vpop.permute.xlu0 %5052 }
 0x2b5   : > { %v5055_v61 = vunpack.i.h.bf16 %v5053_v44  ;;  %v5054_v1 = vunpack.i.l.bf16 %v5053_v44 }
 0x2b7   : > { %v1140_v25 = vsel %vm7806_vm14, %v5054_v1, %v5055_v61 }
 0x2b8   : > { %v5058_v41 = vpop.permute.xlu1 %5057  ;;  %v1138_v12 = vpop.permute.xlu0 %1137 }
 0x2b9   : > { %v5060_v23 = vunpack.i.h.bf16 %v5058_v41  ;;  %v5059_v24 = vunpack.i.l.bf16 %v5058_v41  ;;  %v1341_v41 = vld [vmem:[#allocation7 + $0x26] ss:$8 sm:$0xf] }
 0x2bb   : > { %v1143_v63 = vsel %vm7806_vm14, %v5060_v23, %v1138_v12  ;;  %v1141_v0 = vsel %vm7806_vm14, %v5055_v61, %v5059_v24  ;;  %v1142_v47 = vsel %vm7806_vm14, %v5059_v24, %v5060_v23  ;;  %v1701_v24 = vld [vmem:[#allocation7 + $0x43] ss:$8 sm:$0xf] }
 0x2bc   : > { %v1177_v45 = vpop.permute.xlu1 %1176  ;;  %v1179_v43 = vpop.permute.xlu0 %1178  ;;  %v1718_v61 = vrot.slane %v1701_v24, %v5844_v4  ;;  %v1714_v1 = vrot.slane %v1701_v24, %v5840_v2 }
 0x2bd   : > { %v1193_v51 = vmul.f32 0.0, %v1177_v45  ;;  %v1185_v48 = vsel %vm1184_vm12, %v1177_v45, %v1179_v43  ;;  %v1350_v45 = vrot.slane %v1341_v41, %v5846_v5 }
 0x2be   : > { %v1194_v21 = vmul.f32 %v1185_v48, %v6015_v40 }
 0x2c0   : > { %v1181_v13 = vpop.permute.xlu1 %1180  ;;  %v1183_v16 = vpop.permute.xlu0 %1182  ;;  %v5061_v56 = vpack.i.bf16 %v1194_v21, %v1193_v51  ;;  %v1413_v51 = vld [vmem:[#allocation7 + $0x27] ss:$8 sm:$0xf] }
 0x2c1   : > { %v1186_v19 = vsel %vm1184_vm12, %v1179_v43, %v1181_v13  ;;  %v1187_v49 = vsel %vm1184_vm12, %v1181_v13, %v1183_v16  ;;  %v1197_v7 = vmul.f32 %v1183_v16, %v5934_v57  ;;  %v1346_v43 = vrot.slane %v1341_v41, %v5842_v3  ;;  %v1485_v16 = vld [vmem:[#allocation7 + $0x40] ss:$8 sm:$0xf] }
 0x2c2   : > { %v1195_v50 = vmul.f32 %v1186_v19, %v6006_v35  ;;  %v1196_v52 = vmul.f32 %v1187_v49, %v6002_v33  ;;  %5062 = vrot.lane.b32.xlu1 %v5061_v56, %s7788_s26  ;;  %v1418_v48 = vrot.slane %v1413_v51, %v5842_v3  ;;  %v1430_v21 = vrot.slane %v1413_v51, %v5844_v4 }
 0x2c3   : > { %v1426_v13 = vrot.slane %v1413_v51, %v5840_v2  ;;  %v1494_v56 = vrot.slane %v1485_v16, %v5846_v5  ;;  %v1490_v19 = vrot.slane %v1485_v16, %v5842_v3  ;;  %v1502_v49 = vrot.slane %v1485_v16, %v5844_v4 }
 0x2c4   : > { %v5066_v28 = vpack.i.bf16 %v1196_v52, %v1195_v50  ;;  %v1498_v50 = vrot.slane %v1485_v16, %v5840_v2  ;;  %v1557_v52 = vld [vmem:[#allocation7 + $0x41] ss:$8 sm:$0xf] }
 0x2c5   : > { %v1566_v53 = vrot.slane %v1557_v52, %v5846_v5 }
 0x2c6   : > { %1211 = vrot.lane.b32.xlu1 %v1197_v7, %s7788_s26  ;;  %5067 = vrot.lane.b32.xlu0 %v5066_v28, %s7788_s26  ;;  %v1562_v7 = vrot.slane %v1557_v52, %v5842_v3  ;;  %v1574_v28 = vrot.slane %v1557_v52, %v5844_v4 }
 0x2ca   : > { %1252 = vrot.lane.b32.xlu1 %v1241_v29, %s7781_s17  ;;  %1250 = vrot.lane.b32.xlu0 %v1237_v54, %s7781_s17  ;;  %v1570_v29 = vrot.slane %v1557_v52, %v5840_v2  ;;  %v1629_v54 = vld [vmem:[#allocation7 + $0x42] ss:$8 sm:$0xf] }
 0x2cb   : > { %v1642_v23 = vrot.slane %v1629_v54, %v5840_v2 }
 0x2ce   : > { %1256 = vrot.lane.b32.xlu1 %v1249_v17, %s7781_s17  ;;  %1254 = vrot.lane.b32.xlu0 %v1245_v55, %s7781_s17  ;;  %s7790_s17 = smov 1   ;;  %v1638_v17 = vrot.slane %v1629_v54, %v5846_v5  ;;  %v1634_v55 = vrot.slane %v1629_v54, %v5842_v3 }
 0x334   : > { %v5063_v22 = vpop.permute.xlu1 %5062 }
 0x335   : > { %v5065_v59 = vunpack.i.h.bf16 %v5063_v22  ;;  %v5064_v60 = vunpack.i.l.bf16 %v5063_v22  ;;  %v1646_v22 = vrot.slane %v1629_v54, %v5844_v4 }
 0x337   : > { %v1214_v9 = vsel %vm7807_vm13, %v5064_v60, %v5065_v59  ;;  %v1706_v60 = vrot.slane %v1701_v24, %v5842_v3 }
 0x338   : > { %v1212_v62 = vpop.permute.xlu1 %1211  ;;  %v5068_v8 = vpop.permute.xlu0 %5067  ;;  %v2400_v34 = vpack.c.bf16 %v1214_v9, %v1140_v25  ;;  %v1989_v25 = vld [vmem:[#allocation7 + $0x47] ss:$8 sm:$0xf] }
 0x339   : > { %v5070_v31 = vunpack.i.h.bf16 %v5068_v8  ;;  %v5069_v14 = vunpack.i.l.bf16 %v5068_v8 }
 0x33b   : > { %v1215_v26 = vsel %vm7807_vm13, %v5065_v59, %v5069_v14  ;;  %v1217_v10 = vsel %vm7807_vm13, %v5070_v31, %v1212_v62  ;;  %v1216_v15 = vsel %vm7807_vm13, %v5069_v14, %v5070_v31  ;;  %v1710_v59 = vrot.slane %v1701_v24, %v5846_v5  ;;  %v1773_v62 = vld [vmem:[#allocation7 + $0x44] ss:$8 sm:$0xf] }
 0x33c   : > { %v1253_v42 = vpop.permute.xlu1 %1252  ;;  %v1251_v58 = vpop.permute.xlu0 %1250  ;;  %v2401_v20 = vpack.c.bf16 %v1215_v26, %v1141_v0  ;;  %v2403_v27 = vpack.c.bf16 %v1217_v10, %v1143_v63  ;;  %v2402_v11 = vpack.c.bf16 %v1216_v15, %v1142_v47  ;;  %v1782_v8 = vrot.slane %v1773_v62, %v5846_v5  ;;  %v1845_v0 = vld [vmem:[#allocation7 + $0x45] ss:$8 sm:$0xf]  ;;  %v1917_v15 = vld [vmem:[#allocation7 + $0x46] ss:$8 sm:$0xf] }
 0x33d   : > { %v1259_v30 = vsel %vm1258_vm15, %v1251_v58, %v1253_v42  ;;  %v1267_v6 = vmul.f32 0.0, %v1251_v58  ;;  %v1778_v31 = vrot.slane %v1773_v62, %v5842_v3  ;;  %v1790_v14 = vrot.slane %v1773_v62, %v5844_v4 }
 0x33e   : > { %v1268_v32 = vmul.f32 %v1259_v30, %v6015_v40  ;;  %2469 = vmatprep.subr.bf16.mxu0 %v2401_v20  ;;  %2510 = vmatprep.subr.bf16.mxu1 %v2403_v27  ;;  %v1786_v63 = vrot.slane %v1773_v62, %v5840_v2  ;;  %v1854_v9 = vrot.slane %v1845_v0, %v5846_v5 }
 0x33f   : > { %2470 = vmatpush1.bf16.msra.mxu0 %v2400_v34  ;;  %2511 = vmatpush1.bf16.msra.mxu1 %v2402_v11  ;;  %v1850_v26 = vrot.slane %v1845_v0, %v5842_v3  ;;  %v1862_v10 = vrot.slane %v1845_v0, %v5844_v4  ;;  %v1858_v47 = vrot.slane %v1845_v0, %v5840_v2 }
 0x340   : > { %v1257_v37 = vpop.permute.xlu1 %1256  ;;  %v1255_v38 = vpop.permute.xlu0 %1254  ;;  %v5071_v36 = vpack.i.bf16 %v1268_v32, %v1267_v6  ;;  %v1922_v58 = vrot.slane %v1917_v15, %v5842_v3  ;;  %v1934_v20 = vrot.slane %v1917_v15, %v5844_v4  ;;  %v1930_v27 = vrot.slane %v1917_v15, %v5840_v2  ;;  %v2061_v32 = vld [vmem:[#allocation7 + $0x60] ss:$8 sm:$0xf] }
 0x341   : > { %v1260_v39 = vsel %vm1258_vm15, %v1253_v42, %v1255_v38  ;;  %v1261_v18 = vsel %vm1258_vm15, %v1255_v38, %v1257_v37  ;;  %v1271_v40 = vmul.f32 %v1257_v37, %v5934_v57  ;;  %v1422_v57 = vrot.slane %v1413_v51, %v5846_v5  ;;  %v1305_v51 = vld [vmem:[#allocation7 + $0x25] ss:$8 sm:$0xf] }
 0x342   : > { %v1269_v46 = vmul.f32 %v1260_v39, %v6006_v35  ;;  %v1270_v44 = vmul.f32 %v1261_v18, %v6002_v33  ;;  %5072 = vrot.lane.b32.xlu0 %v5071_v36, %s7790_s17  ;;  %v1358_v33 = vrot.slane %v1341_v41, %v5844_v4  ;;  %v1354_v35 = vrot.slane %v1341_v41, %v5840_v2  ;;  %v2133_v18 = vld [vmem:[#allocation7 + $0x61] ss:$8 sm:$0xf] }
 0x343   : > { %v1926_v42 = vrot.slane %v1917_v15, %v5846_v5  ;;  %v1998_v11 = vrot.slane %v1989_v25, %v5846_v5  ;;  %v1994_v30 = vrot.slane %v1989_v25, %v5842_v3  ;;  %v2006_v6 = vrot.slane %v1989_v25, %v5844_v4 }
 0x344   : > { %v5076_v12 = vpack.i.bf16 %v1270_v44, %v1269_v46  ;;  %v2002_v34 = vrot.slane %v1989_v25, %v5840_v2  ;;  %v2070_v37 = vrot.slane %v2061_v32, %v5846_v5  ;;  %v2066_v38 = vrot.slane %v2061_v32, %v5842_v3 }
 0x345   : > { %v2078_v36 = vrot.slane %v2061_v32, %v5844_v4  ;;  %v2074_v39 = vrot.slane %v2061_v32, %v5840_v2  ;;  %v2142_v46 = vrot.slane %v2133_v18, %v5846_v5  ;;  %v2138_v44 = vrot.slane %v2133_v18, %v5842_v3 }
 0x346   : > { %1285 = vrot.lane.b32.xlu0 %v1271_v40, %s7790_s17  ;;  %5077 = vrot.lane.b32.xlu1 %v5076_v12, %s7790_s17  ;;  %v2150_v41 = vrot.slane %v2133_v18, %v5844_v4  ;;  %v2146_v40 = vrot.slane %v2133_v18, %v5840_v2  ;;  %v2205_v12 = vld [vmem:[#allocation7 + $0x62] ss:$8 sm:$0xf]  ;;  %v1310_v16 = vrot.slane %v1305_v51, %v5842_v3 }
 0x34a   : > { %1361 = vrot.lane.b32.xlu0 %v1350_v45, %s7790_s17  ;;  %1359 = vrot.lane.b32.xlu1 %v1346_v43, %s7790_s17  ;;  %v2214_v45 = vrot.slane %v2205_v12, %v5846_v5  ;;  %v2210_v43 = vrot.slane %v2205_v12, %v5842_v3 }
 0x34e   : > { %1365 = vrot.lane.b32.xlu0 %v1358_v33, %s7790_s17  ;;  %1363 = vrot.lane.b32.xlu1 %v1354_v35, %s7790_s17  ;;  %v2222_v33 = vrot.slane %v2205_v12, %v5844_v4  ;;  %v2218_v35 = vrot.slane %v2205_v12, %v5840_v2  ;;  %s7855_s17 = smov 120  }
 0x352   : > { %1433 = vrot.lane.b32.xlu0 %v1422_v57, %s7788_s26  ;;  %1431 = vrot.lane.b32.xlu1 %v1418_v48, %s7788_s26  ;;  %v1322_v48 = vrot.slane %v1305_v51, %v5844_v4 }
 0x356   : > { %1437 = vrot.lane.b32.xlu0 %v1430_v21, %s7788_s26  ;;  %1435 = vrot.lane.b32.xlu1 %v1426_v13, %s7788_s26  ;;  %v1314_v21 = vrot.slane %v1305_v51, %v5846_v5  ;;  %v1318_v13 = vrot.slane %v1305_v51, %v5840_v2  ;;  %s7854_s26 = smov 121  }
 0x35a   : > { %1505 = vrot.lane.b32.xlu0 %v1494_v56, %s7786_s22  ;;  %1503 = vrot.lane.b32.xlu1 %v1490_v19, %s7786_s22 }
 0x35e   : > { %1509 = vrot.lane.b32.xlu0 %v1502_v49, %s7786_s22  ;;  %1507 = vrot.lane.b32.xlu1 %v1498_v50, %s7786_s22  ;;  %v6396_v50 = vld [vmem:[%s5830_s16 + $0x18] sm:$0xff]  ;;  %s7853_s22 = smov 127  }
 0x35f   : > { %v1330_v52 = vmul.f32 %v6396_v50, %v1322_v48 }
 0x362   : > { %1577 = vrot.lane.b32.xlu0 %v1566_v53, %s7783_s10  ;;  %1575 = vrot.lane.b32.xlu1 %v1562_v7, %s7783_s10  ;;  %v6400_v7 = vld [vmem:[%s5830_s16 + $0x8] sm:$0xff] }
 0x366   : > { %1581 = vrot.lane.b32.xlu0 %v1574_v28, %s7783_s10  ;;  %1579 = vrot.lane.b32.xlu1 %v1570_v29, %s7783_s10  ;;  %s7852_s10 = smov 73   ;;  %v1328_v28 = vmul.f32 %v6400_v7, %v1314_v21  ;;  %v6404_v29 = vld [vmem:[%s5830_s16 + $0x10] sm:$0xff] }
 0x367   : > { %v1329_v54 = vmul.f32 %v6404_v29, %v1318_v13 }
 0x36a   : > { %1649 = vrot.lane.b32.xlu0 %v1638_v17, %s7792_s11  ;;  %1647 = vrot.lane.b32.xlu1 %v1634_v55, %s7792_s11 }
 0x36e   : > { %1653 = vrot.lane.b32.xlu0 %v1646_v22, %s7792_s11  ;;  %1651 = vrot.lane.b32.xlu1 %v1642_v23, %s7792_s11  ;;  %v6408_v22 = vld [vmem:[%s5830_s16] sm:$0xff]  ;;  %s7856_s11 = smov 119  }
 0x36f   : > { %v1327_v23 = vmul.f32 %v6408_v22, %v1310_v16 }
 0x372   : > { %1721 = vrot.lane.b32.xlu0 %v1710_v59, %s7810_s13  ;;  %1719 = vrot.lane.b32.xlu1 %v1706_v60, %s7810_s13 }
 0x376   : > { %1725 = vrot.lane.b32.xlu0 %v1718_v61, %s7810_s13  ;;  %1723 = vrot.lane.b32.xlu1 %v1714_v1, %s7810_s13 }
 0x37a   : > { %1793 = vrot.lane.b32.xlu0 %v1782_v8, %s7808_s21  ;;  %1791 = vrot.lane.b32.xlu1 %v1778_v31, %s7808_s21 }
 0x37e   : > { %1797 = vrot.lane.b32.xlu0 %v1790_v14, %s7808_s21  ;;  %1795 = vrot.lane.b32.xlu1 %v1786_v63, %s7808_s21 }
 0x382   : > { %1865 = vrot.lane.b32.xlu0 %v1854_v9, %s7803_s18  ;;  %1863 = vrot.lane.b32.xlu1 %v1850_v26, %s7803_s18 }
 0x386   : > { %1869 = vrot.lane.b32.xlu0 %v1862_v10, %s7803_s18  ;;  %1867 = vrot.lane.b32.xlu1 %v1858_v47, %s7803_s18 }
 0x38a   : > { %1937 = vrot.lane.b32.xlu0 %v1926_v42, %s7801_s19  ;;  %1935 = vrot.lane.b32.xlu1 %v1922_v58, %s7801_s19 }
 0x38e   : > { %1941 = vrot.lane.b32.xlu0 %v1934_v20, %s7801_s19  ;;  %1939 = vrot.lane.b32.xlu1 %v1930_v27, %s7801_s19 }
 0x392   : > { %2009 = vrot.lane.b32.xlu0 %v1998_v11, %s7799_s14  ;;  %2007 = vrot.lane.b32.xlu1 %v1994_v30, %s7799_s14 }
 0x396   : > { %2013 = vrot.lane.b32.xlu0 %v2006_v6, %s7799_s14  ;;  %2011 = vrot.lane.b32.xlu1 %v2002_v34, %s7799_s14 }
 0x39a   : > { %2081 = vrot.lane.b32.xlu0 %v2070_v37, %s7796_s25  ;;  %2079 = vrot.lane.b32.xlu1 %v2066_v38, %s7796_s25 }
 0x39e   : > { %2085 = vrot.lane.b32.xlu0 %v2078_v36, %s7796_s25  ;;  %2083 = vrot.lane.b32.xlu1 %v2074_v39, %s7796_s25 }
 0x3a2   : > { %2153 = vrot.lane.b32.xlu0 %v2142_v46, %s7794_s15  ;;  %2151 = vrot.lane.b32.xlu1 %v2138_v44, %s7794_s15 }
 0x3a6   : > { %2157 = vrot.lane.b32.xlu0 %v2150_v41, %s7794_s15  ;;  %2155 = vrot.lane.b32.xlu1 %v2146_v40, %s7794_s15 }
 0x3aa   : > { %2225 = vrot.lane.b32.xlu0 %v2214_v45, %s7852_s10  ;;  %2223 = vrot.lane.b32.xlu1 %v2210_v43, %s7852_s10 }
 0x3ae   : > { %2229 = vrot.lane.b32.xlu0 %v2222_v33, %s7852_s10  ;;  %2227 = vrot.lane.b32.xlu1 %v2218_v35, %s7852_s10 }
 0x3b4   : > { %v5073_v57 = vpop.permute.xlu0 %5072 }
 0x3b5   : > { %v5075_v56 = vunpack.i.h.bf16 %v5073_v57  ;;  %v5074_v19 = vunpack.i.l.bf16 %v5073_v57 }
 0x3b7   : > { %v1288_v24 = vsel %vm1287_vm9, %v5074_v19, %v5075_v56 }
 0x3b8   : > { %v5078_v49 = vpop.permute.xlu1 %5077  ;;  %v1286_v53 = vpop.permute.xlu0 %1285  ;;  %v2404_v63 = vpack.c.bf16 %v1327_v23, %v1288_v24 }
 0x3b9   : > { %v5080_v17 = vunpack.i.h.bf16 %v5078_v49  ;;  %v5079_v55 = vunpack.i.l.bf16 %v5078_v49 }
 0x3bb   : > { %v1291_v59 = vsel %vm1287_vm9, %v5080_v17, %v1286_v53  ;;  %v1289_v60 = vsel %vm1287_vm9, %v5075_v56, %v5079_v55  ;;  %v1290_v61 = vsel %vm1287_vm9, %v5079_v55, %v5080_v17 }
 0x3bc   : > { %v2407_v1 = vpack.c.bf16 %v1330_v52, %v1291_v59  ;;  %v1360_v62 = vpop.permute.xlu1 %1359  ;;  %v1362_v8 = vpop.permute.xlu0 %1361  ;;  %v2405_v31 = vpack.c.bf16 %v1328_v28, %v1289_v60  ;;  %v2406_v14 = vpack.c.bf16 %v1329_v54, %v1290_v61 }
 0x3bd   : > { %v1367_v0 = vsel %vm1287_vm9, %v1360_v62, %v1362_v8  ;;  %v1375_v43 = vmul.f32 %v6408_v22, %v1360_v62 }
 0x3be   : > { %2471 = vmatprep.subr.bf16.mxu0 %v2405_v31  ;;  %2512 = vmatprep.subr.bf16.mxu1 %v2407_v1  ;;  %v1376_v42 = vmul.f32 %v6400_v7, %v1367_v0 }
 0x3bf   : > { %2472 = vmatpush1.bf16.msra.mxu0 %v2404_v63  ;;  %2513 = vmatpush1.bf16.msra.mxu1 %v2406_v14 }
 0x3c0   : > { %v1364_v9 = vpop.permute.xlu1 %1363  ;;  %v1366_v26 = vpop.permute.xlu0 %1365 }
 0x3c1   : > { %v1368_v10 = vsel %vm1287_vm9, %v1362_v8, %v1364_v9  ;;  %v1369_v47 = vsel %vm1287_vm9, %v1364_v9, %v1366_v26  ;;  %v1379_v15 = vmul.f32 0.0, %v1366_v26 }
 0x3c2   : > { %v1377_v58 = vmul.f32 %v6404_v29, %v1368_v10  ;;  %v1378_v20 = vmul.f32 %v6396_v50, %v1369_v47 }
 0x3c4   : > { %v5081_v27 = vpack.i.bf16 %v1377_v58, %v1376_v42  ;;  %v5086_v25 = vpack.i.bf16 %v1379_v15, %v1378_v20  ;;  %v1432_v11 = vpop.permute.xlu1 %1431  ;;  %v1434_v30 = vpop.permute.xlu0 %1433 }
 0x3c5   : > { %v1439_v6 = vsel %vm7807_vm13, %v1432_v11, %v1434_v30  ;;  %v1447_v33 = vmul.f32 %v6408_v22, %v1432_v11 }
 0x3c6   : > { %5082 = vrot.lane.b32.xlu1 %v5081_v27, %s7853_s22  ;;  %5087 = vrot.lane.b32.xlu0 %v5086_v25, %s7853_s22  ;;  %v1448_v39 = vmul.f32 %v6400_v7, %v1439_v6 }
 0x3c8   : > { %v1436_v34 = vpop.permute.xlu1 %1435  ;;  %v1438_v32 = vpop.permute.xlu0 %1437 }
 0x3c9   : > { %v1440_v37 = vsel %vm7807_vm13, %v1434_v30, %v1436_v34  ;;  %v1441_v38 = vsel %vm7807_vm13, %v1436_v34, %v1438_v32  ;;  %v1451_v36 = vmul.f32 0.0, %v1438_v32 }
 0x3ca   : > { %v1449_v18 = vmul.f32 %v6404_v29, %v1440_v37  ;;  %v1450_v46 = vmul.f32 %v6396_v50, %v1441_v38 }
 0x3cc   : > { %v5091_v44 = vpack.i.bf16 %v1449_v18, %v1448_v39  ;;  %v5096_v41 = vpack.i.bf16 %v1451_v36, %v1450_v46  ;;  %v1504_v40 = vpop.permute.xlu1 %1503  ;;  %v1506_v12 = vpop.permute.xlu0 %1505 }
 0x3cd   : > { %v1511_v45 = vsel %vm7806_vm14, %v1504_v40, %v1506_v12  ;;  %v1519_v63 = vmul.f32 %v6408_v22, %v1504_v40 }
 0x3ce   : > { %5092 = vrot.lane.b32.xlu1 %v5091_v44, %s7854_s26  ;;  %5097 = vrot.lane.b32.xlu0 %v5096_v41, %s7854_s26  ;;  %v1520_v13 = vmul.f32 %v6400_v7, %v1511_v45 }
 0x3d0   : > { %v1508_v35 = vpop.permute.xlu1 %1507  ;;  %v1510_v51 = vpop.permute.xlu0 %1509 }
 0x3d1   : > { %v1512_v57 = vsel %vm7806_vm14, %v1506_v12, %v1508_v35  ;;  %v1513_v48 = vsel %vm7806_vm14, %v1508_v35, %v1510_v51  ;;  %v1523_v21 = vmul.f32 0.0, %v1510_v51 }
 0x3d2   : > { %v1521_v16 = vmul.f32 %v6404_v29, %v1512_v57  ;;  %v1522_v56 = vmul.f32 %v6396_v50, %v1513_v48  ;;  %1385 = vrot.lane.b32.xlu1 %v1375_v43, %s7853_s22  ;;  %1457 = vrot.lane.b32.xlu0 %v1447_v33, %s7854_s26 }
 0x3d4   : > { %v5101_v19 = vpack.i.bf16 %v1521_v16, %v1520_v13  ;;  %v5106_v49 = vpack.i.bf16 %v1523_v21, %v1522_v56  ;;  %v1576_v52 = vpop.permute.xlu1 %1575  ;;  %v1578_v53 = vpop.permute.xlu0 %1577 }
 0x3d5   : > { %v1583_v28 = vsel %vm7798_vm10, %v1576_v52, %v1578_v53  ;;  %v1591_v0 = vmul.f32 %v6408_v22, %v1576_v52 }
 0x3d6   : > { %5102 = vrot.lane.b32.xlu1 %v5101_v19, %s7855_s17  ;;  %5107 = vrot.lane.b32.xlu0 %v5106_v49, %s7855_s17  ;;  %v1592_v59 = vmul.f32 %v6400_v7, %v1583_v28 }
 0x3d8   : > { %v1580_v54 = vpop.permute.xlu1 %1579  ;;  %v1582_v17 = vpop.permute.xlu0 %1581 }
 0x3d9   : > { %v1584_v55 = vsel %vm7798_vm10, %v1578_v53, %v1580_v54  ;;  %v1585_v23 = vsel %vm7798_vm10, %v1580_v54, %v1582_v17  ;;  %v1595_v24 = vmul.f32 0.0, %v1582_v17  ;;  %vm7805_vm10 = vcmask 719872  }
 0x3da   : > { %v1593_v60 = vmul.f32 %v6404_v29, %v1584_v55  ;;  %v1594_v61 = vmul.f32 %v6396_v50, %v1585_v23 }
 0x3dc   : > { %v5111_v1 = vpack.i.bf16 %v1593_v60, %v1592_v59  ;;  %v5116_v62 = vpack.i.bf16 %v1595_v24, %v1594_v61  ;;  %v1648_v8 = vpop.permute.xlu1 %1647  ;;  %v1650_v31 = vpop.permute.xlu0 %1649 }
 0x3dd   : > { %v1655_v14 = vsel %vm7828_vm0, %v1648_v8, %v1650_v31  ;;  %v1663_v43 = vmul.f32 %v6408_v22, %v1648_v8 }
 0x3de   : > { %5112 = vrot.lane.b32.xlu1 %v5111_v1, %s7856_s11  ;;  %5117 = vrot.lane.b32.xlu0 %v5116_v62, %s7856_s11  ;;  %v1664_v42 = vmul.f32 %v6400_v7, %v1655_v14  ;;  %v5641_v1 = vmov 0  }
 0x3df   : > { %5211 = vset.pattern.permute.xlu0 %v5641_v1  ;;  %5212 = vset.pattern.permute.xlu1 %v5641_v1 }
 0x3e0   : > { %v1652_v9 = vpop.permute.xlu1 %1651  ;;  %v1654_v26 = vpop.permute.xlu0 %1653 }
 0x3e1   : > { %v1656_v10 = vsel %vm7828_vm0, %v1650_v31, %v1652_v9  ;;  %v1657_v47 = vsel %vm7828_vm0, %v1652_v9, %v1654_v26  ;;  %v1667_v15 = vmul.f32 0.0, %v1654_v26 }
 0x3e2   : > { %v1665_v58 = vmul.f32 %v6404_v29, %v1656_v10  ;;  %v1666_v20 = vmul.f32 %v6396_v50, %v1657_v47  ;;  %1529 = vrot.lane.b32.xlu1 %v1519_v63, %s7855_s17  ;;  %1601 = vrot.lane.b32.xlu0 %v1591_v0, %s7856_s11 }
 0x3e4   : > { %v5121_v27 = vpack.i.bf16 %v1665_v58, %v1664_v42  ;;  %v5126_v25 = vpack.i.bf16 %v1667_v15, %v1666_v20  ;;  %v1720_v11 = vpop.permute.xlu1 %1719  ;;  %v1722_v30 = vpop.permute.xlu0 %1721 }
 0x3e5   : > { %v1727_v6 = vsel %vm7827_vm1, %v1720_v11, %v1722_v30  ;;  %v1735_v33 = vmul.f32 %v6408_v22, %v1720_v11 }
 0x3e6   : > { %5122 = vrot.lane.b32.xlu1 %v5121_v27, %s7852_s10  ;;  %5127 = vrot.lane.b32.xlu0 %v5126_v25, %s7852_s10  ;;  %v1736_v39 = vmul.f32 %v6400_v7, %v1727_v6 }
 0x3e8   : > { %v1724_v34 = vpop.permute.xlu1 %1723  ;;  %v1726_v32 = vpop.permute.xlu0 %1725 }
 0x3e9   : > { %v1728_v37 = vsel %vm7827_vm1, %v1722_v30, %v1724_v34  ;;  %v1729_v38 = vsel %vm7827_vm1, %v1724_v34, %v1726_v32  ;;  %v1739_v36 = vmul.f32 0.0, %v1726_v32 }
 0x3ea   : > { %v1737_v18 = vmul.f32 %v6404_v29, %v1728_v37  ;;  %v1738_v46 = vmul.f32 %v6396_v50, %v1729_v38 }
 0x3ec   : > { %v5131_v44 = vpack.i.bf16 %v1737_v18, %v1736_v39  ;;  %v5136_v41 = vpack.i.bf16 %v1739_v36, %v1738_v46  ;;  %v1792_v40 = vpop.permute.xlu1 %1791  ;;  %v1794_v12 = vpop.permute.xlu0 %1793 }
 0x3ed   : > { %v1799_v45 = vsel %vm7826_vm2, %v1792_v40, %v1794_v12  ;;  %v1807_v0 = vmul.f32 %v6408_v22, %v1792_v40 }
 0x3ee   : > { %5132 = vrot.lane.b32.xlu1 %v5131_v44, %s7794_s15  ;;  %5137 = vrot.lane.b32.xlu0 %v5136_v41, %s7794_s15  ;;  %v1808_v13 = vmul.f32 %v6400_v7, %v1799_v45 }
 0x3f0   : > { %v1796_v35 = vpop.permute.xlu1 %1795  ;;  %v1798_v51 = vpop.permute.xlu0 %1797 }
 0x3f1   : > { %v1800_v57 = vsel %vm7826_vm2, %v1794_v12, %v1796_v35  ;;  %v1801_v48 = vsel %vm7826_vm2, %v1796_v35, %v1798_v51  ;;  %v1811_v21 = vmul.f32 0.0, %v1798_v51 }
 0x3f2   : > { %v1809_v16 = vmul.f32 %v6404_v29, %v1800_v57  ;;  %v1810_v56 = vmul.f32 %v6396_v50, %v1801_v48  ;;  %1673 = vrot.lane.b32.xlu1 %v1663_v43, %s7852_s10  ;;  %1745 = vrot.lane.b32.xlu0 %v1735_v33, %s7794_s15  ;;  %s7867_s15 = smov 71  }
 0x3f4   : > { %v5141_v19 = vpack.i.bf16 %v1809_v16, %v1808_v13  ;;  %v5146_v49 = vpack.i.bf16 %v1811_v21, %v1810_v56  ;;  %v1864_v52 = vpop.permute.xlu1 %1863  ;;  %v1866_v53 = vpop.permute.xlu0 %1865 }
 0x3f5   : > { %v1871_v28 = vsel %vm601_vm3, %v1864_v52, %v1866_v53  ;;  %v1879_v9 = vmul.f32 %v6408_v22, %v1864_v52 }
 0x3f6   : > { %5142 = vrot.lane.b32.xlu1 %v5141_v19, %s7796_s25  ;;  %5147 = vrot.lane.b32.xlu0 %v5146_v49, %s7796_s25  ;;  %v1880_v59 = vmul.f32 %v6400_v7, %v1871_v28 }
 0x3f8   : > { %v1868_v54 = vpop.permute.xlu1 %1867  ;;  %v1870_v17 = vpop.permute.xlu0 %1869 }
 0x3f9   : > { %v1872_v55 = vsel %vm601_vm3, %v1866_v53, %v1868_v54  ;;  %v1873_v23 = vsel %vm601_vm3, %v1868_v54, %v1870_v17  ;;  %v1883_v24 = vmul.f32 0.0, %v1870_v17 }
 0x3fa   : > { %v1881_v60 = vmul.f32 %v6404_v29, %v1872_v55  ;;  %v1882_v61 = vmul.f32 %v6396_v50, %v1873_v23 }
 0x3fc   : > { %v5151_v62 = vpack.i.bf16 %v1881_v60, %v1880_v59  ;;  %v5156_v8 = vpack.i.bf16 %v1883_v24, %v1882_v61  ;;  %v1936_v31 = vpop.permute.xlu1 %1935  ;;  %v1938_v14 = vpop.permute.xlu0 %1937 }
 0x3fd   : > { %v1943_v63 = vsel %vm675_vm4, %v1936_v31, %v1938_v14  ;;  %v1951_v33 = vmul.f32 %v6408_v22, %v1936_v31 }
 0x3fe   : > { %5152 = vrot.lane.b32.xlu1 %v5151_v62, %s7799_s14  ;;  %5157 = vrot.lane.b32.xlu0 %v5156_v8, %s7799_s14  ;;  %v1952_v58 = vmul.f32 %v6400_v7, %v1943_v63 }
 0x400   : > { %v1940_v26 = vpop.permute.xlu1 %1939  ;;  %v1942_v10 = vpop.permute.xlu0 %1941 }
 0x401   : > { %v1944_v47 = vsel %vm675_vm4, %v1938_v14, %v1940_v26  ;;  %v1945_v15 = vsel %vm675_vm4, %v1940_v26, %v1942_v10  ;;  %v1955_v42 = vmul.f32 0.0, %v1942_v10  ;;  %v6537_v26 = vld [vmem:[%s7857_s1] sm:$0xff]  ;;  %s7871_s1 = smov 8  }
 0x402   : > { %v1953_v20 = vmul.f32 %v6404_v29, %v1944_v47  ;;  %v1954_v27 = vmul.f32 %v6396_v50, %v1945_v15  ;;  %1817 = vrot.lane.b32.xlu1 %v1807_v0, %s7796_s25  ;;  %1889 = vrot.lane.b32.xlu0 %v1879_v9, %s7799_s14  ;;  %s7858_s25 = smov 55   ;;  %s7866_s14 = smov 65  }
 0x404   : > { %v5161_v25 = vpack.i.bf16 %v1953_v20, %v1952_v58  ;;  %v5166_v11 = vpack.i.bf16 %v1955_v42, %v1954_v27  ;;  %v2008_v30 = vpop.permute.xlu1 %2007  ;;  %v2010_v6 = vpop.permute.xlu0 %2009  ;;  %v4856_v58 = vcombine.high %v6537_v26, %v6537_v26 }
 0x405   : > { %v2015_v34 = vsel %vm630_vm5, %v2008_v30, %v2010_v6  ;;  %v2023_v35 = vmul.f32 %v6408_v22, %v2008_v30  ;;  %v2574_v30 = vld [vmem:[#allocation7] ss:$8 sm:$0xf] }
 0x406   : > { %5162 = vrot.lane.b32.xlu1 %v5161_v25, %s7801_s19  ;;  %5167 = vrot.lane.b32.xlu0 %v5166_v11, %s7801_s19  ;;  %v2024_v18 = vmul.f32 %v6400_v7, %v2015_v34  ;;  %v2551_v34 = vld [vmem:[%s7860_s3] sm:$0xff]  ;;  %s7873_s3 = smov 56  }
 0x407   : > { %4858 = vmatprep.mubr.msk.bf16.mxu0 %vm7805_vm10, %v4856_v58  ;;  %4860 = vmatprep.mubr.msk.bf16.mxu1 %vm7805_vm10, %v4856_v58  ;;  %vm7863_vm10 = vcmask 973824  }
 0x408   : > { %v2012_v32 = vpop.permute.xlu1 %2011  ;;  %v2014_v37 = vpop.permute.xlu0 %2013  ;;  %vm7864_vm14 = vmmov %vm7863_vm10 }
 0x409   : > { %v2016_v38 = vsel %vm630_vm5, %v2010_v6, %v2012_v32  ;;  %v2017_v36 = vsel %vm630_vm5, %v2012_v32, %v2014_v37  ;;  %v2027_v39 = vmul.f32 0.0, %v2014_v37  ;;  %v2583_v6 = vrot.slane %v2574_v30, %v5846_v5  ;;  %vm7865_vm13 = vmmov %vm7863_vm10 }
 0x40a   : > { %v2025_v46 = vmul.f32 %v6404_v29, %v2016_v38  ;;  %v2026_v44 = vmul.f32 %v6396_v50, %v2017_v36  ;;  %v2579_v32 = vrot.slane %v2574_v30, %v5842_v3  ;;  %v2591_v37 = vrot.slane %v2574_v30, %v5844_v4  ;;  %v2645_v38 = vld [vmem:[#allocation7 + $0x1] ss:$8 sm:$0xf] }
 0x40b   : > { %v2587_v36 = vrot.slane %v2574_v30, %v5840_v2 }
 0x40c   : > { %v5171_v41 = vpack.i.bf16 %v2025_v46, %v2024_v18  ;;  %v5176_v40 = vpack.i.bf16 %v2027_v39, %v2026_v44  ;;  %v2080_v12 = vpop.permute.xlu1 %2079  ;;  %v2082_v45 = vpop.permute.xlu0 %2081  ;;  %v2650_v39 = vrot.slane %v2645_v38, %v5842_v3  ;;  %v2654_v18 = vrot.slane %v2645_v38, %v5846_v5  ;;  %v2716_v44 = vld [vmem:[#allocation7 + $0x2] ss:$8 sm:$0xf] }
 0x40d   : > { %v2087_v43 = vsel %vm556_vm6, %v2080_v12, %v2082_v45  ;;  %v2095_v0 = vmul.f32 %v6408_v22, %v2080_v12  ;;  %v2658_v46 = vrot.slane %v2645_v38, %v5840_v2 }
 0x40e   : > { %5172 = vrot.lane.b32.xlu1 %v5171_v41, %s7803_s18  ;;  %5177 = vrot.lane.b32.xlu0 %v5176_v40, %s7803_s18  ;;  %v2096_v16 = vmul.f32 %v6400_v7, %v2087_v43  ;;  %v2662_v41 = vrot.slane %v2645_v38, %v5844_v4  ;;  %v2725_v40 = vrot.slane %v2716_v44, %v5846_v5 }
 0x40f   : > { %v2721_v43 = vrot.slane %v2716_v44, %v5842_v3 }
 0x410   : > { %v2084_v51 = vpop.permute.xlu1 %2083  ;;  %v2086_v57 = vpop.permute.xlu0 %2085 }
 0x411   : > { %v2088_v48 = vsel %vm556_vm6, %v2082_v45, %v2084_v51  ;;  %v2089_v21 = vsel %vm556_vm6, %v2084_v51, %v2086_v57  ;;  %v2099_v13 = vmul.f32 0.0, %v2086_v57 }
 0x412   : > { %v2097_v56 = vmul.f32 %v6404_v29, %v2088_v48  ;;  %v2098_v19 = vmul.f32 %v6396_v50, %v2089_v21  ;;  %1961 = vrot.lane.b32.xlu1 %v1951_v33, %s7801_s19  ;;  %2033 = vrot.lane.b32.xlu0 %v2023_v35, %s7803_s18  ;;  %v2733_v33 = vrot.slane %v2716_v44, %v5844_v4  ;;  %s7861_s18 = smov 63   ;;  %s7862_s19 = smov 64  }
 0x414   : > { %v5181_v49 = vpack.i.bf16 %v2097_v56, %v2096_v16  ;;  %v5186_v52 = vpack.i.bf16 %v2099_v13, %v2098_v19  ;;  %v2152_v53 = vpop.permute.xlu1 %2151  ;;  %v2154_v28 = vpop.permute.xlu0 %2153 }
 0x415   : > { %v2159_v54 = vsel %vm482_vm7, %v2152_v53, %v2154_v28  ;;  %v2167_v9 = vmul.f32 %v6408_v22, %v2152_v53 }
 0x416   : > { %5182 = vrot.lane.b32.xlu1 %v5181_v49, %s7808_s21  ;;  %5187 = vrot.lane.b32.xlu0 %v5186_v52, %s7808_s21  ;;  %v2168_v60 = vmul.f32 %v6400_v7, %v2159_v54  ;;  %v2787_v52 = vld [vmem:[#allocation7 + $0x3] ss:$8 sm:$0xf]  ;;  %v2729_v54 = vrot.slane %v2716_v44, %v5840_v2 }
 0x418   : > { %v2156_v17 = vpop.permute.xlu1 %2155  ;;  %v2158_v55 = vpop.permute.xlu0 %2157 }
 0x419   : > { %v2160_v23 = vsel %vm482_vm7, %v2154_v28, %v2156_v17  ;;  %v2161_v24 = vsel %vm482_vm7, %v2156_v17, %v2158_v55  ;;  %v2171_v59 = vmul.f32 0.0, %v2158_v55 }
 0x41a   : > { %v2169_v61 = vmul.f32 %v6404_v29, %v2160_v23  ;;  %v2170_v1 = vmul.f32 %v6396_v50, %v2161_v24 }
 0x41c   : > { %v5191_v62 = vpack.i.bf16 %v2169_v61, %v2168_v60  ;;  %v5196_v8 = vpack.i.bf16 %v2171_v59, %v2170_v1  ;;  %v2224_v31 = vpop.permute.xlu1 %2223  ;;  %v2226_v14 = vpop.permute.xlu0 %2225 }
 0x41d   : > { %v2231_v63 = vsel %vm408_vm8, %v2224_v31, %v2226_v14  ;;  %v2239_v10 = vmul.f32 %v6408_v22, %v2224_v31 }
 0x41e   : > { %5192 = vrot.lane.b32.xlu1 %v5191_v62, %s7810_s13  ;;  %5197 = vrot.lane.b32.xlu0 %v5196_v8, %s7810_s13  ;;  %v2240_v47 = vmul.f32 %v6400_v7, %v2231_v63  ;;  %v2792_v8 = vrot.slane %v2787_v52, %v5842_v3 }
 0x420   : > { %v2228_v15 = vpop.permute.xlu1 %2227  ;;  %v2230_v42 = vpop.permute.xlu0 %2229  ;;  %v5201_v7 = vpack.i.bf16 %v2240_v47, %v2239_v10  ;;  %v2858_v10 = vld [vmem:[#allocation7 + $0x4] ss:$8 sm:$0xf] }
 0x421   : > { %v2232_v20 = vsel %vm408_vm8, %v2226_v14, %v2228_v15  ;;  %v2233_v27 = vsel %vm408_vm8, %v2228_v15, %v2230_v42  ;;  %v2867_v58 = vrot.slane %v2858_v10, %v5846_v5  ;;  %v2875_v30 = vrot.slane %v2858_v10, %v5844_v4 }
 0x422   : > { %v2241_v25 = vmul.f32 %v6404_v29, %v2232_v20  ;;  %v2242_v11 = vmul.f32 %v6396_v50, %v2233_v27  ;;  %2105 = vrot.lane.b32.xlu1 %v2095_v0, %s7808_s21  ;;  %2177 = vrot.lane.b32.xlu0 %v2167_v9, %s7810_s13  ;;  %v2541_v29 = vld [vmem:[%s7859_s2] sm:$0xff]  ;;  %v2243_v50 = vmul.f32 0.0, %v2230_v42  ;;  %v2796_v0 = vrot.slane %v2787_v52, %v5846_v5  ;;  %s7872_s2 = smov 9  }
 0x423   : > { %v2800_v9 = vrot.slane %v2787_v52, %v5840_v2  ;;  %v2804_v42 = vrot.slane %v2787_v52, %v5844_v4 }
 0x424   : > { %v5206_v22 = vpack.i.bf16 %v2242_v11, %v2241_v25 }
 0x426   : > { %5202 = vrot.lane.b32.xlu1 %v5201_v7, %s7858_s25  ;;  %5207 = vrot.lane.b32.xlu0 %v5206_v22, %s7858_s25  ;;  %v2863_v7 = vrot.slane %v2858_v10, %v5842_v3 }
 0x42a   : > { %2257 = vrot.lane.b32.xlu1 %v2243_v50, %s7858_s25  ;;  %2544 = vperm.xlu0 %5211, %v2541_v29  }
 0x42e   : > { %2554 = vperm.xlu1 %5212, %v2551_v34   ;;  %2594 = vrot.lane.b32.xlu0 %v2583_v6, %s7858_s25 }
 0x432   : > { %2592 = vrot.lane.b32.xlu1 %v2579_v32, %s7858_s25  ;;  %2598 = vrot.lane.b32.xlu0 %v2591_v37, %s7858_s25  ;;  %v2929_v37 = vld [vmem:[#allocation7 + $0x5] ss:$8 sm:$0xf] }
 0x436   : > { %2596 = vrot.lane.b32.xlu1 %v2587_v36, %s7858_s25  ;;  %2663 = vrot.lane.b32.xlu0 %v2650_v39, %s7810_s13  ;;  %v2871_v39 = vrot.slane %v2858_v10, %v5840_v2 }
 0x438   : > { %v5083_v12 = vpop.permute.xlu1 %5082  ;;  %v5088_v45 = vpop.permute.xlu0 %5087 }
 0x439   : > { %v5085_v35 = vunpack.i.h.bf16 %v5083_v12  ;;  %v5084_v51 = vunpack.i.l.bf16 %v5083_v12  ;;  %v5090_v57 = vunpack.i.h.bf16 %v5088_v45  ;;  %v5089_v48 = vunpack.i.l.bf16 %v5088_v45 }
 0x43a   : > { %2665 = vrot.lane.b32.xlu1 %v2654_v18, %s7810_s13  ;;  %2667 = vrot.lane.b32.xlu0 %v2658_v46, %s7810_s13 }
 0x43b   : > { %v1396_v53 = vsel %vm1258_vm15, %v5084_v51, %v5085_v35  ;;  %v1398_v28 = vsel %vm1258_vm15, %v5089_v48, %v5090_v57  ;;  %v1397_v23 = vsel %vm1258_vm15, %v5085_v35, %v5089_v48  ;;  %v2934_v35 = vrot.slane %v2929_v37, %v5842_v3 }
 0x43e   : > { %2669 = vrot.lane.b32.xlu1 %v2662_v41, %s7810_s13  ;;  %2736 = vrot.lane.b32.xlu0 %v2725_v40, %s7808_s21  ;;  %s7869_s13 = smov 1  }
 0x440   : > { %v5093_v21 = vpop.permute.xlu1 %5092  ;;  %v5098_v13 = vpop.permute.xlu0 %5097 }
 0x441   : > { %v5095_v16 = vunpack.i.h.bf16 %v5093_v21  ;;  %v5094_v56 = vunpack.i.l.bf16 %v5093_v21  ;;  %v5100_v19 = vunpack.i.h.bf16 %v5098_v13  ;;  %v5099_v49 = vunpack.i.l.bf16 %v5098_v13 }
 0x442   : > { %2734 = vrot.lane.b32.xlu1 %v2721_v43, %s7808_s21  ;;  %2740 = vrot.lane.b32.xlu0 %v2733_v33, %s7808_s21  ;;  %v2938_v21 = vrot.slane %v2929_v37, %v5846_v5  ;;  %v2942_v13 = vrot.slane %v2929_v37, %v5840_v2 }
 0x443   : > { %v1468_v17 = vsel %vm1184_vm12, %v5094_v56, %v5095_v16  ;;  %v1470_v55 = vsel %vm1184_vm12, %v5099_v49, %v5100_v19  ;;  %v1469_v24 = vsel %vm1184_vm12, %v5095_v16, %v5099_v49  ;;  %v3000_v16 = vld [vmem:[#allocation7 + $0x6] ss:$8 sm:$0xf]  ;;  %v2946_v49 = vrot.slane %v2929_v37, %v5844_v4 }
 0x444   : > { %v1386_v59 = vpop.permute.xlu1 %1385  ;;  %v1458_v60 = vpop.permute.xlu0 %1457  ;;  %v2409_v61 = vpack.c.bf16 %v1468_v17, %v1396_v53  ;;  %v2411_v1 = vpack.c.bf16 %v1470_v55, %v1398_v28  ;;  %v2410_v62 = vpack.c.bf16 %v1469_v24, %v1397_v23  ;;  %v3005_v52 = vrot.slane %v3000_v16, %v5842_v3 }
 0x445   : > { %v1395_v31 = vsel %vm1258_vm15, %v1386_v59, %v5084_v51  ;;  %v1467_v14 = vsel %vm1184_vm12, %v1458_v60, %v5094_v56  ;;  %v3009_v55 = vrot.slane %v3000_v16, %v5846_v5  ;;  %v3013_v59 = vrot.slane %v3000_v16, %v5840_v2 }
 0x446   : > { %v2408_v63 = vpack.c.bf16 %v1467_v14, %v1395_v31  ;;  %2473 = vmatprep.subr.bf16.mxu0 %v2409_v61  ;;  %2514 = vmatprep.subr.bf16.mxu1 %v2411_v1 }
 0x447   : > { %2515 = vmatpush1.bf16.msra.mxu1 %v2410_v62  ;;  %2738 = vrot.lane.b32.xlu1 %v2729_v54, %s7808_s21  ;;  %s7868_s21 = smov 72  }
 0x448   : > { %2474 = vmatpush1.bf16.msra.mxu0 %v2408_v63  ;;  %2805 = vrot.lane.b32.xlu0 %v2792_v8, %s7861_s18  ;;  %v5103_v47 = vpop.permute.xlu1 %5102  ;;  %v5108_v15 = vpop.permute.xlu0 %5107  ;;  %v3071_v8 = vld [vmem:[#allocation7 + $0x7] ss:$8 sm:$0xf]  ;;  %v3017_v63 = vrot.slane %v3000_v16, %v5844_v4 }
 0x449   : > { %v5105_v20 = vunpack.i.h.bf16 %v5103_v47  ;;  %v5104_v27 = vunpack.i.l.bf16 %v5103_v47  ;;  %v5110_v25 = vunpack.i.h.bf16 %v5108_v15  ;;  %v5109_v11 = vunpack.i.l.bf16 %v5108_v15 }
 0x44b   : > { %2807 = vrot.lane.b32.xlu1 %v2796_v0, %s7861_s18  ;;  %v1540_v38 = vsel %vm1110_vm11, %v5104_v27, %v5105_v20  ;;  %v1542_v36 = vsel %vm1110_vm11, %v5109_v11, %v5110_v25  ;;  %v1541_v44 = vsel %vm1110_vm11, %v5105_v20, %v5109_v11  ;;  %v3076_v25 = vrot.slane %v3071_v8, %v5842_v3 }
 0x44c   : > { %2809 = vrot.lane.b32.xlu0 %v2800_v9, %s7861_s18 }
 0x44f   : > { %2811 = vrot.lane.b32.xlu1 %v2804_v42, %s7861_s18 }
 0x450   : > { %v5113_v22 = vpop.permute.xlu1 %5112  ;;  %v5118_v29 = vpop.permute.xlu0 %5117  ;;  %2878 = vrot.lane.b32.xlu0 %v2867_v58, %s7862_s19 }
 0x451   : > { %v5115_v50 = vunpack.i.h.bf16 %v5113_v22  ;;  %v5114_v6 = vunpack.i.l.bf16 %v5113_v22  ;;  %v5120_v34 = vunpack.i.h.bf16 %v5118_v29  ;;  %v5119_v32 = vunpack.i.l.bf16 %v5118_v29 }
 0x452   : > { %v3080_v29 = vrot.slane %v3071_v8, %v5846_v5 }
 0x453   : > { %v1612_v18 = vsel %vm7863_vm10, %v5114_v6, %v5115_v50  ;;  %v1614_v46 = vsel %vm7864_vm14, %v5119_v32, %v5120_v34  ;;  %v1613_v41 = vsel %vm7865_vm13, %v5115_v50, %v5119_v32  ;;  %2876 = vrot.lane.b32.xlu1 %v2863_v7, %s7862_s19  ;;  %v3142_v50 = vld [vmem:[#allocation7 + $0x20] ss:$8 sm:$0xf]  ;;  %v3088_v32 = vrot.slane %v3071_v8, %v5844_v4  ;;  %vm7883_vm14 = vmmov %vm7863_vm10 }
 0x454   : > { %v1530_v40 = vpop.permute.xlu1 %1529  ;;  %v1602_v12 = vpop.permute.xlu0 %1601  ;;  %v2413_v45 = vpack.c.bf16 %v1612_v18, %v1540_v38  ;;  %v2415_v43 = vpack.c.bf16 %v1614_v46, %v1542_v36  ;;  %v2414_v33 = vpack.c.bf16 %v1613_v41, %v1541_v44  ;;  %2882 = vrot.lane.b32.xlu0 %v2875_v30, %s7862_s19  ;;  %v3084_v30 = vrot.slane %v3071_v8, %v5840_v2 }
 0x455   : > { %v1539_v51 = vsel %vm1110_vm11, %v1530_v40, %v5104_v27  ;;  %v1611_v57 = vsel %vm7863_vm10, %v1602_v12, %v5114_v6  ;;  %v3147_v37 = vrot.slane %v3142_v50, %v5842_v3  ;;  %v3151_v46 = vrot.slane %v3142_v50, %v5846_v5 }
 0x456   : > { %v2412_v48 = vpack.c.bf16 %v1611_v57, %v1539_v51  ;;  %2475 = vmatprep.subr.bf16.mxu0 %v2413_v45  ;;  %2516 = vmatprep.subr.bf16.mxu1 %v2415_v43  ;;  %v3155_v40 = vrot.slane %v3142_v50, %v5840_v2  ;;  %vm7824_vm13 = vcmask 1043456   ;;  %vm7884_vm10 = vcmask 56320  }
 0x457   : > { %2517 = vmatpush1.bf16.msra.mxu1 %v2414_v33  ;;  %2880 = vrot.lane.b32.xlu1 %v2871_v39, %s7862_s19 }
 0x458   : > { %2476 = vmatpush1.bf16.msra.mxu0 %v2412_v48  ;;  %2947 = vrot.lane.b32.xlu0 %v2934_v35, %s7866_s14  ;;  %v5123_v56 = vpop.permute.xlu1 %5122  ;;  %v5128_v19 = vpop.permute.xlu0 %5127  ;;  %v3213_v35 = vld [vmem:[#allocation7 + $0x21] ss:$8 sm:$0xf]  ;;  %v3159_v48 = vrot.slane %v3142_v50, %v5844_v4 }
 0x459   : > { %v5125_v53 = vunpack.i.h.bf16 %v5123_v56  ;;  %v5124_v28 = vunpack.i.l.bf16 %v5123_v56  ;;  %v5130_v54 = vunpack.i.h.bf16 %v5128_v19  ;;  %v5129_v17 = vunpack.i.l.bf16 %v5128_v19 }
 0x45b   : > { %2949 = vrot.lane.b32.xlu1 %v2938_v21, %s7866_s14  ;;  %v1684_v31 = vsel %vm408_vm8, %v5124_v28, %v5125_v53  ;;  %v1686_v14 = vsel %vm408_vm8, %v5129_v17, %v5130_v54  ;;  %v1685_v10 = vsel %vm408_vm8, %v5125_v53, %v5129_v17  ;;  %v3218_v54 = vrot.slane %v3213_v35, %v5842_v3 }
 0x45c   : > { %2951 = vrot.lane.b32.xlu0 %v2942_v13, %s7866_s14 }
 0x45f   : > { %2953 = vrot.lane.b32.xlu1 %v2946_v49, %s7866_s14 }
 0x460   : > { %v5133_v23 = vpop.permute.xlu1 %5132  ;;  %v5138_v24 = vpop.permute.xlu0 %5137  ;;  %3018 = vrot.lane.b32.xlu0 %v3005_v52, %s7867_s15 }
 0x461   : > { %v5135_v60 = vunpack.i.h.bf16 %v5133_v23  ;;  %v5134_v61 = vunpack.i.l.bf16 %v5133_v23  ;;  %v5140_v1 = vunpack.i.h.bf16 %v5138_v24  ;;  %v5139_v62 = vunpack.i.l.bf16 %v5138_v24 }
 0x462   : > { %v3222_v24 = vrot.slane %v3213_v35, %v5846_v5 }
 0x463   : > { %v1756_v0 = vsel %vm482_vm7, %v5134_v61, %v5135_v60  ;;  %v1758_v9 = vsel %vm482_vm7, %v5139_v62, %v5140_v1  ;;  %v1757_v47 = vsel %vm482_vm7, %v5135_v60, %v5139_v62  ;;  %3020 = vrot.lane.b32.xlu1 %v3009_v55, %s7867_s15  ;;  %v3284_v60 = vld [vmem:[#allocation7 + $0x22] ss:$8 sm:$0xf]  ;;  %v3230_v62 = vrot.slane %v3213_v35, %v5844_v4 }
 0x464   : > { %v1674_v15 = vpop.permute.xlu1 %1673  ;;  %v1746_v42 = vpop.permute.xlu0 %1745  ;;  %v2417_v58 = vpack.c.bf16 %v1756_v0, %v1684_v31  ;;  %v2419_v20 = vpack.c.bf16 %v1758_v9, %v1686_v14  ;;  %v2418_v27 = vpack.c.bf16 %v1757_v47, %v1685_v10  ;;  %3022 = vrot.lane.b32.xlu0 %v3013_v59, %s7867_s15  ;;  %v3226_v59 = vrot.slane %v3213_v35, %v5840_v2 }
 0x465   : > { %v1683_v11 = vsel %vm408_vm8, %v1674_v15, %v5124_v28  ;;  %v1755_v7 = vsel %vm482_vm7, %v1746_v42, %v5134_v61  ;;  %v3289_v8 = vrot.slane %v3284_v60, %v5842_v3  ;;  %v3293_v9 = vrot.slane %v3284_v60, %v5846_v5 }
 0x466   : > { %v2416_v22 = vpack.c.bf16 %v1755_v7, %v1683_v11  ;;  %2477 = vmatprep.subr.bf16.mxu0 %v2417_v58  ;;  %2518 = vmatprep.subr.bf16.mxu1 %v2419_v20  ;;  %v3297_v15 = vrot.slane %v3284_v60, %v5840_v2 }
 0x467   : > { %2519 = vmatpush1.bf16.msra.mxu1 %v2418_v27  ;;  %3024 = vrot.lane.b32.xlu1 %v3017_v63, %s7867_s15 }
 0x468   : > { %2478 = vmatpush1.bf16.msra.mxu0 %v2416_v22  ;;  %3089 = vrot.lane.b32.xlu0 %v3076_v25, %s7868_s21  ;;  %v5143_v6 = vpop.permute.xlu1 %5142  ;;  %v5148_v34 = vpop.permute.xlu0 %5147  ;;  %v3355_v25 = vld [vmem:[#allocation7 + $0x23] ss:$8 sm:$0xf]  ;;  %v3301_v22 = vrot.slane %v3284_v60, %v5844_v4 }
 0x469   : > { %v5145_v38 = vunpack.i.h.bf16 %v5143_v6  ;;  %v5144_v36 = vunpack.i.l.bf16 %v5143_v6  ;;  %v5150_v39 = vunpack.i.h.bf16 %v5148_v34  ;;  %v5149_v18 = vunpack.i.l.bf16 %v5148_v34 }
 0x46b   : > { %3091 = vrot.lane.b32.xlu1 %v3080_v29, %s7868_s21  ;;  %v1828_v51 = vsel %vm556_vm6, %v5144_v36, %v5145_v38  ;;  %v1830_v57 = vsel %vm556_vm6, %v5149_v18, %v5150_v39  ;;  %v1829_v16 = vsel %vm556_vm6, %v5145_v38, %v5149_v18  ;;  %v3360_v39 = vrot.slane %v3355_v25, %v5842_v3 }
 0x46c   : > { %3093 = vrot.lane.b32.xlu0 %v3084_v30, %s7868_s21 }
 0x46f   : > { %3095 = vrot.lane.b32.xlu1 %v3088_v32, %s7868_s21 }
 0x470   : > { %v5153_v44 = vpop.permute.xlu1 %5152  ;;  %v5158_v41 = vpop.permute.xlu0 %5157  ;;  %3160 = vrot.lane.b32.xlu0 %v3147_v37, %s7852_s10 }
 0x471   : > { %v5155_v12 = vunpack.i.h.bf16 %v5153_v44  ;;  %v5154_v45 = vunpack.i.l.bf16 %v5153_v44  ;;  %v5160_v43 = vunpack.i.h.bf16 %v5158_v41  ;;  %v5159_v33 = vunpack.i.l.bf16 %v5158_v41 }
 0x472   : > { %v3364_v41 = vrot.slane %v3355_v25, %v5846_v5 }
 0x473   : > { %v1900_v21 = vsel %vm630_vm5, %v5154_v45, %v5155_v12  ;;  %v1902_v13 = vsel %vm630_vm5, %v5159_v33, %v5160_v43  ;;  %v1901_v56 = vsel %vm630_vm5, %v5155_v12, %v5159_v33  ;;  %3162 = vrot.lane.b32.xlu1 %v3151_v46, %s7852_s10  ;;  %v3426_v12 = vld [vmem:[#allocation7 + $0x24] ss:$8 sm:$0xf]  ;;  %v3372_v33 = vrot.slane %v3355_v25, %v5844_v4 }
 0x474   : > { %v1818_v19 = vpop.permute.xlu1 %1817  ;;  %v1890_v49 = vpop.permute.xlu0 %1889  ;;  %v2421_v52 = vpack.c.bf16 %v1900_v21, %v1828_v51  ;;  %v2423_v53 = vpack.c.bf16 %v1902_v13, %v1830_v57  ;;  %v2422_v28 = vpack.c.bf16 %v1901_v56, %v1829_v16  ;;  %3164 = vrot.lane.b32.xlu0 %v3155_v40, %s7852_s10  ;;  %v3368_v40 = vrot.slane %v3355_v25, %v5840_v2 }
 0x475   : > { %v1827_v17 = vsel %vm556_vm6, %v1818_v19, %v5144_v36  ;;  %v1899_v55 = vsel %vm630_vm5, %v1890_v49, %v5154_v45  ;;  %v3431_v35 = vrot.slane %v3426_v12, %v5842_v3  ;;  %v3435_v13 = vrot.slane %v3426_v12, %v5846_v5 }
 0x476   : > { %v2420_v23 = vpack.c.bf16 %v1899_v55, %v1827_v17  ;;  %2479 = vmatprep.subr.bf16.mxu0 %v2421_v52  ;;  %2520 = vmatprep.subr.bf16.mxu1 %v2423_v53  ;;  %v3439_v19 = vrot.slane %v3426_v12, %v5840_v2 }
 0x477   : > { %2521 = vmatpush1.bf16.msra.mxu1 %v2422_v28  ;;  %3166 = vrot.lane.b32.xlu1 %v3159_v48, %s7852_s10 }
 0x478   : > { %2480 = vmatpush1.bf16.msra.mxu0 %v2420_v23  ;;  %3231 = vrot.lane.b32.xlu0 %v3218_v54, %s7856_s11  ;;  %v5163_v61 = vpop.permute.xlu1 %5162  ;;  %v5168_v1 = vpop.permute.xlu0 %5167  ;;  %v3531_v54 = vld [vmem:[#allocation7 + $0x26] ss:$8 sm:$0xf]  ;;  %v3443_v23 = vrot.slane %v3426_v12, %v5844_v4  ;;  %v3673_v12 = vld [vmem:[#allocation7 + $0x40] ss:$8 sm:$0xf] }
 0x479   : > { %v5165_v31 = vunpack.i.h.bf16 %v5163_v61  ;;  %v5164_v14 = vunpack.i.l.bf16 %v5163_v61  ;;  %v5170_v63 = vunpack.i.h.bf16 %v5168_v1  ;;  %v5169_v0 = vunpack.i.l.bf16 %v5168_v1 }
 0x47b   : > { %3233 = vrot.lane.b32.xlu1 %v3222_v24, %s7856_s11  ;;  %v1972_v11 = vsel %vm675_vm4, %v5164_v14, %v5165_v31  ;;  %v1974_v7 = vsel %vm675_vm4, %v5169_v0, %v5170_v63  ;;  %v1973_v50 = vsel %vm675_vm4, %v5165_v31, %v5169_v0  ;;  %v3536_v63 = vrot.slane %v3531_v54, %v5842_v3 }
 0x47c   : > { %3235 = vrot.lane.b32.xlu0 %v3226_v59, %s7856_s11 }
 0x47f   : > { %3237 = vrot.lane.b32.xlu1 %v3230_v62, %s7856_s11 }
 0x480   : > { %v5173_v10 = vpop.permute.xlu1 %5172  ;;  %v5178_v47 = vpop.permute.xlu0 %5177  ;;  %3302 = vrot.lane.b32.xlu0 %v3289_v8, %s7855_s17 }
 0x481   : > { %v5175_v42 = vunpack.i.h.bf16 %v5173_v10  ;;  %v5174_v58 = vunpack.i.l.bf16 %v5173_v10  ;;  %v5180_v20 = vunpack.i.h.bf16 %v5178_v47  ;;  %v5179_v27 = vunpack.i.l.bf16 %v5178_v47 }
 0x482   : > { %v3540_v47 = vrot.slane %v3531_v54, %v5846_v5 }
 0x483   : > { %v2044_v29 = vsel %vm601_vm3, %v5174_v58, %v5175_v42  ;;  %v2046_v30 = vsel %vm601_vm3, %v5179_v27, %v5180_v20  ;;  %v2045_v6 = vsel %vm601_vm3, %v5175_v42, %v5179_v27  ;;  %3304 = vrot.lane.b32.xlu1 %v3293_v9, %s7855_s17 }
 0x484   : > { %v1962_v34 = vpop.permute.xlu1 %1961  ;;  %v2034_v32 = vpop.permute.xlu0 %2033  ;;  %v2425_v37 = vpack.c.bf16 %v2044_v29, %v1972_v11  ;;  %v2427_v38 = vpack.c.bf16 %v2046_v30, %v1974_v7  ;;  %v2426_v36 = vpack.c.bf16 %v2045_v6, %v1973_v50  ;;  %3306 = vrot.lane.b32.xlu0 %v3297_v15, %s7855_s17  ;;  %v3602_v7 = vld [vmem:[#allocation7 + $0x27] ss:$8 sm:$0xf]  ;;  %v3548_v50 = vrot.slane %v3531_v54, %v5844_v4 }
 0x485   : > { %v1971_v18 = vsel %vm675_vm4, %v1962_v34, %v5164_v14  ;;  %v2043_v46 = vsel %vm601_vm3, %v2034_v32, %v5174_v58  ;;  %v3544_v58 = vrot.slane %v3531_v54, %v5840_v2 }
 0x486   : > { %v2424_v44 = vpack.c.bf16 %v2043_v46, %v1971_v18  ;;  %2481 = vmatprep.subr.bf16.mxu0 %v2425_v37  ;;  %2522 = vmatprep.subr.bf16.mxu1 %v2427_v38  ;;  %v3607_v38 = vrot.slane %v3602_v7, %v5842_v3  ;;  %v4855_v46 = vcombine.low %v6537_v26, %v6537_v26 }
 0x487   : > { %2523 = vmatpush1.bf16.msra.mxu1 %v2426_v36  ;;  %3308 = vrot.lane.b32.xlu1 %v3301_v22, %s7855_s17  ;;  %v3619_v26 = vrot.slane %v3602_v7, %v5844_v4 }
 0x488   : > { %2482 = vmatpush1.bf16.msra.mxu0 %v2424_v44  ;;  %3373 = vrot.lane.b32.xlu0 %v3360_v39, %s7854_s26  ;;  %v5183_v45 = vpop.permute.xlu1 %5182  ;;  %v5188_v43 = vpop.permute.xlu0 %5187  ;;  %v3611_v44 = vrot.slane %v3602_v7, %v5846_v5 }
 0x489   : > { %v5185_v51 = vunpack.i.h.bf16 %v5183_v45  ;;  %v5184_v57 = vunpack.i.l.bf16 %v5183_v45  ;;  %v5190_v48 = vunpack.i.h.bf16 %v5188_v43  ;;  %v5189_v21 = vunpack.i.l.bf16 %v5188_v43 }
 0x48a   : > { %v3678_v45 = vrot.slane %v3673_v12, %v5842_v3  ;;  %v3682_v43 = vrot.slane %v3673_v12, %v5846_v5 }
 0x48b   : > { %3375 = vrot.lane.b32.xlu1 %v3364_v41, %s7854_s26  ;;  %v2116_v17 = vsel %vm7826_vm2, %v5184_v57, %v5185_v51  ;;  %v2118_v55 = vsel %vm7826_vm2, %v5189_v21, %v5190_v48  ;;  %v2117_v60 = vsel %vm7826_vm2, %v5185_v51, %v5189_v21 }
 0x48c   : > { %3377 = vrot.lane.b32.xlu0 %v3368_v40, %s7854_s26  ;;  %v3615_v40 = vrot.slane %v3602_v7, %v5840_v2 }
 0x48f   : > { %3379 = vrot.lane.b32.xlu1 %v3372_v33, %s7854_s26  ;;  %v3686_v33 = vrot.slane %v3673_v12, %v5840_v2 }
 0x490   : > { %v5193_v16 = vpop.permute.xlu1 %5192  ;;  %v5198_v56 = vpop.permute.xlu0 %5197  ;;  %3444 = vrot.lane.b32.xlu0 %v3431_v35, %s7853_s22  ;;  %v3690_v35 = vrot.slane %v3673_v12, %v5844_v4 }
 0x491   : > { %v5195_v49 = vunpack.i.h.bf16 %v5193_v16  ;;  %v5194_v52 = vunpack.i.l.bf16 %v5193_v16  ;;  %v5200_v53 = vunpack.i.h.bf16 %v5198_v56  ;;  %v5199_v28 = vunpack.i.l.bf16 %v5198_v56 }
 0x493   : > { %v2188_v24 = vsel %vm7827_vm1, %v5194_v52, %v5195_v49  ;;  %v2190_v59 = vsel %vm7827_vm1, %v5199_v28, %v5200_v53  ;;  %v2189_v61 = vsel %vm7827_vm1, %v5195_v49, %v5199_v28  ;;  %3446 = vrot.lane.b32.xlu1 %v3435_v13, %s7853_s22 }
 0x494   : > { %v2106_v1 = vpop.permute.xlu1 %2105  ;;  %v2178_v62 = vpop.permute.xlu0 %2177  ;;  %v2429_v8 = vpack.c.bf16 %v2188_v24, %v2116_v17  ;;  %v2431_v31 = vpack.c.bf16 %v2190_v59, %v2118_v55  ;;  %v2430_v14 = vpack.c.bf16 %v2189_v61, %v2117_v60  ;;  %3448 = vrot.lane.b32.xlu0 %v3439_v19, %s7853_s22 }
 0x495   : > { %v2115_v0 = vsel %vm7826_vm2, %v2106_v1, %v5184_v57  ;;  %v2187_v9 = vsel %vm7827_vm1, %v2178_v62, %v5194_v52 }
 0x496   : > { %v2428_v10 = vpack.c.bf16 %v2187_v9, %v2115_v0  ;;  %2483 = vmatprep.subr.bf16.mxu0 %v2429_v8  ;;  %2524 = vmatprep.subr.bf16.mxu1 %v2431_v31 }
 0x497   : > { %2525 = vmatpush1.bf16.msra.mxu1 %v2430_v14  ;;  %3450 = vrot.lane.b32.xlu1 %v3443_v23, %s7853_s22 }
 0x498   : > { %v5203_v15 = vpop.permute.xlu1 %5202  ;;  %v5208_v42 = vpop.permute.xlu0 %5207  ;;  %2484 = vmatpush1.bf16.msra.mxu0 %v2428_v10  ;;  %3549 = vrot.lane.b32.xlu0 %v3536_v63, %s7869_s13 }
 0x499   : > { %v5205_v20 = vunpack.i.h.bf16 %v5203_v15  ;;  %v5204_v27 = vunpack.i.l.bf16 %v5203_v15  ;;  %v5210_v25 = vunpack.i.h.bf16 %v5208_v42  ;;  %v5209_v11 = vunpack.i.l.bf16 %v5208_v42 }
 0x49b   : > { %v2260_v22 = vsel %vm7828_vm0, %v5205_v20, %v5209_v11  ;;  %v2259_v29 = vsel %vm7828_vm0, %v5204_v27, %v5205_v20  ;;  %v2261_v30 = vsel %vm7828_vm0, %v5209_v11, %v5210_v25  ;;  %3551 = vrot.lane.b32.xlu1 %v3540_v47, %s7869_s13 }
 0x49c   : > { %v2258_v6 = vpop.permute.xlu1 %2257  ;;  %v2433_v34 = vpack.c.bf16 %v2260_v22, %v2260_v22  ;;  %v2432_v32 = vpack.c.bf16 %v2259_v29, %v2259_v29  ;;  %v2434_v37 = vpack.c.bf16 %v2261_v30, %v2261_v30  ;;  %3553 = vrot.lane.b32.xlu0 %v3544_v58, %s7869_s13 }
 0x49d   : > { %v2262_v36 = vsel %vm7828_vm0, %v5210_v25, %v2258_v6 }
 0x49e   : > { %v2435_v39 = vpack.c.bf16 %v2262_v36, %v2262_v36  ;;  %4857 = vmatprep.subr.msk.bf16.mxu0 %vm7824_vm13, %v2433_v34  ;;  %v2448_v18 = vsel %vm7824_vm13, %v2432_v32, 0  ;;  %v2454_v41 = vsel %vm7824_vm13, %v2434_v37, 0 }
 0x49f   : > { %2486 = vmatpush1.bf16.msra.mxu0 %v2448_v18  ;;  %3555 = vrot.lane.b32.xlu1 %v3548_v50, %s7869_s13 }
 0x4a0   : > { %4859 = vmatprep.subr.msk.bf16.mxu1 %vm7824_vm13, %v2435_v39  ;;  %3620 = vrot.lane.b32.xlu0 %v3607_v38, %s7870_s0  ;;  %vm7888_vm13 = vcmask 72704  }
 0x4a1   : > { %2527 = vmatpush1.bf16.msra.mxu1 %v2454_v41 }
 0x4a2   : > { %2492 = vmatmul.mubr.bf16.vlgmr.msra.gmra.mrb[0].mxu0 %v4855_v46 }
 0x4a3   : > { %3622 = vrot.lane.b32.xlu1 %v3611_v44, %s7870_s0 }
 0x4a4   : > { %2533 = vmatmul.mubr.bf16.vlgmr.msra.gmra.mrb[0].mxu1 %v4855_v46  ;;  %3624 = vrot.lane.b32.xlu0 %v3615_v40, %s7870_s0 }
 0x4a7   : > { %3626 = vrot.lane.b32.xlu1 %v3619_v26, %s7870_s0 }
 0x4a8   : > { %3691 = vrot.lane.b32.xlu0 %v3678_v45, %s7871_s1 }
 0x4a9   : > { %v2545_v51 = vpop.permute.xlu0 %2544 }
 0x4ab   : > { %3693 = vrot.lane.b32.xlu1 %v3682_v43, %s7871_s1 }
 0x4ac   : > { %3695 = vrot.lane.b32.xlu0 %v3686_v33, %s7871_s1 }
 0x4ad   : > { %v6746_v57 = vpop.permute.xlu1 %2554  ;;  %v2595_v48 = vpop.permute.xlu0 %2594 }
 0x4af   : > { %3697 = vrot.lane.b32.xlu1 %v3690_v35, %s7871_s1 }
 0x4b1   : > { %v2593_v21 = vpop.permute.xlu1 %2592  ;;  %v6748_v13 = vpop.permute.xlu0 %2598 }
 0x4b2   : > { %v2600_v22 = vsel %vm7828_vm0, %v2593_v21, %v2595_v48  ;;  %v2608_v6 = vmul.f32 0.0, %v2593_v21 }
 0x4b5   : > { %v2597_v16 = vpop.permute.xlu1 %2596  ;;  %v2664_v56 = vpop.permute.xlu0 %2663 }
 0x4b6   : > { %v2679_v34 = vmul.f32 0.0, %v2664_v56  ;;  %v2601_v21 = vsel %vm7828_vm0, %v2595_v48, %v2597_v16 }
 0x4b9   : > { %v6750_v19 = vpop.permute.xlu1 %2665  ;;  %v6752_v49 = vpop.permute.xlu0 %2667 }
 0x4ba   : > { %v2671_v32 = vsel %vm7827_vm1, %v2664_v56, %v6750_v19 }
 0x4bd   : > { %v6754_v52 = vpop.permute.xlu1 %2669  ;;  %v6756_v53 = vpop.permute.xlu0 %2736 }
 0x4c1   : > { %v2735_v28 = vpop.permute.xlu1 %2734  ;;  %v6758_v54 = vpop.permute.xlu0 %2740 }
 0x4c2   : > { %v2742_v38 = vsel %vm7826_vm2, %v2735_v28, %v6756_v53  ;;  %v2750_v56 = vmul.f32 0.0, %v2735_v28 }
 0x4c5   : > { %v6760_v17 = vpop.permute.xlu1 %2738  ;;  %v2806_v55 = vpop.permute.xlu0 %2805 }
 0x4c6   : > { %v2821_v36 = vmul.f32 0.0, %v2806_v55 }
 0x4c9   : > { %v6762_v23 = vpop.permute.xlu1 %2807  ;;  %v6764_v24 = vpop.permute.xlu0 %2809 }
 0x4ca   : > { %v2813_v37 = vsel %vm601_vm3, %v2806_v55, %v6762_v23  ;;  %v2602_v55 = vsel %vm7828_vm0, %v2597_v16, %v6748_v13 }
 0x4cd   : > { %v6766_v59 = vpop.permute.xlu1 %2811  ;;  %v6768_v60 = vpop.permute.xlu0 %2878 }
 0x4d1   : > { %v2877_v61 = vpop.permute.xlu1 %2876  ;;  %v6770_v1 = vpop.permute.xlu0 %2882 }
 0x4d2   : > { %v2884_v41 = vsel %vm675_vm4, %v2877_v61, %v6768_v60 }
 0x4d5   : > { %v6772_v62 = vpop.permute.xlu1 %2880  ;;  %v6774_v8 = vpop.permute.xlu0 %2947 }
 0x4d9   : > { %v6776_v31 = vpop.permute.xlu1 %2949  ;;  %v6778_v14 = vpop.permute.xlu0 %2951 }
 0x4dd   : > { %v6780_v0 = vpop.permute.xlu1 %2953  ;;  %v6794_v39 = vpop.permute.xlu0 %3018 }
 0x4e1   : > { %v6796_v18 = vpop.permute.xlu1 %3020 }
 0x575   : > { %v2493_v63 = vpop.f32.mrb[0].mxu0 }
 0x576   : > { %v2547_v9 = vmul.f32 %v2545_v51, %v2493_v63  ;;  %v2495_v10 = vpop.f32.mrb[1].mxu0  ;;  %v2892_v63 = vmul.f32 0.0, %v2877_v61 }
 0x577   : > { %v2548_v47 = vmul.f32 %v2545_v51, %v2495_v10  ;;  %v2497_v15 = vpop.f32.mrb[2].mxu0  ;;  %v2534_v42 = vpop.f32.mrb[0].mxu1 }
 0x578   : > { %v2557_v58 = vadd.f32 %v6746_v57, %v2547_v9  ;;  %v2549_v20 = vmul.f32 %v2545_v51, %v2534_v42  ;;  %v2498_v27 = vpop.f32.mrb[3].mxu0  ;;  %v2536_v25 = vpop.f32.mrb[1].mxu1 }
 0x579   : > { %v2558_v11 = vadd.f32 %v6746_v57, %v2548_v47  ;;  %v2538_v7 = vpop.f32.mrb[2].mxu1  ;;  %v2550_v26 = vmul.f32 %v2545_v51, %v2536_v25  ;;  %v6815_v10 = vpop.permute.xlu0 %3022 }
 0x57a   : > { %v6785_v29 = vmax.f32 %v2557_v58, 0.0  ;;  %v2559_v30 = vadd.f32 %v6746_v57, %v2549_v20  ;;  %v2539_v50 = vpop.f32.mrb[3].mxu1  ;;  %v6817_v47 = vpop.permute.xlu1 %3024  ;;  %v2672_v58 = vsel %vm7827_vm1, %v6750_v19, %v6752_v49  ;;  %v2673_v20 = vsel %vm7827_vm1, %v6752_v49, %v6754_v52 }
 0x57b   : > { %v6802_v40 = vmax.f32 %v2558_v11, 0.0  ;;  %v2560_v9 = vadd.f32 %v6746_v57, %v2550_v26  ;;  %v2743_v11 = vsel %vm7826_vm2, %v6756_v53, %v6760_v17  ;;  %v2744_v19 = vsel %vm7826_vm2, %v6760_v17, %v6758_v54 }
 0x57c   : > { %v2680_v46 = vmul.f32 %v2671_v32, %v6785_v29  ;;  %v2609_v44 = vmul.f32 %v2600_v22, %v6785_v29  ;;  %v6804_v12 = vmax.f32 %v2559_v30, 0.0  ;;  %v2822_v33 = vmul.f32 %v2813_v37, %v6785_v29  ;;  %v3744_v37 = vld [vmem:[#allocation7 + $0x41] ss:$8 sm:$0xf] }
 0x57d   : > { %v2751_v35 = vmul.f32 %v2742_v38, %v6785_v29  ;;  %v2893_v51 = vmul.f32 %v2884_v41, %v6785_v29  ;;  %v2610_v48 = vmul.f32 %v2601_v21, %v6802_v40  ;;  %v6823_v16 = vmax.f32 %v2560_v9, 0.0  ;;  %v6831_v27 = vpop.permute.xlu0 %3089 }
 0x57e   : > { %v5218_v45 = vpack.i.bf16 %v2680_v46, %v2679_v34  ;;  %v5213_v43 = vpack.i.bf16 %v2609_v44, %v2608_v6  ;;  %v5228_v15 = vpack.i.bf16 %v2822_v33, %v2821_v36  ;;  %v2611_v28 = vmul.f32 %v2602_v55, %v6804_v12  ;;  %v6833_v25 = vpop.permute.xlu1 %3091 }
 0x57f   : > { %v5223_v42 = vpack.i.bf16 %v2751_v35, %v2750_v56  ;;  %v5233_v61 = vpack.i.bf16 %v2893_v51, %v2892_v63  ;;  %v2612_v7 = vmul.f32 %v6748_v13, %v6823_v16  ;;  %v2683_v49 = vmul.f32 %v6754_v52, %v6823_v16  ;;  %v3886_v51 = vld [vmem:[#allocation7 + $0x43] ss:$8 sm:$0xf] }
 0x580   : > { %5219 = vrot.lane.b32.xlu0 %v5218_v45, %s7868_s21  ;;  %5214 = vrot.lane.b32.xlu1 %v5213_v43, %s7852_s10  ;;  %v5238_v57 = vpack.i.bf16 %v2611_v28, %v2610_v48  ;;  %v2681_v22 = vmul.f32 %v2672_v58, %v6802_v40  ;;  %v2682_v30 = vmul.f32 %v2673_v20, %v6804_v12  ;;  %v3815_v45 = vld [vmem:[#allocation7 + $0x42] ss:$8 sm:$0xf]  ;;  %v3957_v58 = vld [vmem:[#allocation7 + $0x44] ss:$8 sm:$0xf] }
 0x581   : > { %v2752_v50 = vmul.f32 %v2743_v11, %v6802_v40  ;;  %v2753_v6 = vmul.f32 %v2744_v19, %v6804_v12  ;;  %v6853_v53 = vpop.permute.xlu0 %3093  ;;  %v2814_v52 = vsel %vm601_vm3, %v6762_v23, %v6764_v24  ;;  %v2815_v32 = vsel %vm601_vm3, %v6764_v24, %v6766_v59 }
 0x582   : > { %v6855_v17 = vpop.permute.xlu1 %3095  ;;  %v5243_v13 = vpack.i.bf16 %v2682_v30, %v2681_v22  ;;  %v2754_v38 = vmul.f32 %v6758_v54, %v6823_v16  ;;  %v2825_v36 = vmul.f32 %v6766_v59, %v6823_v16  ;;  %v2823_v46 = vmul.f32 %v2814_v52, %v6802_v40  ;;  %v4028_v30 = vld [vmem:[#allocation7 + $0x45] ss:$8 sm:$0xf] }
 0x583   : > { %v5248_v34 = vpack.i.bf16 %v2753_v6, %v2752_v50  ;;  %v2824_v44 = vmul.f32 %v2815_v32, %v6804_v12  ;;  %v3749_v24 = vrot.slane %v3744_v37, %v5842_v3  ;;  %v3753_v54 = vrot.slane %v3744_v37, %v5846_v5 }
 0x584   : > { %5229 = vrot.lane.b32.xlu0 %v5228_v15, %s7866_s14  ;;  %5224 = vrot.lane.b32.xlu1 %v5223_v42, %s7867_s15  ;;  %v3757_v59 = vrot.slane %v3744_v37, %v5840_v2  ;;  %v3761_v35 = vrot.slane %v3744_v37, %v5844_v4  ;;  %v3820_v21 = vrot.slane %v3815_v45, %v5842_v3 }
 0x585   : > { %v6871_v23 = vpop.permute.xlu0 %3160  ;;  %v5253_v26 = vpack.i.bf16 %v2824_v44, %v2823_v46  ;;  %v3824_v63 = vrot.slane %v3815_v45, %v5846_v5  ;;  %v3828_v9 = vrot.slane %v3815_v45, %v5840_v2  ;;  %v3832_v15 = vrot.slane %v3815_v45, %v5844_v4  ;;  %v4170_v45 = vld [vmem:[#allocation7 + $0x47] ss:$8 sm:$0xf] }
 0x586   : > { %v6873_v41 = vpop.permute.xlu1 %3162  ;;  %v3891_v42 = vrot.slane %v3886_v51, %v5842_v3  ;;  %v3903_v19 = vrot.slane %v3886_v51, %v5844_v4  ;;  %v3970_v22 = vrot.slane %v3957_v58, %v5840_v2  ;;  %v4037_v37 = vrot.slane %v4028_v30, %v5846_v5 }
 0x587   : > { %v4045_v46 = vrot.slane %v4028_v30, %v5844_v4 }
 0x588   : > { %5234 = vrot.lane.b32.xlu1 %v5233_v61, %s7862_s19  ;;  %5239 = vrot.lane.b32.xlu0 %v5238_v57, %s7852_s10  ;;  %v3895_v61 = vrot.slane %v3886_v51, %v5846_v5  ;;  %v3899_v57 = vrot.slane %v3886_v51, %v5840_v2  ;;  %v4179_v51 = vrot.slane %v4170_v45, %v5846_v5 }
 0x589   : > { %v6882_v43 = vpop.permute.xlu0 %3164 }
 0x58a   : > { %v6884_v33 = vpop.permute.xlu1 %3166 }
 0x58c   : > { %2626 = vrot.lane.b32.xlu1 %v2612_v7, %s7852_s10  ;;  %2697 = vrot.lane.b32.xlu0 %v2683_v49, %s7868_s21  ;;  %v3962_v7 = vrot.slane %v3957_v58, %v5842_v3  ;;  %v3966_v49 = vrot.slane %v3957_v58, %v5846_v5 }
 0x58d   : > { %v6890_v56 = vpop.permute.xlu0 %3231 }
 0x58e   : > { %v6892_v55 = vpop.permute.xlu1 %3233 }
 0x590   : > { %5244 = vrot.lane.b32.xlu1 %v5243_v13, %s7868_s21  ;;  %5249 = vrot.lane.b32.xlu0 %v5248_v34, %s7867_s15  ;;  %v3974_v13 = vrot.slane %v3957_v58, %v5844_v4  ;;  %v4033_v34 = vrot.slane %v4028_v30, %v5842_v3  ;;  %v4187_v58 = vrot.slane %v4170_v45, %v5844_v4 }
 0x591   : > { %v6902_v48 = vpop.permute.xlu0 %3235 }
 0x592   : > { %v6904_v28 = vpop.permute.xlu1 %3237 }
 0x594   : > { %2768 = vrot.lane.b32.xlu1 %v2754_v38, %s7867_s15  ;;  %2839 = vrot.lane.b32.xlu0 %v2825_v36, %s7866_s14  ;;  %v4041_v38 = vrot.slane %v4028_v30, %v5840_v2  ;;  %v4099_v36 = vld [vmem:[#allocation7 + $0x46] ss:$8 sm:$0xf] }
 0x595   : > { %v6910_v20 = vpop.permute.xlu0 %3302  ;;  %v4104_v44 = vrot.slane %v4099_v36, %v5842_v3 }
 0x596   : > { %v6912_v11 = vpop.permute.xlu1 %3304 }
 0x598   : > { %5254 = vrot.lane.b32.xlu1 %v5253_v26, %s7866_s14  ;;  %3762 = vrot.lane.b32.xlu0 %v3749_v24, %s7872_s2 }
 0x599   : > { %v6922_v50 = vpop.permute.xlu0 %3306 }
 0x59a   : > { %7875 = vst [vmem:[#allocation18_spill] sm:$0xff] %v6922_v50  ;;  %v6924_v6 = vpop.permute.xlu1 %3308 }
 0x59c   : > { %3764 = vrot.lane.b32.xlu1 %v3753_v54, %s7872_s2  ;;  %3766 = vrot.lane.b32.xlu0 %v3757_v59, %s7872_s2  ;;  %v4108_v54 = vrot.slane %v4099_v36, %v5846_v5  ;;  %v4112_v59 = vrot.slane %v4099_v36, %v5840_v2 }
 0x59d   : > { %v6930_v52 = vpop.permute.xlu0 %3373 }
 0x59e   : > { %v6932_v32 = vpop.permute.xlu1 %3375 }
 0x59f   : > { %7876 = vst [vmem:[#allocation19_spill] sm:$0xff] %v6932_v32 }
 0x5a0   : > { %3768 = vrot.lane.b32.xlu1 %v3761_v35, %s7872_s2  ;;  %3833 = vrot.lane.b32.xlu0 %v3820_v21, %s7858_s25 }
 0x5a1   : > { %v6942_v24 = vpop.permute.xlu0 %3377 }
 0x5a2   : > { %v6944_v26 = vpop.permute.xlu1 %3379 }
 0x5a4   : > { %3835 = vrot.lane.b32.xlu1 %v3824_v63, %s7858_s25  ;;  %3837 = vrot.lane.b32.xlu0 %v3828_v9, %s7858_s25  ;;  %v4116_v63 = vrot.slane %v4099_v36, %v5844_v4  ;;  %v4175_v9 = vrot.slane %v4170_v45, %v5842_v3 }
 0x5a5   : > { %v6950_v35 = vpop.permute.xlu0 %3444 }
 0x5a6   : > { %7877 = vst [vmem:[#allocation20_spill] sm:$0xff] %v6950_v35  ;;  %v6952_v21 = vpop.permute.xlu1 %3446 }
 0x5a7   : > { %7878 = vst [vmem:[#allocation21_spill] sm:$0xff] %v6952_v21 }
 0x5a8   : > { %3839 = vrot.lane.b32.xlu1 %v3832_v15, %s7858_s25  ;;  %3904 = vrot.lane.b32.xlu0 %v3891_v42, %s7873_s3  ;;  %v4183_v15 = vrot.slane %v4170_v45, %v5840_v2  ;;  %v4241_v42 = vld [vmem:[#allocation7 + $0x60] ss:$8 sm:$0xf] }
 0x5a9   : > { %v4254_v30 = vrot.slane %v4241_v42, %v5840_v2 }
 0x5ac   : > { %3906 = vrot.lane.b32.xlu1 %v3895_v61, %s7873_s3  ;;  %3908 = vrot.lane.b32.xlu0 %v3899_v57, %s7873_s3  ;;  %v6962_v61 = vpop.permute.xlu0 %3448  ;;  %v6964_v57 = vpop.permute.xlu1 %3450 }
 0x5b0   : > { %3910 = vrot.lane.b32.xlu1 %v3903_v19, %s7873_s3  ;;  %3975 = vrot.lane.b32.xlu0 %v3962_v7, %s7874_s7  ;;  %v4246_v19 = vrot.slane %v4241_v42, %v5842_v3  ;;  %v6970_v7 = vpop.permute.xlu0 %3549 }
 0x5b4   : > { %3977 = vrot.lane.b32.xlu1 %v3966_v49, %s7874_s7  ;;  %3979 = vrot.lane.b32.xlu0 %v3970_v22, %s7874_s7  ;;  %v6972_v49 = vpop.permute.xlu1 %3551  ;;  %v4250_v22 = vrot.slane %v4241_v42, %v5846_v5 }
 0x5b8   : > { %3981 = vrot.lane.b32.xlu1 %v3974_v13, %s7874_s7  ;;  %4046 = vrot.lane.b32.xlu0 %v4033_v34, %s7861_s18  ;;  %v4312_v13 = vld [vmem:[#allocation7 + $0x61] ss:$8 sm:$0xf]  ;;  %v4258_v34 = vrot.slane %v4241_v42, %v5844_v4  ;;  %v6984_v36 = vpop.permute.xlu1 %3555 }
 0x5b9   : > { %7879 = vst [vmem:[#allocation22_spill] sm:$0xff] %v6984_v36 }
 0x5bc   : > { %4048 = vrot.lane.b32.xlu1 %v4037_v37, %s7861_s18  ;;  %4050 = vrot.lane.b32.xlu0 %v4041_v38, %s7861_s18  ;;  %v4317_v37 = vrot.slane %v4312_v13, %v5842_v3  ;;  %v6982_v38 = vpop.permute.xlu0 %3553  ;;  %v6992_v45 = vpop.permute.xlu1 %3622 }
 0x5c0   : > { %4052 = vrot.lane.b32.xlu1 %v4045_v46, %s7861_s18  ;;  %4117 = vrot.lane.b32.xlu0 %v4104_v44, %s7862_s19  ;;  %v4321_v46 = vrot.slane %v4312_v13, %v5846_v5  ;;  %v4325_v44 = vrot.slane %v4312_v13, %v5840_v2 }
 0x5c4   : > { %4119 = vrot.lane.b32.xlu1 %v4108_v54, %s7862_s19  ;;  %4121 = vrot.lane.b32.xlu0 %v4112_v59, %s7862_s19  ;;  %v4383_v54 = vld [vmem:[#allocation7 + $0x62] ss:$8 sm:$0xf]  ;;  %v6990_v59 = vpop.permute.xlu0 %3620 }
 0x5c5   : > { %v4392_v42 = vrot.slane %v4383_v54, %v5846_v5 }
 0x5c8   : > { %4123 = vrot.lane.b32.xlu1 %v4116_v63, %s7862_s19  ;;  %4188 = vrot.lane.b32.xlu0 %v4175_v9, %s7866_s14  ;;  %v4329_v63 = vrot.slane %v4312_v13, %v5844_v4  ;;  %v4388_v9 = vrot.slane %v4383_v54, %v5842_v3  ;;  %v2956_v13 = vsel %vm630_vm5, %v6776_v31, %v6778_v14 }
 0x5c9   : > { %v3251_v3 = vmul.f32 %v6904_v28, %v6823_v16 }
 0x5cc   : > { %4190 = vrot.lane.b32.xlu1 %v4179_v51, %s7866_s14  ;;  %4192 = vrot.lane.b32.xlu0 %v4183_v15, %s7866_s14  ;;  %v2885_v51 = vsel %vm675_vm4, %v6768_v60, %v6772_v62  ;;  %v2886_v15 = vsel %vm675_vm4, %v6772_v62, %v6770_v1  ;;  %v2955_v62 = vsel %vm630_vm5, %v6774_v8, %v6776_v31 }
 0x5cd   : > { %v2895_v60 = vmul.f32 %v2886_v15, %v6804_v12 }
 0x5d0   : > { %4194 = vrot.lane.b32.xlu1 %v4187_v58, %s7866_s14  ;;  %4259 = vrot.lane.b32.xlu0 %v4246_v19, %s7867_s15  ;;  %v4396_v58 = vrot.slane %v4383_v54, %v5840_v2  ;;  %v7008_v19 = vpop.permute.xlu0 %3624 }
 0x5d4   : > { %4261 = vrot.lane.b32.xlu1 %v4250_v22, %s7867_s15  ;;  %4263 = vrot.lane.b32.xlu0 %v4254_v30, %s7867_s15  ;;  %v7010_v22 = vpop.permute.xlu1 %3626  ;;  %v2894_v30 = vmul.f32 %v2885_v51, %v6802_v40  ;;  %v3028_v51 = vsel %vm556_vm6, %v6815_v10, %v6817_v47 }
 0x5d5   : > { %7880 = vst [vmem:[#allocation23_spill] sm:$0xff] %v7010_v22 }
 0x5d8   : > { %4265 = vrot.lane.b32.xlu1 %v4258_v34, %s7867_s15  ;;  %4330 = vrot.lane.b32.xlu0 %v4317_v37, %s7868_s21  ;;  %v4400_v34 = vrot.slane %v4383_v54, %v5844_v4  ;;  %v5258_v37 = vpack.i.bf16 %v2895_v60, %v2894_v30  ;;  %v2963_v54 = vmul.f32 0.0, %v6774_v8  ;;  %v3038_v30 = vmul.f32 %v6817_v47, %v6823_v16 }
 0x5d9   : > { %v3099_v60 = vsel %vm482_vm7, %v6853_v53, %v6855_v17 }
 0x5da   : > { %v3108_v8 = vmul.f32 %v3099_v60, %v6804_v12  ;;  %v3241_v60 = vsel %vm7883_vm14, %v6902_v48, %v6904_v28  ;;  %vm7885_vm14 = vmmov %vm7884_vm10 }
 0x5dc   : > { %4332 = vrot.lane.b32.xlu1 %v4321_v46, %s7868_s21  ;;  %4334 = vrot.lane.b32.xlu0 %v4325_v44, %s7868_s21  ;;  %v2964_v46 = vmul.f32 %v2955_v62, %v6785_v29  ;;  %v2965_v44 = vmul.f32 %v2956_v13, %v6802_v40 }
 0x5de   : > { %v5268_v31 = vpack.i.bf16 %v2965_v44, %v2964_v46 }
 0x5e0   : > { %4336 = vrot.lane.b32.xlu1 %v4329_v63, %s7868_s21  ;;  %4401 = vrot.lane.b32.xlu0 %v4388_v9, %s7852_s10  ;;  %v7025_v63 = vpop.permute.xlu0 %3691  ;;  %v7027_v9 = vpop.permute.xlu1 %3693 }
 0x5e4   : > { %4403 = vrot.lane.b32.xlu1 %v4392_v42, %s7852_s10  ;;  %4405 = vrot.lane.b32.xlu0 %v4396_v58, %s7852_s10  ;;  %v7036_v15 = vpop.permute.xlu0 %3695  ;;  %v7038_v42 = vpop.permute.xlu1 %3697  ;;  %v3037_v58 = vmul.f32 %v3028_v51, %v6804_v12  ;;  %v3105_v51 = vmul.f32 0.0, %v6831_v27 }
 0x5e5   : > { %7881 = vst [vmem:[#allocation24_spill] sm:$0xff] %v7038_v42 }
 0x5e8   : > { %4407 = vrot.lane.b32.xlu1 %v4400_v34, %s7852_s10  ;;  %5259 = vrot.lane.b32.xlu0 %v5258_v37, %s7862_s19  ;;  %v5283_v34 = vpack.i.bf16 %v3038_v30, %v3037_v58  ;;  %v3109_v37 = vmul.f32 %v6855_v17, %v6823_v16  ;;  %v3180_v30 = vmul.f32 %v6884_v33, %v6823_v16 }
 0x5ea   : > { %v5293_v47 = vpack.i.bf16 %v3109_v37, %v3108_v8 }
 0x5ec   : > { %5269 = vrot.lane.b32.xlu0 %v5268_v31, %s7861_s18  ;;  %v3170_v31 = vsel %vm408_vm8, %v6882_v43, %v6884_v33 }
 0x5ed   : > { %v3179_v17 = vmul.f32 %v3170_v31, %v6804_v12  ;;  %v3312_v31 = vsel %vm1110_vm11, %v6922_v50, %v6924_v6 }
 0x5ee   : > { %v3321_v28 = vmul.f32 %v3312_v31, %v6804_v12 }
 0x5ef   : > { %v5303_v37 = vpack.i.bf16 %v3180_v30, %v3179_v17  ;;  %v3247_v30 = vmul.f32 0.0, %v6890_v56 }
 0x5f0   : > { %2973 = vrot.lane.b32.xlu0 %v2963_v54, %s7861_s18 }
 0x5f2   : > { %v5220_v62 = vpop.permute.xlu0 %5219  ;;  %v5215_v13 = vpop.permute.xlu1 %5214 }
 0x5f3   : > { %v5222_v5 = vunpack.i.h.bf16 %v5220_v62  ;;  %v5221_v33 = vunpack.i.l.bf16 %v5220_v62  ;;  %v5217_v2 = vunpack.i.h.bf16 %v5215_v13  ;;  %v5216_v4 = vunpack.i.l.bf16 %v5215_v13 }
 0x5f4   : > { %5284 = vrot.lane.b32.xlu0 %v5283_v34, %s7874_s7 }
 0x5f5   : > { %v2699_v35 = vsel %vm482_vm7, %v5221_v33, %v5222_v5  ;;  %v2628_v21 = vsel %vm408_vm8, %v5216_v4, %v5217_v2  ;;  %v3322_v4 = vmul.f32 %v6924_v6, %v6823_v16 }
 0x5f6   : > { %v7051_v46 = vpop.permute.xlu0 %5229  ;;  %v7053_v44 = vpop.permute.xlu1 %5224 }
 0x5f8   : > { %5294 = vrot.lane.b32.xlu0 %v5293_v47, %s7873_s3  ;;  %v3250_v47 = vmul.f32 %v3241_v60, %v6804_v12 }
 0x5fa   : > { %v7060_v54 = vpop.permute.xlu1 %5234  ;;  %v5240_v58 = vpop.permute.xlu0 %5239  ;;  %v5313_v17 = vpack.i.bf16 %v3251_v3, %v3250_v47 }
 0x5fb   : > { %7882 = vst [vmem:[#allocation25_spill] sm:$0xff] %v7060_v54  ;;  %v5242_v42 = vunpack.i.h.bf16 %v5240_v58  ;;  %v5241_v22 = vunpack.i.l.bf16 %v5240_v58 }
 0x5fc   : > { %3115 = vrot.lane.b32.xlu0 %v3105_v51, %s7873_s3 }
 0x5fd   : > { %v2630_v62 = vsel %vm408_vm8, %v5241_v22, %v5242_v42  ;;  %v2629_v13 = vsel %vm408_vm8, %v5217_v2, %v5241_v22  ;;  %v3383_v2 = vsel %vm1184_vm12, %v6942_v24, %v6944_v26  ;;  %v5232_v22 = vunpack.i.h.bf16 %v7051_v46 }
 0x5fe   : > { %v2627_v34 = vpop.permute.xlu1 %2626  ;;  %v2698_v8 = vpop.permute.xlu0 %2697 }
 0x5ff   : > { %v2631_v58 = vsel %vm408_vm8, %v5242_v42, %v2627_v34  ;;  %v5231_v42 = vunpack.i.l.bf16 %v7051_v46  ;;  %v4558_v34 = vpack.c.bf16 %v2699_v35, %v2628_v21  ;;  %v3393_v35 = vmul.f32 %v6944_v26, %v6823_v16 }
 0x600   : > { %5304 = vrot.lane.b32.xlu0 %v5303_v37, %s7858_s25 }
 0x602   : > { %v5245_v51 = vpop.permute.xlu1 %5244  ;;  %v5250_v36 = vpop.permute.xlu0 %5249 }
 0x603   : > { %v5247_v60 = vunpack.i.h.bf16 %v5245_v51  ;;  %v5246_v54 = vunpack.i.l.bf16 %v5245_v51 }
 0x604   : > { %5314 = vrot.lane.b32.xlu0 %v5313_v17, %s7872_s2  ;;  %v5251_v17 = vunpack.i.l.bf16 %v5250_v36 }
 0x605   : > { %v2701_v3 = vsel %vm482_vm7, %v5246_v54, %v5247_v60  ;;  %v2700_v37 = vsel %vm482_vm7, %v5222_v5, %v5246_v54  ;;  %v2702_v47 = vsel %vm482_vm7, %v5247_v60, %v2698_v8  ;;  %v5227_v5 = vunpack.i.h.bf16 %v7053_v44 }
 0x606   : > { %v2769_v51 = vpop.permute.xlu1 %2768  ;;  %v2840_v31 = vpop.permute.xlu0 %2839  ;;  %v4559_v32 = vpack.c.bf16 %v2700_v37, %v2629_v13  ;;  %v4561_v33 = vpack.c.bf16 %v2702_v47, %v2631_v58  ;;  %v4560_v50 = vpack.c.bf16 %v2701_v3, %v2630_v62  ;;  %v5226_v54 = vunpack.i.l.bf16 %v7053_v44 }
 0x607   : > { %v5252_v8 = vunpack.i.h.bf16 %v5250_v36  ;;  %v5323_v62 = vpack.i.bf16 %v3322_v4, %v3321_v28  ;;  %v3392_v13 = vmul.f32 %v3383_v2, %v6804_v12  ;;  %v2841_v44 = vsel %vm630_vm5, %v5231_v42, %v5232_v22 }
 0x608   : > { %3257 = vrot.lane.b32.xlu0 %v3247_v30, %s7872_s2  ;;  %4635 = vmatprep.subr.bf16.mxu0 %v4559_v32  ;;  %v2770_v36 = vsel %vm556_vm6, %v5226_v54, %v5227_v5  ;;  %v3454_v42 = vsel %vm1258_vm15, %v6962_v61, %v6964_v57  ;;  %v3464_v54 = vmul.f32 %v6964_v57, %v6823_v16 }
 0x609   : > { %4676 = vmatprep.subr.bf16.mxu1 %v4561_v33  ;;  %4636 = vmatpush1.bf16.msra.mxu0 %v4558_v34  ;;  %v2772_v32 = vsel %vm556_vm6, %v5251_v17, %v5252_v8  ;;  %v2773_v30 = vsel %vm556_vm6, %v5252_v8, %v2769_v51  ;;  %v5333_v47 = vpack.i.bf16 %v3393_v35, %v3392_v13  ;;  %v3389_v51 = vmul.f32 0.0, %v6930_v52 }
 0x60a   : > { %4677 = vmatpush1.bf16.msra.mxu1 %v4560_v50  ;;  %v5255_v6 = vpop.permute.xlu1 %5254  ;;  %v7097_v60 = vpop.permute.xlu0 %3762  ;;  %v2771_v50 = vsel %vm556_vm6, %v5227_v5, %v5251_v17  ;;  %v4562_v34 = vpack.c.bf16 %v2841_v44, %v2770_v36  ;;  %v3463_v5 = vmul.f32 %v3454_v42, %v6804_v12  ;;  %v3557_v8 = vsel %vm1287_vm9, %v6970_v7, %v6972_v49 }
 0x60b   : > { %v5257_v21 = vunpack.i.h.bf16 %v5255_v6  ;;  %v5256_v46 = vunpack.i.l.bf16 %v5255_v6  ;;  %v3558_v17 = vsel %vm1287_vm9, %v6972_v49, %v6982_v38  ;;  %v3566_v35 = vmul.f32 %v3557_v8, %v6802_v40 }
 0x60c   : > { %5324 = vrot.lane.b32.xlu0 %v5323_v62, %s7871_s1  ;;  %v5343_v13 = vpack.i.bf16 %v3464_v54, %v3463_v5  ;;  %v3628_v57 = vsel %vm7884_vm10, %v6990_v59, %v6992_v45  ;;  %vm7886_vm10 = vcmask 64512   ;;  %v3565_v42 = vmul.f32 %v6970_v7, %v6785_v29 }
 0x60d   : > { %v2843_v28 = vsel %vm630_vm5, %v5256_v46, %v5257_v21  ;;  %v2842_v58 = vsel %vm630_vm5, %v5232_v22, %v5256_v46  ;;  %v2844_v26 = vsel %vm630_vm5, %v5257_v21, %v2840_v31  ;;  %v3567_v21 = vmul.f32 %v3558_v17, %v6804_v12 }
 0x60e   : > { %v3765_v3 = vpop.permute.xlu1 %3764  ;;  %v7111_v37 = vpop.permute.xlu0 %3766  ;;  %v4563_v33 = vpack.c.bf16 %v2842_v58, %v2771_v50  ;;  %v4565_v4 = vpack.c.bf16 %v2844_v26, %v2773_v30  ;;  %v4564_v2 = vpack.c.bf16 %v2843_v28, %v2772_v32  ;;  %v3629_v46 = vsel %vm7885_vm14, %v6992_v45, %v7008_v19  ;;  %vm7887_vm14 = vmmov %vm7886_vm10 }
 0x60f   : > { %v5348_v36 = vpack.i.bf16 %v3567_v21, %v3566_v35  ;;  %v3637_v32 = vmul.f32 %v3628_v57, %v6802_v40  ;;  %v3638_v50 = vmul.f32 %v3629_v46, %v6804_v12  ;;  %v3699_v45 = vsel %vm7886_vm10, %v7025_v63, %v7027_v9  ;;  %vm7889_vm10 = vmmov %vm7888_vm13 }
 0x610   : > { %5334 = vrot.lane.b32.xlu0 %v5333_v47, %s7870_s0  ;;  %4637 = vmatprep.subr.bf16.mxu0 %v4563_v33  ;;  %v3700_v26 = vsel %vm7887_vm14, %v7027_v9, %v7036_v15  ;;  %v3708_v47 = vmul.f32 %v3699_v45, %v6802_v40 }
 0x611   : > { %4678 = vmatprep.subr.bf16.mxu1 %v4565_v4  ;;  %4638 = vmatpush1.bf16.msra.mxu0 %v4562_v34  ;;  %v5358_v58 = vpack.i.bf16 %v3638_v50, %v3637_v32  ;;  %v3709_v33 = vmul.f32 %v3700_v26, %v6804_v12  ;;  %v3770_v34 = vsel %vm7888_vm13, %v7097_v60, %v3765_v3  ;;  %vm7890_vm13 = vcmask 973824  }
 0x612   : > { %4679 = vmatpush1.bf16.msra.mxu1 %v4564_v2  ;;  %v7118_v31 = vpop.permute.xlu1 %3768  ;;  %v7120_v22 = vpop.permute.xlu0 %3833  ;;  %v3779_v17 = vmul.f32 %v3770_v34, %v6802_v40  ;;  %v3707_v26 = vmul.f32 %v7025_v63, %v6785_v29  ;;  %vm7891_vm14 = vmmov %vm7890_vm13 }
 0x613   : > { %v5368_v8 = vpack.i.bf16 %v3709_v33, %v3708_v47 }
 0x614   : > { %3399 = vrot.lane.b32.xlu0 %v3389_v51, %s7870_s0  ;;  %v3771_v51 = vsel %vm7889_vm10, %v3765_v3, %v7111_v37  ;;  %vm7899_vm10 = vcmask 56320  }
 0x615   : > { %v3780_v7 = vmul.f32 %v3771_v51, %v6804_v12 }
 0x616   : > { %v3836_v6 = vpop.permute.xlu1 %3835  ;;  %v7132_v62 = vpop.permute.xlu0 %3837 }
 0x617   : > { %v5378_v3 = vpack.i.bf16 %v3780_v7, %v3779_v17  ;;  %v3842_v32 = vsel %vm7828_vm0, %v3836_v6, %v7132_v62 }
 0x618   : > { %5344 = vrot.lane.b32.xlu0 %v5343_v13, %s7869_s13  ;;  %v3851_v33 = vmul.f32 %v3842_v32, %v6804_v12 }
 0x61a   : > { %v7143_v49 = vpop.permute.xlu1 %3839  ;;  %v7145_v44 = vpop.permute.xlu0 %3904 }
 0x61c   : > { %5349 = vrot.lane.b32.xlu0 %v5348_v36, %s7853_s22  ;;  %v3841_v36 = vsel %vm7828_vm0, %v7120_v22, %v3836_v6 }
 0x61d   : > { %v3850_v47 = vmul.f32 %v3841_v36, %v6802_v40 }
 0x61e   : > { %v3907_v30 = vpop.permute.xlu1 %3906  ;;  %v3909_v28 = vpop.permute.xlu0 %3908 }
 0x61f   : > { %v3912_v34 = vsel %vm7827_vm1, %v7145_v44, %v3907_v30  ;;  %v3913_v51 = vsel %vm7827_vm1, %v3907_v30, %v3909_v28  ;;  %v2957_v30 = vsel %vm630_vm5, %v6778_v14, %v6780_v0  ;;  %v3026_v14 = vsel %vm556_vm6, %v6794_v39, %v6796_v18 }
 0x620   : > { %5359 = vrot.lane.b32.xlu0 %v5358_v58, %s7854_s26  ;;  %v3922_v63 = vmul.f32 %v3913_v51, %v6804_v12  ;;  %v2896_v51 = vmul.f32 %v6770_v1, %v6823_v16  ;;  %v3849_v1 = vmul.f32 %v7120_v22, %v6785_v29 }
 0x622   : > { %v3911_v4 = vpop.permute.xlu1 %3910  ;;  %v7159_v2 = vpop.permute.xlu0 %3975 }
 0x623   : > { %v3914_v9 = vsel %vm7827_vm1, %v3909_v28, %v3911_v4  ;;  %v7168_v5 = vmul.f32 0.0, %v3911_v4 }
 0x624   : > { %v7171_v54 = vmul.f32 %v3914_v9, %v6823_v16  ;;  %3575 = vrot.lane.b32.xlu0 %v3565_v42, %s7853_s22  ;;  %v5388_v9 = vpack.i.bf16 %v3851_v33, %v3850_v47 }
 0x626   : > { %v5403_v13 = vpack.i.bf16 %v7168_v5, %v7171_v54  ;;  %v3978_v35 = vpop.permute.xlu1 %3977  ;;  %v3980_v21 = vpop.permute.xlu0 %3979 }
 0x627   : > { %v3983_v47 = vsel %vm7826_vm2, %v7159_v2, %v3978_v35  ;;  %v3984_v33 = vsel %vm7826_vm2, %v3978_v35, %v3980_v21  ;;  %v2967_v35 = vmul.f32 %v6780_v0, %v6823_v16 }
 0x628   : > { %5369 = vrot.lane.b32.xlu0 %v5368_v8, %s7855_s17  ;;  %v3921_v8 = vmul.f32 %v3912_v34, %v6802_v40 }
 0x62a   : > { %v3982_v57 = vpop.permute.xlu1 %3981  ;;  %v7179_v46 = vpop.permute.xlu0 %4046  ;;  %v5398_v28 = vpack.i.bf16 %v3922_v63, %v3921_v8  ;;  %v3027_v8 = vsel %vm556_vm6, %v6796_v18, %v6815_v10  ;;  %v2966_v63 = vmul.f32 %v2957_v30, %v6804_v12  ;;  %v3035_v30 = vmul.f32 %v3026_v14, %v6785_v29 }
 0x62b   : > { %v3985_v50 = vsel %vm7826_vm2, %v3980_v21, %v3982_v57  ;;  %v7186_v58 = vmul.f32 0.0, %v3982_v57  ;;  %v3992_v21 = vmul.f32 %v3983_v47, %v6802_v40  ;;  %v3036_v47 = vmul.f32 %v3027_v8, %v6802_v40 }
 0x62c   : > { %v7189_v45 = vmul.f32 %v3985_v50, %v6823_v16  ;;  %5379 = vrot.lane.b32.xlu0 %v5378_v3, %s7856_s11  ;;  %v4062_v5 = vmul.f32 %v7179_v46, %v6785_v29 }
 0x62e   : > { %v5413_v4 = vpack.i.bf16 %v7186_v58, %v7189_v45  ;;  %v4049_v6 = vpop.permute.xlu1 %4048  ;;  %v4051_v42 = vpop.permute.xlu0 %4050 }
 0x62f   : > { %v4054_v32 = vsel %vm601_vm3, %v7179_v46, %v4049_v6  ;;  %v4055_v18 = vsel %vm601_vm3, %v4049_v6, %v4051_v42 }
 0x630   : > { %3717 = vrot.lane.b32.xlu0 %v3707_v26, %s7855_s17  ;;  %v4064_v6 = vmul.f32 %v4055_v18, %v6804_v12 }
 0x632   : > { %v4053_v17 = vpop.permute.xlu1 %4052  ;;  %v4118_v7 = vpop.permute.xlu0 %4117 }
 0x633   : > { %v4056_v3 = vsel %vm601_vm3, %v4051_v42, %v4053_v17  ;;  %v7205_v57 = vmul.f32 0.0, %v4053_v17  ;;  %v3993_v17 = vmul.f32 %v3984_v33, %v6804_v12  ;;  %v7243_v10 = vmul.f32 %v4118_v7, %v6785_v29 }
 0x634   : > { %v7208_v36 = vmul.f32 %v4056_v3, %v6823_v16  ;;  %5389 = vrot.lane.b32.xlu0 %v5388_v9, %s7852_s10 }
 0x635   : > { %v5408_v33 = vpack.i.bf16 %v3993_v17, %v3992_v21  ;;  %v5278_v21 = vpack.i.bf16 %v3036_v47, %v3035_v30  ;;  %v3169_v30 = vsel %vm408_vm8, %v6873_v41, %v6882_v43  ;;  %v3991_v47 = vmul.f32 %v7159_v2, %v6785_v29 }
 0x636   : > { %v4120_v50 = vpop.permute.xlu1 %4119  ;;  %v4122_v26 = vpop.permute.xlu0 %4121  ;;  %v3034_v2 = vmul.f32 0.0, %v6794_v39  ;;  %v3240_v39 = vsel %vm7891_vm14, %v6892_v55, %v6902_v48  ;;  %vm7902_vm14 = vcmask 72704  }
 0x637   : > { %v4125_v34 = vsel %vm675_vm4, %v4118_v7, %v4120_v50 }
 0x638   : > { %v4134_v9 = vmul.f32 %v4125_v34, %v6802_v40  ;;  %5399 = vrot.lane.b32.xlu0 %v5398_v28, %s7868_s21 }
 0x63a   : > { %v5263_v3 = vpack.i.bf16 %v4134_v9, %v2896_v51  ;;  %v4124_v28 = vpop.permute.xlu1 %4123  ;;  %v7237_v34 = vpop.permute.xlu0 %4188  ;;  %v4063_v51 = vmul.f32 %v4054_v32, %v6802_v40  ;;  %v5273_v9 = vpack.i.bf16 %v2967_v35, %v2966_v63 }
 0x63b   : > { %v7245_v0 = vmul.f32 0.0, %v4124_v28  ;;  %v4127_v35 = vsel %vm675_vm4, %v4122_v26, %v4124_v28  ;;  %v4126_v28 = vsel %vm675_vm4, %v4120_v50, %v4122_v26 }
 0x63c   : > { %3859 = vrot.lane.b32.xlu0 %v3849_v1, %s7852_s10  ;;  %5264 = vrot.lane.b32.xlu1 %v5263_v3, %s7862_s19  ;;  %v3097_v1 = vsel %vm482_vm7, %v6831_v27, %v6833_v25  ;;  %v3098_v3 = vsel %vm482_vm7, %v6833_v25, %v6853_v53  ;;  %v5418_v14 = vpack.i.bf16 %v4064_v6, %v4063_v51 }
 0x63d   : > { %v5433_v22 = vpack.i.bf16 %v7243_v10, %v7245_v0  ;;  %v3106_v17 = vmul.f32 %v3097_v1, %v6785_v29  ;;  %v3107_v63 = vmul.f32 %v3098_v3, %v6802_v40  ;;  %v3168_v53 = vsel %vm408_vm8, %v6871_v23, %v6873_v41 }
 0x63e   : > { %v4191_v42 = vpop.permute.xlu1 %4190  ;;  %v4193_v7 = vpop.permute.xlu0 %4192  ;;  %v4135_v50 = vmul.f32 %v4126_v28, %v6804_v12 }
 0x63f   : > { %v5288_v1 = vpack.i.bf16 %v3107_v63, %v3106_v17  ;;  %v4196_v3 = vsel %vm630_vm5, %v7237_v34, %v4191_v42 }
 0x640   : > { %5409 = vrot.lane.b32.xlu0 %v5408_v33, %s7867_s15  ;;  %5274 = vrot.lane.b32.xlu1 %v5273_v9, %s7861_s18  ;;  %v4136_v33 = vmul.f32 %v4127_v35, %v6823_v16  ;;  %v4205_v63 = vmul.f32 %v4196_v3, %v6802_v40 }
 0x642   : > { %v4195_v8 = vpop.permute.xlu1 %4194  ;;  %v7263_v32 = vpop.permute.xlu0 %4259  ;;  %v5428_v17 = vpack.i.bf16 %v4136_v33, %v4135_v50 }
 0x643   : > { %v4198_v27 = vsel %vm630_vm5, %v4193_v7, %v4195_v8  ;;  %v7269_v18 = vmul.f32 0.0, %v4195_v8  ;;  %v4275_v58 = vmul.f32 %v7263_v32, %v6785_v29 }
 0x644   : > { %v7272_v25 = vmul.f32 %v4198_v27, %v6823_v16  ;;  %5419 = vrot.lane.b32.xlu0 %v5418_v14, %s7866_s14  ;;  %5279 = vrot.lane.b32.xlu1 %v5278_v21, %s7874_s7  ;;  %v4197_v14 = vsel %vm630_vm5, %v4191_v42, %v4193_v7  ;;  %v3239_v42 = vsel %vm7890_vm13, %v6890_v56, %v6892_v55  ;;  %vm7901_vm13 = vcmask 64512  }
 0x645   : > { %v3177_v7 = vmul.f32 %v3168_v53, %v6785_v29  ;;  %v3178_v21 = vmul.f32 %v3169_v30, %v6802_v40  ;;  %v4206_v35 = vmul.f32 %v4197_v14, %v6804_v12  ;;  %v3248_v56 = vmul.f32 %v3239_v42, %v6785_v29 }
 0x646   : > { %v5443_v51 = vpack.i.bf16 %v7269_v18, %v7272_v25  ;;  %v4262_v6 = vpop.permute.xlu1 %4261  ;;  %v4264_v9 = vpop.permute.xlu0 %4263  ;;  %v3249_v55 = vmul.f32 %v3240_v39, %v6802_v40 }
 0x647   : > { %v4267_v41 = vsel %vm556_vm6, %v7263_v32, %v4262_v6  ;;  %v4268_v43 = vsel %vm556_vm6, %v4262_v6, %v4264_v9  ;;  %v5438_v48 = vpack.i.bf16 %v4206_v35, %v4205_v63  ;;  %v5298_v33 = vpack.i.bf16 %v3178_v21, %v3177_v7 }
 0x648   : > { %v7297_v26 = vmul.f32 %v4267_v41, %v6802_v40  ;;  %v7300_v8 = vmul.f32 %v4268_v43, %v6804_v12  ;;  %4001 = vrot.lane.b32.xlu0 %v3991_v47, %s7867_s15  ;;  %5289 = vrot.lane.b32.xlu1 %v5288_v1, %s7873_s3  ;;  %v3310_v43 = vsel %vm1110_vm11, %v6910_v20, %v6912_v11 }
 0x64a   : > { %v5448_v27 = vpack.i.bf16 %v7300_v8, %v7297_v26  ;;  %v4266_v28 = vpop.permute.xlu1 %4265  ;;  %v4331_v47 = vpop.permute.xlu0 %4330 }
 0x64b   : > { %v4269_v6 = vsel %vm556_vm6, %v4264_v9, %v4266_v28  ;;  %v4204_v9 = vmul.f32 %v7237_v34, %v6785_v29  ;;  %v4279_v42 = vmul.f32 0.0, %v4266_v28  ;;  %v3176_v34 = vmul.f32 0.0, %v6871_v23 }
 0x64c   : > { %3044 = vrot.lane.b32.xlu1 %v3034_v2, %s7874_s7  ;;  %5429 = vrot.lane.b32.xlu0 %v5428_v17, %s7862_s19  ;;  %v5308_v2 = vpack.i.bf16 %v3249_v55, %v3248_v56  ;;  %v4278_v50 = vmul.f32 %v4269_v6, %v6823_v16  ;;  %v7892_v17 = vld [vmem:[#allocation18_spill] sm:$0xff]  ;;  %v7893_v56 = vld [vmem:[#allocation19_spill] sm:$0xff]  ;;  %v3319_v55 = vmul.f32 %v3310_v43, %v6785_v29 }
 0x64d   : > { %v3311_v63 = vsel %vm1110_vm11, %v6912_v11, %v7892_v17  ;;  %v3381_v28 = vsel %vm1184_vm12, %v6930_v52, %v7893_v56 }
 0x64e   : > { %v4333_v53 = vpop.permute.xlu1 %4332  ;;  %v4335_v30 = vpop.permute.xlu0 %4334  ;;  %v3390_v43 = vmul.f32 %v3381_v28, %v6785_v29 }
 0x64f   : > { %v4338_v1 = vsel %vm482_vm7, %v4331_v47, %v4333_v53  ;;  %v4339_v3 = vsel %vm482_vm7, %v4333_v53, %v4335_v30 }
 0x650   : > { %v7324_v14 = vmul.f32 %v4338_v1, %v6802_v40  ;;  %v7327_v41 = vmul.f32 %v4339_v3, %v6804_v12  ;;  %5299 = vrot.lane.b32.xlu1 %v5298_v33, %s7858_s25  ;;  %5439 = vrot.lane.b32.xlu0 %v5438_v48, %s7861_s18  ;;  %v5453_v48 = vpack.i.bf16 %v4279_v42, %v4278_v50 }
 0x651   : > { %v3382_v1 = vsel %vm1184_vm12, %v7893_v56, %v6942_v24 }
 0x652   : > { %v5458_v39 = vpack.i.bf16 %v7327_v41, %v7324_v14  ;;  %v4337_v7 = vpop.permute.xlu1 %4336  ;;  %v4402_v21 = vpop.permute.xlu0 %4401 }
 0x653   : > { %v4340_v35 = vsel %vm482_vm7, %v4335_v30, %v4337_v7  ;;  %v4350_v33 = vmul.f32 0.0, %v4337_v7  ;;  %v3320_v30 = vmul.f32 %v3311_v63, %v6802_v40  ;;  %v7357_v3 = vmul.f32 %v4402_v21, %v6785_v29 }
 0x654   : > { %5309 = vrot.lane.b32.xlu1 %v5308_v2, %s7872_s2  ;;  %4214 = vrot.lane.b32.xlu0 %v4204_v9, %s7861_s18  ;;  %v4349_v53 = vmul.f32 %v4340_v35, %v6823_v16  ;;  %v3391_v7 = vmul.f32 %v3382_v1, %v6802_v40  ;;  %v7894_v35 = vld [vmem:[#allocation21_spill] sm:$0xff] }
 0x655   : > { %v5318_v42 = vpack.i.bf16 %v3320_v30, %v3319_v55 }
 0x656   : > { %v4404_v6 = vpop.permute.xlu1 %4403  ;;  %v4406_v11 = vpop.permute.xlu0 %4405  ;;  %v5463_v2 = vpack.i.bf16 %v4350_v33, %v4349_v53  ;;  %v4346_v53 = vmul.f32 %v4331_v47, %v6785_v29  ;;  %v5328_v1 = vpack.i.bf16 %v3391_v7, %v3390_v43 }
 0x657   : > { %v4409_v23 = vsel %vm408_vm8, %v4402_v21, %v4404_v6  ;;  %v4410_v28 = vsel %vm408_vm8, %v4404_v6, %v4406_v11 }
 0x658   : > { %v7360_v52 = vmul.f32 %v4409_v23, %v6802_v40  ;;  %3186 = vrot.lane.b32.xlu1 %v3176_v34, %s7858_s25  ;;  %5454 = vrot.lane.b32.xlu0 %v5453_v48, %s7874_s7  ;;  %v7895_v34 = vld [vmem:[#allocation20_spill] sm:$0xff]  ;;  %v3453_v48 = vsel %vm1258_vm15, %v7894_v35, %v6962_v61  ;;  %v7896_v23 = vld [vmem:[#allocation25_spill] sm:$0xff]  ;;  %v3318_v61 = vmul.f32 0.0, %v6910_v20  ;;  %v4717_v20 = vld [vmem:[%s7763_s5] sm:$0xff] }
 0x659   : > { %v3452_v56 = vsel %vm1258_vm15, %v7895_v34, %v7894_v35  ;;  %v5236_v6 = vunpack.i.l.bf16 %v7896_v23  ;;  %v3462_v9 = vmul.f32 %v3453_v48, %v6802_v40  ;;  %v3460_v48 = vmul.f32 0.0, %v7895_v34 }
 0x65a   : > { %v7367_v50 = vpop.permute.xlu1 %4407  ;;  %v7369_v24 = vpop.permute.xlu0 %5259  ;;  %v7906_v8 = vpack.i.bf16 %v7360_v52, %v7357_v3 }
 0x65b   : > { %v4411_v21 = vsel %vm408_vm8, %v4406_v11, %v7367_v50  ;;  %v7825_v17 = vunpack.i.h.bf16 %v7369_v24  ;;  %v5261_v63 = vunpack.i.l.bf16 %v7369_v24  ;;  %v7907_v14 = vunpack.i.h.bf16 %v7369_v24 }
 0x65c   : > { %5319 = vrot.lane.b32.xlu1 %v5318_v42, %s7871_s1  ;;  %5464 = vrot.lane.b32.xlu0 %v5463_v2, %s7873_s3  ;;  %v4420_v33 = vmul.f32 %v4411_v21, %v6823_v16  ;;  %v5237_v2 = vunpack.i.h.bf16 %v7896_v23  ;;  %v3461_v23 = vmul.f32 %v3452_v56, %v6785_v29 }
 0x65d   : > { %v7385_v55 = vsel %vm675_vm4, %v5261_v63, %v7825_v17  ;;  %v4419_v17 = vmul.f32 %v4410_v28, %v6804_v12 }
 0x65e   : > { %v7392_v30 = vpop.permute.xlu0 %5269  ;;  %v2913_v47 = vsel %vm675_vm4, %v5237_v2, %v5261_v63  ;;  %v2912_v28 = vsel %vm675_vm4, %v5236_v6, %v5237_v2  ;;  %v7897_v63 = vld [vmem:[#allocation22_spill] sm:$0xff]  ;;  %v7898_v6 = vld [vmem:[#allocation23_spill] sm:$0xff] }
 0x65f   : > { %v5272_v11 = vunpack.i.h.bf16 %v7392_v30  ;;  %v5271_v42 = vunpack.i.l.bf16 %v7392_v30  ;;  %v5473_v7 = vpack.i.bf16 %v4420_v33, %v4419_v17  ;;  %v5338_v17 = vpack.i.bf16 %v3462_v9, %v3461_v23 }
 0x660   : > { %5329 = vrot.lane.b32.xlu1 %v5328_v1, %s7870_s0  ;;  %4356 = vrot.lane.b32.xlu0 %v4346_v53, %s7873_s3  ;;  %v3559_v56 = vsel %vm1287_vm9, %v6982_v38, %v7897_v63  ;;  %v3569_v33 = vmul.f32 0.0, %v7897_v63  ;;  %v3640_v9 = vmul.f32 0.0, %v7898_v6  ;;  %v3772_v23 = vsel %vm7902_vm14, %v7111_v37, %v7118_v31 }
 0x661   : > { %v2984_v43 = vsel %vm601_vm3, %v5271_v42, %v5272_v11  ;;  %v3568_v2 = vmul.f32 %v3559_v56, %v6823_v16  ;;  %v3778_v37 = vmul.f32 %v7097_v60, %v6785_v29  ;;  %v3853_v63 = vmul.f32 0.0, %v7143_v49 }
 0x662   : > { %v2974_v21 = vpop.permute.xlu0 %2973  ;;  %v4567_v35 = vpack.c.bf16 %v2984_v43, %v2913_v47  ;;  %v7900_v43 = vld [vmem:[#allocation24_spill] sm:$0xff]  ;;  %v3920_v60 = vmul.f32 %v7145_v44, %v6785_v29 }
 0x663   : > { %v2983_v1 = vsel %vm601_vm3, %v2974_v21, %v5271_v42  ;;  %v3630_v42 = vsel %vm7899_vm10, %v7008_v19, %v7898_v6  ;;  %v3701_v34 = vsel %vm7901_vm13, %v7036_v15, %v7900_v43  ;;  %v3711_v19 = vmul.f32 0.0, %v7900_v43 }
 0x664   : > { %v4566_v53 = vpack.c.bf16 %v2983_v1, %v2912_v28  ;;  %3328 = vrot.lane.b32.xlu1 %v3318_v61, %s7871_s1  ;;  %5474 = vrot.lane.b32.xlu0 %v5473_v7, %s7858_s25  ;;  %v5353_v61 = vpack.i.bf16 %v3569_v33, %v3568_v2  ;;  %v3639_v38 = vmul.f32 %v3630_v42, %v6823_v16  ;;  %v3782_v1 = vmul.f32 0.0, %v7118_v31 }
 0x665   : > { %4639 = vmatprep.subr.bf16.mxu0 %v4567_v35  ;;  %v3710_v7 = vmul.f32 %v3701_v34, %v6823_v16  ;;  %v3636_v35 = vmul.f32 %v6990_v59, %v6785_v29  ;;  %v3781_v15 = vmul.f32 %v3772_v23, %v6823_v16  ;;  %v3843_v59 = vsel %vm7828_vm0, %v7132_v62, %v7143_v49 }
 0x666   : > { %4640 = vmatpush1.bf16.msra.mxu0 %v4566_v53  ;;  %v5363_v47 = vpack.i.bf16 %v3640_v9, %v3639_v38  ;;  %v7435_v21 = vpop.permute.xlu0 %5284  ;;  %v7903_v33 = vpack.i.bf16 %v7205_v57, %v7208_v36  ;;  %vm7904_vm10 = vcmask 719872   ;;  %v4421_v6 = vmul.f32 0.0, %v7367_v50  ;;  %v4727_v50 = vld [vmem:[%s7764_s6] sm:$0xff] }
 0x667   : > { %v5373_v28 = vpack.i.bf16 %v3711_v19, %v3710_v7  ;;  %vm7905_vm13 = vmmov %vm7904_vm10  ;;  %v5287_v18 = vunpack.i.h.bf16 %v7435_v21  ;;  %v5286_v25 = vunpack.i.l.bf16 %v7435_v21 }
 0x668   : > { %5339 = vrot.lane.b32.xlu1 %v5338_v17, %s7869_s13  ;;  %4720 = vperm.xlu0 %5211, %v4717_v20   ;;  %v5383_v20 = vpack.i.bf16 %v3782_v1, %v3781_v15  ;;  %v3852_v17 = vmul.f32 %v3843_v59, %v6823_v16 }
 0x669   : > { %v3057_v3 = vsel %vm7826_vm2, %v5286_v25, %v5287_v18 }
 0x66a   : > { %v7445_v53 = vpop.permute.xlu0 %5294  ;;  %v5393_v31 = vpack.i.bf16 %v3853_v63, %v3852_v17 }
 0x66b   : > { %v5297_v36 = vunpack.i.h.bf16 %v7445_v53  ;;  %v5296_v10 = vunpack.i.l.bf16 %v7445_v53 }
 0x66c   : > { %3470 = vrot.lane.b32.xlu1 %v3460_v48, %s7869_s13  ;;  %s7943_s13 = sshll.u32 %s5824_s20, 5 }
 0x66d   : > { %v3128_v2 = vsel %vm7827_vm1, %v5296_v10, %v5297_v36 }
 0x66e   : > { %v7456_v56 = vpop.permute.xlu0 %3115  ;;  %v4573_v24 = vpack.c.bf16 %v3128_v2, %v3057_v3 }
 0x670   : > { %5354 = vrot.lane.b32.xlu1 %v5353_v61, %s7853_s22 }
 0x672   : > { %v7459_v48 = vpop.permute.xlu0 %5304 }
 0x673   : > { %v5306_v43 = vunpack.i.l.bf16 %v7459_v48 }
 0x674   : > { %5364 = vrot.lane.b32.xlu1 %v5363_v47, %s7854_s26 }
 0x676   : > { %v7468_v62 = vpop.permute.xlu0 %5314 }
 0x677   : > { %v5317_v52 = vunpack.i.h.bf16 %v7468_v62  ;;  %v5316_v30 = vunpack.i.l.bf16 %v7468_v62 }
 0x678   : > { %3646 = vrot.lane.b32.xlu1 %v3636_v35, %s7854_s26 }
 0x679   : > { %v3270_v21 = vsel %vm7902_vm14, %v5316_v30, %v5317_v52 }
 0x67a   : > { %v7471_v49 = vpop.permute.xlu0 %3257 }
 0x67c   : > { %5374 = vrot.lane.b32.xlu1 %v5373_v28, %s7855_s17 }
 0x67e   : > { %v7483_v44 = vpop.permute.xlu0 %5324 }
 0x67f   : > { %v5327_v36 = vunpack.i.h.bf16 %v7483_v44 }
 0x680   : > { %5384 = vrot.lane.b32.xlu1 %v5383_v20, %s7856_s11 }
 0x682   : > { %v7486_v54 = vpop.permute.xlu0 %5334 }
 0x683   : > { %v5337_v62 = vunpack.i.h.bf16 %v7486_v54 }
 0x684   : > { %3788 = vrot.lane.b32.xlu1 %v3778_v37, %s7856_s11  ;;  %s4873_s11 = sshll.u32 %s5709_s9, 9  ;;  %s4750_s9 = scalar_lea.sflag [#allocation6], %s5824_s20 }
 0x688   : > { %5394 = vrot.lane.b32.xlu1 %v5393_v31, %s7852_s10 }
 0x68c   : > { %5404 = vrot.lane.b32.xlu1 %v5403_v13, %s7868_s21  ;;  %v7496_v13 = vpop.permute.xlu0 %3399 }
 0x690   : > { %3930 = vrot.lane.b32.xlu1 %v3920_v60, %s7868_s21  ;;  %v7502_v46 = vpop.permute.xlu0 %5344  ;;  %s336_s21 = scalar_lea.vmem [#allocation9], %s7943_s13 }
 0x691   : > { %v5347_v3 = vunpack.i.h.bf16 %v7502_v46  ;;  %v5346_v52 = vunpack.i.l.bf16 %v7502_v46  ;;  %s4764_s17 = sshll.u32 %s336_s21, 4  ;;  %s7716_s17 = int_to_ptr.vmem [resolvable:$true] %s4764_s17 }
 0x694   : > { %5414 = vrot.lane.b32.xlu1 %v5413_v4, %s7867_s15  ;;  %v7515_v4 = vld [vmem:[%s7762_s4] sm:$0xff] }
 0x695   : > { %v4862_v57 = vcombine.high %v7515_v4, %v7515_v4 }
 0x697   : > { %4864 = vmatprep.mubr.msk.bf16.mxu0 %vm7904_vm10, %v4862_v57  ;;  %4866 = vmatprep.mubr.msk.bf16.mxu1 %vm7905_vm13, %v4862_v57  ;;  %vm7908_vm10 = vcmask 56320   ;;  %vm7909_vm13 = vmmov %vm7902_vm14 }
 0x698   : > { %5424 = vrot.lane.b32.xlu1 %v7903_v33, %s7866_s14  ;;  %v5336_v33 = vunpack.i.l.bf16 %v7486_v54  ;;  %vm7910_vm14 = vmmov %vm7909_vm13 }
 0x69a   : > { %v3412_v18 = vsel %vm7908_vm10, %v5336_v33, %v5337_v62 }
 0x69c   : > { %4072 = vrot.lane.b32.xlu1 %v4062_v5, %s7866_s14 }
 0x6a0   : > { %5434 = vrot.lane.b32.xlu1 %v5433_v22, %s7862_s19  ;;  %v7525_v22 = vpop.permute.xlu0 %5349 }
 0x6a4   : > { %5444 = vrot.lane.b32.xlu1 %v5443_v51, %s7861_s18  ;;  %s5548_s18 = scalar_lea.vmem %s7716_s17, 512 }
 0x6a5   : > { %p5549_p4 = scmp.ne.s32.totalorder %s7716_s17, %s5548_s18 }
 0x6a7   : > { %p5550_p6 = pnand %p5549_p4, %p5779_p12 }
 0x6a8   : > { %5449 = vrot.lane.b32.xlu1 %v5448_v27, %s7874_s7 }
 0x6a9   : > { %p5551_p8 = pneg %p5550_p6 }
 0x6ac   : > { %5459 = vrot.lane.b32.xlu1 %v5458_v39, %s7873_s3 }
 0x6ae   : > { %v7510_v45 = vpop.permute.xlu1 %5264 }
 0x6af   : > { %v5266_v0 = vunpack.i.l.bf16 %v7510_v45 }
 0x6b0   : > { %4285 = vrot.lane.b32.xlu1 %v4275_v58, %s7874_s7 }
 0x6b1   : > { %v2915_v41 = vsel %vm675_vm4, %v7907_v14, %v5266_v0 }
 0x6b2   : > { %v5275_v32 = vpop.permute.xlu1 %5274 }
 0x6b3   : > { %v5277_v51 = vunpack.i.h.bf16 %v5275_v32  ;;  %v5276_v26 = vunpack.i.l.bf16 %v5275_v32 }
 0x6b4   : > { %5469 = vrot.lane.b32.xlu1 %v7906_v8, %s7858_s25 }
 0x6b5   : > { %v2985_v27 = vsel %vm601_vm3, %v5272_v11, %v5276_v26  ;;  %v2986_v39 = vsel %vm601_vm3, %v5276_v26, %v5277_v51  ;;  %v7546_v11 = vpop.permute.xlu0 %5359 }
 0x6b6   : > { %v4568_v42 = vpack.c.bf16 %v2985_v27, %v7385_v55  ;;  %v5280_v9 = vpop.permute.xlu1 %5279  ;;  %v4569_v61 = vpack.c.bf16 %v2986_v39, %v2915_v41  ;;  %v5307_v55 = vunpack.i.h.bf16 %v7459_v48  ;;  %v5361_v62 = vunpack.i.l.bf16 %v7546_v11 }
 0x6b7   : > { %v5282_v38 = vunpack.i.h.bf16 %v5280_v9  ;;  %v5281_v47 = vunpack.i.l.bf16 %v5280_v9 }
 0x6b8   : > { %4435 = vrot.lane.b32.xlu1 %v4421_v6, %s7858_s25  ;;  %4680 = vmatprep.subr.bf16.mxu1 %v4569_v61  ;;  %v3199_v37 = vsel %vm7828_vm0, %v5306_v43, %v5307_v55  ;;  %v3496_v61 = vld [vmem:[#allocation7 + $0x25] ss:$8 sm:$0xf]  ;;  %s7714_s25 = scalar_lea.hbm %s7766_s8, %s4873_s11 }
 0x6b9   : > { %4681 = vmatpush1.bf16.msra.mxu1 %v4568_v42  ;;  %v3056_v35 = vsel %vm7826_vm2, %v5282_v38, %v5286_v25  ;;  %v3055_v28 = vsel %vm7826_vm2, %v5281_v47, %v5282_v38  ;;  %v7559_v1 = vpop.permute.xlu0 %3575  ;;  %v4577_v31 = vpack.c.bf16 %v3270_v21, %v3199_v37 }
 0x6ba   : > { %v5290_v34 = vpop.permute.xlu1 %5289  ;;  %4682 = vmatprep.subr.bf16.mxu1 %v4573_v24  ;;  %v7913_v24 = vld [vmem:[#allocation16_spill] sm:$0xff] }
 0x6bb   : > { %v5292_v7 = vunpack.i.h.bf16 %v5290_v34  ;;  %v5291_v19 = vunpack.i.l.bf16 %v5290_v34  ;;  %v3513_v38 = vrot.slane %v3496_v61, %v7913_v24  ;;  %v3483_v34 = vsel %vm1287_vm9, %v5346_v52, %v5347_v3 }
 0x6bc   : > { %4730 = vperm.xlu1 %5212, %v4727_v50  }
 0x6bd   : > { %v3127_v23 = vsel %vm7827_vm1, %v5292_v7, %v5296_v10  ;;  %v3126_v15 = vsel %vm7827_vm1, %v5291_v19, %v5292_v7  ;;  %v3125_v63 = vsel %vm7827_vm1, %v7456_v56, %v5291_v19  ;;  %v7567_v5 = vpop.permute.xlu0 %5369  ;;  %v5326_v10 = vunpack.i.l.bf16 %v7483_v44  ;;  %vm7912_vm1 = vmmov %vm7909_vm13 }
 0x6be   : > { %v4572_v53 = vpack.c.bf16 %v3127_v23, %v3056_v35  ;;  %v3045_v20 = vpop.permute.xlu1 %3044  ;;  %v4571_v59 = vpack.c.bf16 %v3126_v15, %v3055_v28  ;;  %v3521_v7 = vmul.f32 %v3513_v38, %v6823_v16  ;;  %v5371_v24 = vunpack.i.l.bf16 %v7567_v5 }
 0x6bf   : > { %v3054_v17 = vsel %vm7826_vm2, %v3045_v20, %v5281_v47  ;;  %vm7911_vm2 = vcmask 64512  }
 0x6c0   : > { %v4570_v48 = vpack.c.bf16 %v3125_v63, %v3054_v17  ;;  %4641 = vmatprep.subr.bf16.mxu0 %v4571_v59  ;;  %4683 = vmatpush1.bf16.msra.mxu1 %v4572_v53  ;;  %v3341_v44 = vsel %vm7911_vm2, %v5326_v10, %v5327_v36  ;;  %v4585_v37 = vpack.c.bf16 %v3521_v7, %v3483_v34  ;;  %v7920_v17 = vld [vmem:[#allocation14_spill] sm:$0xff] }
 0x6c1   : > { %4684 = vmatprep.subr.bf16.mxu1 %v4577_v31  ;;  %v7576_v8 = vpop.permute.xlu0 %5379  ;;  %v4581_v6 = vpack.c.bf16 %v3412_v18, %v3341_v44  ;;  %v3509_v63 = vrot.slane %v3496_v61, %v7920_v17  ;;  %v7921_v31 = vld [vmem:[#allocation17_spill] sm:$0xff] }
 0x6c2   : > { %v5300_v60 = vpop.permute.xlu1 %5299  ;;  %4642 = vmatpush1.bf16.msra.mxu0 %v4570_v48  ;;  %v3505_v48 = vrot.slane %v3496_v61, %v7921_v31 }
 0x6c3   : > { %v5302_v58 = vunpack.i.h.bf16 %v5300_v60  ;;  %v5301_v57 = vunpack.i.l.bf16 %v5300_v60  ;;  %v5362_v60 = vunpack.i.h.bf16 %v7546_v11 }
 0x6c4   : > { %v3519_v18 = vmul.f32 %v3505_v48, %v6802_v40 }
 0x6c5   : > { %v3198_v25 = vsel %vm7828_vm0, %v5302_v58, %v5306_v43  ;;  %v3197_v26 = vsel %vm7828_vm0, %v5301_v57, %v5302_v58  ;;  %v7922_v58 = vld [vmem:[#allocation15_spill] sm:$0xff] }
 0x6c6   : > { %v5310_v56 = vpop.permute.xlu1 %5309 }
 0x6c7   : > { %v5312_v0 = vunpack.i.h.bf16 %v5310_v56  ;;  %v5311_v32 = vunpack.i.l.bf16 %v5310_v56  ;;  %v5351_v56 = vunpack.i.l.bf16 %v7525_v22 }
 0x6c9   : > { %v3269_v51 = vsel %vm7909_vm13, %v5312_v0, %v5316_v30  ;;  %v3268_v54 = vsel %vm7910_vm14, %v5311_v32, %v5312_v0  ;;  %v3267_v2 = vsel %vm7912_vm1, %v7471_v49, %v5311_v32  ;;  %v7584_v30 = vpop.permute.xlu0 %3717  ;;  %vm7914_vm1 = vmmov %vm7911_vm2  ;;  %v3520_v32 = vmul.f32 %v3509_v63, %v6804_v12 }
 0x6ca   : > { %v4576_v27 = vpack.c.bf16 %v3269_v51, %v3198_v25  ;;  %v3187_v14 = vpop.permute.xlu1 %3186  ;;  %v4575_v41 = vpack.c.bf16 %v3268_v54, %v3197_v26  ;;  %vm7915_vm2 = vmmov %vm7908_vm10 }
 0x6cb   : > { %v3196_v39 = vsel %vm7828_vm0, %v3187_v14, %v5301_v57  ;;  %vm7916_vm10 = vmmov %vm7914_vm1  ;;  %v3501_v57 = vrot.slane %v3496_v61, %v7922_v58  ;;  %v3657_v14 = vsel %vm1184_vm12, %v5361_v62, %v5362_v60 }
 0x6cc   : > { %v4574_v42 = vpack.c.bf16 %v3267_v2, %v3196_v39  ;;  %4643 = vmatprep.subr.bf16.mxu0 %v4575_v41  ;;  %4685 = vmatpush1.bf16.msra.mxu1 %v4576_v27  ;;  %vm7917_vm13 = vmmov %vm7915_vm2 }
 0x6cd   : > { %4686 = vmatprep.subr.bf16.mxu1 %v4581_v6  ;;  %v7593_v23 = vpop.permute.xlu0 %5389  ;;  %vm7918_vm14 = vmmov %vm7914_vm1  ;;  %v3518_v26 = vmul.f32 %v3501_v57, %v6785_v29  ;;  %v5382_v29 = vunpack.i.h.bf16 %v7576_v8 }
 0x6ce   : > { %v5320_v9 = vpop.permute.xlu1 %5319  ;;  %4644 = vmatpush1.bf16.msra.mxu0 %v4574_v42  ;;  %vm7919_vm0 = vmmov %vm7915_vm2  ;;  %v5381_v42 = vunpack.i.l.bf16 %v7576_v8  ;;  %v5392_v63 = vunpack.i.h.bf16 %v7593_v23  ;;  %v5391_v31 = vunpack.i.l.bf16 %v7593_v23 }
 0x6cf   : > { %v5322_v47 = vunpack.i.h.bf16 %v5320_v9  ;;  %v5321_v50 = vunpack.i.l.bf16 %v5320_v9 }
 0x6d1   : > { %v3340_v19 = vsel %vm7914_vm1, %v5322_v47, %v5326_v10  ;;  %v3339_v35 = vsel %vm7916_vm10, %v5321_v50, %v5322_v47  ;;  %v7605_v0 = vpop.permute.xlu0 %5399 }
 0x6d2   : > { %v5330_v55 = vpop.permute.xlu1 %5329 }
 0x6d3   : > { %v5332_v49 = vunpack.i.h.bf16 %v5330_v55  ;;  %v5331_v43 = vunpack.i.l.bf16 %v5330_v55 }
 0x6d5   : > { %v3411_v21 = vsel %vm7915_vm2, %v5332_v49, %v5336_v33  ;;  %v3410_v46 = vsel %vm7917_vm13, %v5331_v43, %v5332_v49  ;;  %v3409_v59 = vsel %vm7919_vm0, %v7496_v13, %v5331_v43  ;;  %v5352_v13 = vunpack.i.h.bf16 %v7525_v22  ;;  %v7615_v40 = vpop.permute.xlu0 %3859 }
 0x6d6   : > { %v4580_v28 = vpack.c.bf16 %v3411_v21, %v3340_v19  ;;  %v3329_v15 = vpop.permute.xlu1 %3328  ;;  %v4579_v53 = vpack.c.bf16 %v3410_v46, %v3339_v35  ;;  %vm7923_vm0 = vcmask 973824   ;;  %v3585_v19 = vsel %vm1258_vm15, %v7559_v1, %v5351_v56 }
 0x6d7   : > { %v3338_v20 = vsel %vm7918_vm14, %v3329_v15, %v5321_v50  ;;  %v3586_v12 = vsel %vm1258_vm15, %v5351_v56, %v5352_v13  ;;  %v3799_v7 = vsel %vm7923_vm0, %v5381_v42, %v5382_v29  ;;  %v3727_v56 = vsel %vm1110_vm11, %v7584_v30, %v5371_v24 }
 0x6d8   : > { %v4578_v16 = vpack.c.bf16 %v3409_v59, %v3338_v20  ;;  %4645 = vmatprep.subr.bf16.mxu0 %v4579_v53  ;;  %4687 = vmatpush1.bf16.msra.mxu1 %v4580_v28  ;;  %v4587_v44 = vpack.c.bf16 %v3657_v14, %v3586_v12  ;;  %v5402_v59 = vunpack.i.h.bf16 %v7605_v0  ;;  %vm7935_vm2 = vcmask 449536  }
 0x6d9   : > { %4688 = vmatprep.subr.bf16.mxu1 %v4585_v37  ;;  %v7621_v38 = vpop.permute.xlu0 %5409  ;;  %v5401_v37 = vunpack.i.l.bf16 %v7605_v0  ;;  %vm7936_vm10 = vmmov %vm7935_vm2 }
 0x6da   : > { %v5340_v33 = vpop.permute.xlu1 %5339  ;;  %4646 = vmatpush1.bf16.msra.mxu0 %v4578_v16  ;;  %v5411_v12 = vunpack.i.l.bf16 %v7621_v38  ;;  %vm7937_vm13 = vmmov %vm7935_vm2 }
 0x6db   : > { %v5342_v36 = vunpack.i.h.bf16 %v5340_v33  ;;  %v5341_v10 = vunpack.i.l.bf16 %v5340_v33  ;;  %vm7938_vm14 = vmmov %vm7935_vm2 }
 0x6dd   : > { %v3482_v25 = vsel %vm1287_vm9, %v5342_v36, %v5346_v52  ;;  %v3481_v11 = vsel %vm1287_vm9, %v5341_v10, %v5342_v36  ;;  %v5372_v52 = vunpack.i.h.bf16 %v7567_v5  ;;  %v7632_v28 = vpop.permute.xlu0 %5419 }
 0x6de   : > { %v4584_v51 = vpack.c.bf16 %v3520_v32, %v3482_v25  ;;  %v3471_v54 = vpop.permute.xlu1 %3470  ;;  %v4583_v27 = vpack.c.bf16 %v3519_v18, %v3481_v11  ;;  %v3870_v32 = vsel %vm408_vm8, %v5391_v31, %v5392_v63 }
 0x6df   : > { %v3480_v41 = vsel %vm1287_vm9, %v3471_v54, %v5341_v10  ;;  %v3728_v35 = vsel %vm1110_vm11, %v5371_v24, %v5372_v52  ;;  %vm7924_vm9 = vmmov %vm7923_vm0  ;;  %v5422_v54 = vunpack.i.h.bf16 %v7632_v28 }
 0x6e0   : > { %v4582_v22 = vpack.c.bf16 %v3518_v26, %v3480_v41  ;;  %4647 = vmatprep.subr.bf16.mxu0 %v4583_v27  ;;  %4689 = vmatpush1.bf16.msra.mxu1 %v4584_v51  ;;  %v4591_v46 = vpack.c.bf16 %v3799_v7, %v3728_v35  ;;  %v5421_v27 = vunpack.i.l.bf16 %v7632_v28 }
 0x6e1   : > { %v7638_v48 = vpop.permute.xlu0 %4001 }
 0x6e2   : > { %v5355_v39 = vpop.permute.xlu1 %5354  ;;  %4648 = vmatpush1.bf16.msra.mxu0 %v4582_v22  ;;  %v5412_v22 = vunpack.i.h.bf16 %v7621_v38 }
 0x6e3   : > { %4649 = vmatprep.subr.bf16.mxu0 %v4587_v44  ;;  %v5357_v2 = vunpack.i.h.bf16 %v5355_v39  ;;  %v5356_v6 = vunpack.i.l.bf16 %v5355_v39 }
 0x6e5   : > { %v3587_v47 = vsel %vm1258_vm15, %v5352_v13, %v5356_v6  ;;  %v3588_v55 = vsel %vm1258_vm15, %v5356_v6, %v5357_v2  ;;  %v3941_v13 = vsel %vm482_vm7, %v5401_v37, %v5402_v59  ;;  %vm7926_vm15 = vmmov %vm7923_vm0  ;;  %v7649_v25 = vpop.permute.xlu0 %5429 }
 0x6e6   : > { %v5365_v9 = vpop.permute.xlu1 %5364  ;;  %v4595_v18 = vpack.c.bf16 %v3941_v13, %v3870_v32 }
 0x6e7   : > { %v5367_v61 = vunpack.i.h.bf16 %v5365_v9  ;;  %v5366_v3 = vunpack.i.l.bf16 %v5365_v9 }
 0x6e9   : > { %v3658_v50 = vsel %vm1184_vm12, %v5362_v60, %v5366_v3  ;;  %v3659_v49 = vsel %vm1184_vm12, %v5366_v3, %v5367_v61  ;;  %v7655_v44 = vpop.permute.xlu0 %5439  ;;  %v4083_v3 = vsel %vm630_vm5, %v5421_v27, %v5422_v54 }
 0x6ea   : > { %v4588_v43 = vpack.c.bf16 %v3658_v50, %v3587_v47  ;;  %v3647_v34 = vpop.permute.xlu1 %3646  ;;  %v4589_v8 = vpack.c.bf16 %v3659_v49, %v3588_v55  ;;  %v4012_v47 = vsel %vm556_vm6, %v5411_v12, %v5412_v22  ;;  %v5441_v7 = vunpack.i.l.bf16 %v7655_v44 }
 0x6eb   : > { %v3656_v5 = vsel %vm1184_vm12, %v3647_v34, %v5361_v62  ;;  %vm7925_vm12 = vmmov %vm7923_vm0  ;;  %v4599_v50 = vpack.c.bf16 %v4083_v3, %v4012_v47  ;;  %vm7939_vm0 = vcmask 1043456  }
 0x6ec   : > { %v4586_v21 = vpack.c.bf16 %v3656_v5, %v3585_v19  ;;  %4690 = vmatprep.subr.bf16.mxu1 %v4589_v8  ;;  %v5442_v8 = vunpack.i.h.bf16 %v7655_v44 }
 0x6ed   : > { %4691 = vmatpush1.bf16.msra.mxu1 %v4588_v43  ;;  %v4215_v55 = vpop.permute.xlu0 %4214 }
 0x6ee   : > { %v5375_v15 = vpop.permute.xlu1 %5374  ;;  %4650 = vmatpush1.bf16.msra.mxu0 %v4586_v21  ;;  %v5431_v21 = vunpack.i.l.bf16 %v7649_v25 }
 0x6ef   : > { %4651 = vmatprep.subr.bf16.mxu0 %v4591_v46  ;;  %v5377_v53 = vunpack.i.h.bf16 %v5375_v15  ;;  %v5376_v20 = vunpack.i.l.bf16 %v5375_v15 }
 0x6f1   : > { %v3729_v60 = vsel %vm1110_vm11, %v5372_v52, %v5376_v20  ;;  %v3730_v33 = vsel %vm1110_vm11, %v5376_v20, %v5377_v53  ;;  %v3869_v52 = vsel %vm408_vm8, %v7615_v40, %v5391_v31  ;;  %v5455_v35 = vpop.permute.xlu0 %5454  ;;  %v5267_v20 = vunpack.i.h.bf16 %v7510_v45 }
 0x6f2   : > { %v5385_v1 = vpop.permute.xlu1 %5384  ;;  %v5457_v32 = vunpack.i.h.bf16 %v5455_v35 }
 0x6f3   : > { %v5387_v16 = vunpack.i.h.bf16 %v5385_v1  ;;  %v5386_v17 = vunpack.i.l.bf16 %v5385_v1 }
 0x6f5   : > { %v3800_v62 = vsel %vm7924_vm9, %v5382_v29, %v5386_v17  ;;  %v3801_v58 = vsel %vm7925_vm12, %v5386_v17, %v5387_v16  ;;  %v4225_v16 = vsel %vm601_vm3, %v5441_v7, %v5442_v8  ;;  %v4011_v17 = vsel %vm556_vm6, %v7638_v48, %v5411_v12  ;;  %vm7940_vm9 = vmmov %vm7939_vm0 }
 0x6f6   : > { %v4592_v57 = vpack.c.bf16 %v3800_v62, %v3729_v60  ;;  %v3789_v36 = vpop.permute.xlu1 %3788  ;;  %v4593_v10 = vpack.c.bf16 %v3801_v58, %v3730_v33  ;;  %v4154_v60 = vsel %vm675_vm4, %v5267_v20, %v5431_v21  ;;  %v5465_v33 = vpop.permute.xlu0 %5464  ;;  %vm7941_vm12 = vmmov %vm7939_vm0 }
 0x6f7   : > { %v3798_v23 = vsel %vm7926_vm15, %v3789_v36, %v5381_v42  ;;  %v4603_v62 = vpack.c.bf16 %v4225_v16, %v4154_v60  ;;  %v4224_v36 = vsel %vm601_vm3, %v4215_v55, %v5441_v7  ;;  %v5466_v13 = vunpack.i.l.bf16 %v5465_v33  ;;  %vm7942_vm15 = vmmov %vm7939_vm0 }
 0x6f8   : > { %v4590_v0 = vpack.c.bf16 %v3798_v23, %v3727_v56  ;;  %4692 = vmatprep.subr.bf16.mxu1 %v4593_v10  ;;  %v5467_v10 = vunpack.i.h.bf16 %v5465_v33  ;;  %v4861_v16 = vcombine.low %v7515_v4, %v7515_v4 }
 0x6f9   : > { %4693 = vmatpush1.bf16.msra.mxu1 %v4592_v57  ;;  %v5432_v57 = vunpack.i.h.bf16 %v7649_v25 }
 0x6fa   : > { %v5395_v11 = vpop.permute.xlu1 %5394  ;;  %4652 = vmatpush1.bf16.msra.mxu0 %v4590_v0 }
 0x6fb   : > { %4653 = vmatprep.subr.bf16.mxu0 %v4595_v18  ;;  %v5397_v51 = vunpack.i.h.bf16 %v5395_v11  ;;  %v5396_v26 = vunpack.i.l.bf16 %v5395_v11  ;;  %v5456_v18 = vunpack.i.l.bf16 %v5455_v35 }
 0x6fd   : > { %v3871_v39 = vsel %vm408_vm8, %v5392_v63, %v5396_v26  ;;  %v3872_v6 = vsel %vm408_vm8, %v5396_v26, %v5397_v51  ;;  %v4155_v26 = vsel %vm675_vm4, %v5431_v21, %v5432_v57 }
 0x6fe   : > { %v5405_v30 = vpop.permute.xlu1 %5404 }
 0x6ff   : > { %v5407_v14 = vunpack.i.h.bf16 %v5405_v30  ;;  %v5406_v41 = vunpack.i.l.bf16 %v5405_v30 }
 0x701   : > { %v3942_v2 = vsel %vm482_vm7, %v5402_v59, %v5406_v41  ;;  %v3943_v29 = vsel %vm482_vm7, %v5406_v41, %v5407_v14  ;;  %v4357_v14 = vpop.permute.xlu0 %4356 }
 0x702   : > { %v4596_v42 = vpack.c.bf16 %v3942_v2, %v3871_v39  ;;  %v3931_v9 = vpop.permute.xlu1 %3930  ;;  %v4597_v61 = vpack.c.bf16 %v3943_v29, %v3872_v6 }
 0x703   : > { %v3940_v24 = vsel %vm482_vm7, %v3931_v9, %v5401_v37 }
 0x704   : > { %v4594_v38 = vpack.c.bf16 %v3940_v24, %v3869_v52  ;;  %4694 = vmatprep.subr.bf16.mxu1 %v4597_v61 }
 0x705   : > { %4695 = vmatpush1.bf16.msra.mxu1 %v4596_v42  ;;  %v5475_v61 = vpop.permute.xlu0 %5474 }
 0x706   : > { %v5415_v49 = vpop.permute.xlu1 %5414  ;;  %4654 = vmatpush1.bf16.msra.mxu0 %v4594_v38 }
 0x707   : > { %4655 = vmatprep.subr.bf16.mxu0 %v4599_v50  ;;  %v5417_v43 = vunpack.i.h.bf16 %v5415_v49  ;;  %v5416_v34 = vunpack.i.l.bf16 %v5415_v49  ;;  %v5477_v49 = vunpack.i.h.bf16 %v5475_v61 }
 0x709   : > { %v4013_v46 = vsel %vm556_vm6, %v5412_v22, %v5416_v34  ;;  %v4014_v15 = vsel %vm556_vm6, %v5416_v34, %v5417_v43  ;;  %vm7928_vm6 = vcmask 465920   ;;  %v5476_v43 = vunpack.i.l.bf16 %v5475_v61 }
 0x70a   : > { %v5425_v19 = vpop.permute.xlu1 %5424  ;;  %v4298_v44 = vsel %vm7928_vm6, %v5456_v18, %v5457_v32 }
 0x70b   : > { %v5427_v40 = vunpack.i.h.bf16 %v5425_v19  ;;  %v5426_v5 = vunpack.i.l.bf16 %v5425_v19  ;;  %v4439_v21 = vsel %vm7935_vm2, %v5476_v43, %v5477_v49 }
 0x70d   : > { %v4084_v28 = vsel %vm630_vm5, %v5422_v54, %v5426_v5  ;;  %v4085_v53 = vsel %vm630_vm5, %v5426_v5, %v5427_v40 }
 0x70e   : > { %v4600_v59 = vpack.c.bf16 %v4084_v28, %v4013_v46  ;;  %v4073_v37 = vpop.permute.xlu1 %4072  ;;  %v4601_v1 = vpack.c.bf16 %v4085_v53, %v4014_v15 }
 0x70f   : > { %v4082_v63 = vsel %vm630_vm5, %v4073_v37, %v5421_v27  ;;  %vm7927_vm5 = vcmask 457728  }
 0x710   : > { %v4598_v31 = vpack.c.bf16 %v4082_v63, %v4011_v17  ;;  %4696 = vmatprep.subr.bf16.mxu1 %v4601_v1  ;;  %v4369_v30 = vsel %vm7927_vm5, %v5466_v13, %v5467_v10  ;;  %v4721_v63 = vpop.permute.xlu0 %4720 }
 0x711   : > { %4697 = vmatpush1.bf16.msra.mxu1 %v4600_v59  ;;  %v4609_v39 = vpack.c.bf16 %v4369_v30, %v4298_v44 }
 0x712   : > { %v5435_v58 = vpop.permute.xlu1 %5434  ;;  %4656 = vmatpush1.bf16.msra.mxu0 %v4598_v31 }
 0x713   : > { %v5437_v45 = vunpack.i.h.bf16 %v5435_v58  ;;  %4657 = vmatprep.subr.bf16.mxu0 %v4603_v62  ;;  %v5436_v48 = vunpack.i.l.bf16 %v5435_v58 }
 0x715   : > { %v4153_v56 = vsel %vm675_vm4, %v5437_v45, %v5267_v20  ;;  %v4156_v25 = vsel %vm675_vm4, %v5432_v57, %v5436_v48  ;;  %vm7929_vm4 = vmmov %vm7928_vm6  ;;  %v4612_v20 = vpack.c.bf16 %v4439_v21, %v4439_v21 }
 0x716   : > { %v4602_v23 = vpack.c.bf16 %v4224_v36, %v4153_v56  ;;  %v5445_v0 = vpop.permute.xlu1 %5444  ;;  %vm7931_vm7 = vmmov %vm7929_vm4 }
 0x717   : > { %v5447_v11 = vunpack.i.h.bf16 %v5445_v0  ;;  %v5446_v51 = vunpack.i.l.bf16 %v5445_v0  ;;  %vm7933_vm11 = vmmov %vm7929_vm4  ;;  %v4630_v17 = vsel %vm7942_vm15, %v4612_v20, 0  ;;  %v5486_v0 = vld [vmem:[%s5830_s16] sm:$0xff] }
 0x718   : > { %4658 = vmatpush1.bf16.msra.mxu0 %v4602_v23 }
 0x719   : > { %v4226_v54 = vsel %vm601_vm3, %v5442_v8, %v5446_v51  ;;  %v4227_v27 = vsel %vm601_vm3, %v5446_v51, %v5447_v11  ;;  %vm7930_vm3 = vmmov %vm7927_vm5  ;;  %v5487_v51 = vld [vmem:[%s5830_s16 + $0x8] sm:$0xff] }
 0x71a   : > { %v4604_v41 = vpack.c.bf16 %v4226_v54, %v4155_v26  ;;  %v5450_v22 = vpop.permute.xlu1 %5449  ;;  %v4605_v12 = vpack.c.bf16 %v4227_v27, %v4156_v25  ;;  %vm7932_vm8 = vmmov %vm7930_vm3  ;;  %v5488_v27 = vld [vmem:[%s5830_s16 + $0x10] sm:$0xff] }
 0x71b   : > { %v5452_v2 = vunpack.i.h.bf16 %v5450_v22  ;;  %v5451_v6 = vunpack.i.l.bf16 %v5450_v22  ;;  %vm7934_vm1 = vmmov %vm7930_vm3 }
 0x71c   : > { %4698 = vmatprep.subr.bf16.mxu1 %v4605_v12 }
 0x71d   : > { %4699 = vmatpush1.bf16.msra.mxu1 %v4604_v41  ;;  %v4297_v3 = vsel %vm7929_vm4, %v5452_v2, %v5456_v18  ;;  %v4296_v24 = vsel %vm7931_vm7, %v5451_v6, %v5452_v2  ;;  %v5489_v41 = vld [vmem:[%s5830_s16 + $0x18] sm:$0xff]  ;;  %s5642_s16 = smov [#allocation9]  }
 0x71e   : > { %v5460_v29 = vpop.permute.xlu1 %5459  ;;  %4700 = vmatprep.subr.bf16.mxu1 %v4609_v39  ;;  %s5552_s19 = sshll.u32 %s5642_s16, 4  ;;  %s5553_s19 = int_to_ptr.vmem [resolvable:$false] %s5552_s19 }
 0x71f   : > { %v5462_v42 = vunpack.i.h.bf16 %v5460_v29  ;;  %v5461_v9 = vunpack.i.l.bf16 %v5460_v29  ;;  %s5554_s14 = scalar_lea.vmem %s5553_s19, 1024  ;;  %p5555_p10 = scmp.lt.s32.totalorder %s7716_s17, %s5553_s19 }
 0x720   : > { %p5556_p13 = scmp.lt.s32.totalorder %s5554_s14, %s5548_s18 }
 0x721   : > { %v4368_v52 = vsel %vm7930_vm3, %v5462_v42, %v5466_v13  ;;  %v4367_v38 = vsel %vm7932_vm8, %v5461_v9, %v5462_v42  ;;  %v4366_v8 = vsel %vm7934_vm1, %v4357_v14, %v5461_v9 }
 0x722   : > { %v4608_v47 = vpack.c.bf16 %v4368_v52, %v4297_v3  ;;  %v4286_v50 = vpop.permute.xlu1 %4285  ;;  %v4607_v55 = vpack.c.bf16 %v4367_v38, %v4296_v24  ;;  %p5557_p3 = por %p5556_p13, %p5555_p10 }
 0x723   : > { %v4295_v34 = vsel %vm7933_vm11, %v4286_v50, %v5451_v6 }
 0x724   : > { %v4606_v7 = vpack.c.bf16 %v4366_v8, %v4295_v34  ;;  %4659 = vmatprep.subr.bf16.mxu0 %v4607_v55  ;;  %4701 = vmatpush1.bf16.msra.mxu1 %v4608_v47  ;;  %p5558_p7 = pnand %p5557_p3, %p5551_p8 }
 0x726   : > { %v5470_v19 = vpop.permute.xlu1 %5469  ;;  %4660 = vmatpush1.bf16.msra.mxu0 %v4606_v7 }
 0x727   : > { %v5472_v40 = vunpack.i.h.bf16 %v5470_v19  ;;  %v5471_v5 = vunpack.i.l.bf16 %v5470_v19 }
 0x729   : > { %v4438_v35 = vsel %vm7936_vm10, %v5472_v40, %v5476_v43  ;;  %v4437_v46 = vsel %vm7937_vm13, %v5471_v5, %v5472_v40 }
 0x72a   : > { %v4611_v28 = vpack.c.bf16 %v4438_v35, %v4438_v35  ;;  %v4436_v15 = vpop.permute.xlu1 %4435  ;;  %v4610_v53 = vpack.c.bf16 %v4437_v46, %v4437_v46 }
 0x72b   : > { %v4440_v59 = vsel %vm7938_vm14, %v5477_v49, %v4436_v15 }
 0x72c   : > { %v4613_v37 = vpack.c.bf16 %v4440_v59, %v4440_v59  ;;  %4863 = vmatprep.subr.msk.bf16.mxu0 %vm7939_vm0, %v4611_v28  ;;  %v4624_v1 = vsel %vm7940_vm9, %v4610_v53, 0 }
 0x72d   : > { %4662 = vmatpush1.bf16.msra.mxu0 %v4624_v1 }
 0x72e   : > { %4865 = vmatprep.subr.msk.bf16.mxu1 %vm7941_vm12, %v4613_v37 }
 0x72f   : > { %4703 = vmatpush1.bf16.msra.mxu1 %v4630_v17 }
 0x730   : > { %4668 = vmatmul.mubr.bf16.vlgmr.msra.gmra.mrb[4].mxu0 %v4861_v16 }
 0x732   : > { %4709 = vmatmul.mubr.bf16.vlgmr.msra.gmra.mrb[4].mxu1 %v4861_v16 }
 0x73b   : > { %v4731_v60 = vpop.permute.xlu1 %4730 }
 0x803   : > { %v4669_v31 = vpop.f32.mrb[4].mxu0 }
 0x804   : > { %v4723_v62 = vmul.f32 %v4721_v63, %v4669_v31  ;;  %v4671_v33 = vpop.f32.mrb[5].mxu0 }
 0x805   : > { %v4724_v58 = vmul.f32 %v4721_v63, %v4671_v33  ;;  %v4673_v45 = vpop.f32.mrb[6].mxu0  ;;  %v4710_v57 = vpop.f32.mrb[4].mxu1 }
 0x806   : > { %v4733_v4 = vadd.f32 %v4731_v60, %v4723_v62  ;;  %v4725_v36 = vmul.f32 %v4721_v63, %v4710_v57  ;;  %v4674_v10 = vpop.f32.mrb[7].mxu0  ;;  %v4712_v13 = vpop.f32.mrb[5].mxu1 }
 0x807   : > { %v4734_v48 = vadd.f32 %v4731_v60, %v4724_v58  ;;  %v4726_v56 = vmul.f32 %v4721_v63, %v4712_v13  ;;  %v4714_v23 = vpop.f32.mrb[6].mxu1 }
 0x808   : > { %v4737_v32 = vadd.f32 %v5486_v0, %v4733_v4  ;;  %v4735_v18 = vadd.f32 %v4731_v60, %v4725_v36  ;;  %v4715_v11 = vpop.f32.mrb[7].mxu1 }
 0x809   : > { %v4738_v26 = vadd.f32 %v5487_v51, %v4734_v48  ;;  %v4736_v54 = vadd.f32 %v4731_v60, %v4726_v56 }
 0x80a   : > { %v4741_v25 = vmax.f32 %v4737_v32, 0.0  ;;  %v4739_v30 = vadd.f32 %v5488_v27, %v4735_v18 }
 0x80b   : > { %v4742_v14 = vmax.f32 %v4738_v26, 0.0  ;;  %v4740_v22 = vadd.f32 %v5489_v41, %v4736_v54 }
 0x80c   : > { %4745 = vst [vmem:[%s336_s21] sm:$0xff] %v4741_v25  ;;  %v4743_v12 = vmax.f32 %v4739_v30, 0.0 }
 0x80d   : > { %4746 = vst [vmem:[%s336_s21 + $0x8] sm:$0xff] %v4742_v14  ;;  %v4744_v44 = vmax.f32 %v4740_v22, 0.0 }
 0x80e   : > { %4747 = vst [vmem:[%s336_s21 + $0x10] sm:$0xff] %v4743_v12 }
 0x80f   : > { %4748 = vst [vmem:[%s336_s21 + $0x18] sm:$0xff] %v4744_v44 }
 0x810   : > { %5561 = shalt.err (!%p5558_p7)
}
 0x811   : > { %s5562_s20 = scalar_lea.hbm %s7714_s25, 512  ;;  %s5566_s2 = scalar_lea.hbm %s7766_s8, 1024 }
 0x812   : > { %p5563_p9 = scmp.ne.s32.totalorder %s7714_s25, %s5562_s20  ;;  %p5567_p0 = scmp.lt.u32.totalorder %s7714_s25, %s7766_s8 }
 0x813   : > { %p5568_p11 = scmp.lt.u32.totalorder %s5566_s2, %s5562_s20  ;;  %p5570_p4 = scmp.lt.u32.totalorder %s5562_s20, %s7714_s25 }
 0x814   : > { %p5564_p2 = pnand %p5563_p9, %p5779_p12 }
 0x815   : > { %p5569_p1 = por %p5568_p11, %p5567_p0 }
 0x816   : > { %p5565_p5 = pneg %p5564_p2 }
 0x817   : > { %p5571_p6 = por %p5570_p4, %p5569_p1 }
 0x819   : > { %p5572_p8 = pnand %p5571_p6, %p5565_p5 }
 0x81b   : > { %5575 = shalt.err (!%p5572_p8)
}
 0x81c   : > { %4880 = dma.vmem_to_hbm [thread:$0]  (%p5779_p12), %s7716_s17, 512, %s7714_s25, %s4750_s9  }
 0x81d PF: > { %s4776_s3 = sand.u32 1, %s5606_s27   ;;  %p7944_p10 = scmp.ne.s32.totalorder %s7835_s12, 0 }
 0x81e   : > { %p7945_p13 = scmp.ge.s32.totalorder %s5618_s30, 2  ;;  %s4777_s7 = scalar_lea.sflag [#allocation6], %s4776_s3 }
 0x820   : > { %p4891_p3 = pnand %p7945_p13, %p7944_p10 }
 0x822   : > { %5601 = dma.done.wait (!%p4891_p3), %s4777_s7, 512  }
 0x823   : > { %5603 = vsyncadd (!%p4891_p3), %s4777_s7, 4294966784  ;;  %s7946_s30 = sld [smem:[#allocation13_spill]]  ;;  %s7947_s27 = smov %s5610_s28 }
 0x824   : > { %s7948_s28 = smov %s5614_s29  ;;  %s7949_s29 = smov %s5775_s23 }
 0x829   : > { %p22_p7 = scmp.ge.s32.totalorder %s7946_s30, 4  }
 0x82b   :  { %24 = sbr.rel (!%p22_p7) target bundleno = 12 (0xc), region = 127 }
 0x832   :  { %4782 = vsyncpa [#allocation5], 1 }
 0x833   :  { %4784 = vsyncpa [#allocation5 + $0x1], 1 }
 0x834   :  { %4785 = vsyncpa [#allocation8], 1 }
 0x835   :  { %4786 = vsyncpa [#allocation6], 1 }
 0x836   :  { %4788 = vsyncpa [#allocation6 + $0x1], 1 }

</bundles_post_ra>
